<compile_context>
chip_gen: v5e
topology: v5e:2x2
jax: 0.10.0
libtpu: 0.0.40
codegen_flags: <defaults>
</compile_context>

<pallas_src>
import jax
import jax.numpy as jnp
from jax import lax
from jax.experimental import pallas as pl
from jax.experimental.pallas import tpu as pltpu


# ----------------------------------------------------------------------------
# Kernel
# ----------------------------------------------------------------------------
def _attention_gru_kernel(mask_ref, feat_ref, wih_ref, whh_ref,
                          bih_ref, bhn_ref, aw_ref, ab_ref,
                          out_ref,
                          gx_ref, h_ref, m_ref, d_ref, acc_ref):
    # Grid: (batch tile i [parallel], time chunk t [arbitrary]).
    #   mask_ref: (1, tb, Tc)   feat_ref: (Tc, tb, Dp)
    #   wih_ref:  (Dp, 3Hp)     whh_ref:  (Hp, 3Hp)
    #   bih_ref:  (1, 3Hp)  b_ih with b_hr / b_hz folded in
    #   bhn_ref:  (1, Hp)   b_hn (stays inside the r * (...) term)
    #   aw_ref:   (1, Hp)       ab_ref:   (1, 1) in SMEM
    #   out_ref:  (tb, Hp)
    # Scratch (persists across the time grid axis):
    #   gx_ref (Tc*tb, 3Hp) f32, h/m/d/acc carries.
    t = pl.program_id(1)
    n_t = pl.num_programs(1)
    Tc, tb, Dp = feat_ref.shape
    Hp = whh_ref.shape[0]
    f32 = jnp.float32

    @pl.when(t == 0)
    def _init():
        h_ref[...] = jnp.zeros_like(h_ref)
        m_ref[...] = jnp.full(m_ref.shape, -jnp.inf, f32)
        d_ref[...] = jnp.zeros_like(d_ref)
        acc_ref[...] = jnp.zeros_like(acc_ref)

    # Small hoisted loads; kept (1, X) so Mosaic broadcasts at the use site
    # instead of pinning (tb, X) vregs for the whole kernel.
    whh = whh_ref[...]                                  # (Hp, 3Hp) mm dtype
    bih = bih_ref[...].astype(f32)                      # (1, 3Hp)
    bhn = bhn_ref[...].astype(f32)                      # (1, Hp)
    aw = aw_ref[...].astype(f32)                        # (1, Hp)
    ab = ab_ref[0, 0]                                   # SMEM scalar

    # Input projection for all Tc steps of this chunk in ONE MXU matmul
    # (off the serial dependency chain).  tb % 8 == 0 keeps the reshape
    # tile-aligned.
    x = feat_ref[...].reshape(Tc * tb, Dp)
    gx_ref[...] = jnp.dot(x, wih_ref[...], preferred_element_type=f32) + bih

    # Load carries once per chunk; carry SSA values through the unrolled
    # serial loop, store back once at the end of the chunk.
    h = h_ref[...]
    m = m_ref[...]
    denom = d_ref[...]
    acc = acc_ref[...]

    for tt in range(Tc):                                # statically unrolled
        gh = jnp.dot(h.astype(whh.dtype), whh,
                     preferred_element_type=f32)        # (tb, 3Hp)
        lo, hi = tt * tb, (tt + 1) * tb
        # Gate slices are 128-lane aligned because H is padded to Hp.
        r = jax.nn.sigmoid(gx_ref[lo:hi, 0:Hp] + gh[:, 0:Hp])
        z = jax.nn.sigmoid(gx_ref[lo:hi, Hp:2 * Hp] + gh[:, Hp:2 * Hp])
        n = jnp.tanh(gx_ref[lo:hi, 2 * Hp:3 * Hp]
                     + r * (gh[:, 2 * Hp:3 * Hp] + bhn))
        h = (1.0 - z) * n + z * h                       # (tb, Hp)

        # Attention score (XLU lane reduce; overlaps next step's matmul).
        s = jnp.sum(h * aw, axis=-1, keepdims=True) + ab   # (tb, 1)

        # Online softmax over time; the mask multiplies the numerator only,
        # which is exactly softmax -> mask -> weighted-sum as in PyTorch.
        m_new = jnp.maximum(m, s)
        alpha = jnp.exp(m - m_new)
        p = jnp.exp(s - m_new)
        denom = alpha * denom + p
        acc = alpha * acc + (p * mask_ref[0, :, tt:tt + 1]) * h
        m = m_new

    h_ref[...] = h
    m_ref[...] = m
    d_ref[...] = denom
    acc_ref[...] = acc

    @pl.when(t == n_t - 1)
    def _finalize():
        # TODO(synk): training-mode dropout on the attention weights would use
        # pltpu.prng_seed / pltpu.prng_random_bits; eval mode => identity.
        out_ref[...] = (acc / denom).astype(out_ref.dtype)


# ----------------------------------------------------------------------------
# Wrapper
# ----------------------------------------------------------------------------
def _round_up(x, m):
    return ((x + m - 1) // m) * m


def _pad_axis(x, axis, new_size):
    if x.shape[axis] == new_size:
        return x
    pad = [(0, 0)] * x.ndim
    pad[axis] = (0, new_size - x.shape[axis])
    return jnp.pad(x, pad)


def _pick_batch_tile(B):
    """Fill the 256-row MXU when the batch allows and keep >= 2 batch-tile
    grid programs for B > 8 so v7x's two TensorCores both get work."""
    if B >= 512:
        return 256
    if B > 128:
        return 128
    if B > 8:
        return _round_up((B + 1) // 2, 8)
    return _round_up(max(B, 1), 8)


def _pick_time_chunk(T, tb, Dp, Hp, mm_bytes, budget=8 << 20, max_steps=32):
    """Largest divisor of T whose per-chunk VMEM footprint fits the budget."""
    per_row = 3 * Hp * 4 + 2 * Dp * mm_bytes   # gx scratch + 2x feature buffer
    limit = max(1, min(T, max_steps, budget // max(1, tb * per_row)))
    for tc in range(limit, 0, -1):
        if T % tc == 0:
            return tc
    return 1


def _block_bytes(shape, dtype):
    itemsize = jnp.dtype(dtype).itemsize
    lanes = _round_up(shape[-1], 128)
    subl = _round_up(shape[-2], 8) if len(shape) >= 2 else 1
    lead = 1
    for s in shape[:-2]:
        lead *= int(s)
    return lead * subl * lanes * itemsize


def attention_gru_pallas(p_mask, feature, params, *, matmul_dtype=jnp.bfloat16):
    """p_mask: (B, T), feature: (B, T, D) float32 -> (B, H) float32.

    matmul_dtype: dtype for the MXU matmuls (feature, W_ih, W_hh); default
    bf16 with f32 accumulation and f32 h/acc/softmax state.  Pass jnp.float32
    for tight parity with an f32 reference.
    """
    B, T, D = feature.shape
    H = params["w_hh"].shape[0]
    f32 = jnp.float32
    mm_dtype = jnp.dtype(matmul_dtype)
    mm_bytes = mm_dtype.itemsize

    Hp = _round_up(H, 128)                  # lane-dense hidden dim
    Dp = _round_up(D, 128)                  # lane-dense feature dim
    tb = _pick_batch_tile(B)
    Bp = _round_up(B, tb)
    Tc = _pick_time_chunk(T, tb, Dp, Hp, mm_bytes)
    n_t = T // Tc

    # ---- parameters: per-gate lane padding + bias folding -------------------
    def pad_gated_w(w, in_dim, in_pad):     # (in_dim, 3H) -> (in_pad, 3Hp)
        w3 = w.astype(f32).reshape(in_dim, 3, H)
        w3 = _pad_axis(_pad_axis(w3, 0, in_pad), 2, Hp)
        return w3.reshape(in_pad, 3 * Hp).astype(mm_dtype)

    def pad_gated_b(b):                     # (1, 3H) -> (1, 3Hp)
        b3 = _pad_axis(b.astype(f32).reshape(1, 3, H), 2, Hp)
        return b3.reshape(1, 3 * Hp)

    w_ih = pad_gated_w(params["w_ih"], D, Dp)
    w_hh = pad_gated_w(params["w_hh"], H, Hp)
    b_ih = params["b_ih"].astype(f32)
    b_hh = params["b_hh"].astype(f32)
    # PyTorch GRU: r/z use (b_i* + b_h*) outside the nonlinearity -> fold
    # those into the hoisted GX projection; only b_hn stays inside r*(...).
    b_fold = pad_gated_b(jnp.concatenate(
        [b_ih[:, :2 * H] + b_hh[:, :2 * H], b_ih[:, 2 * H:]], axis=1))
    b_hn = _pad_axis(b_hh[:, 2 * H:], 1, Hp)                      # (1, Hp)
    attn_w = _pad_axis(params["attn_w"].astype(f32), 1, Hp)       # (1, Hp)
    attn_b = params["attn_b"].astype(f32).reshape(1, 1)

    # ---- activations ---------------------------------------------------------
    # Feature time-major so the per-step gx slice is one contiguous (tb, 3Hp)
    # slab in the serial loop (no per-step sublane gathers).
    # TODO(synk): consuming batch-major (B, T, D) directly would remove this
    # XLA pre-pass at the cost of per-step sublane gathers in the inner loop.
    feat = jnp.transpose(feature, (1, 0, 2))                      # (T, B, D)
    feat = _pad_axis(_pad_axis(feat, 1, Bp), 2, Dp).astype(mm_dtype)
    # Mask as (n_t, Bp, Tc): batch on sublanes, time on lanes -> tiny blocks.
    mask = _pad_axis(p_mask.astype(f32), 0, Bp)                   # (Bp, T)
    mask = jnp.transpose(mask.reshape(Bp, n_t, Tc), (1, 0, 2))    # (n_t,Bp,Tc)

    grid = (Bp // tb, n_t)
    in_specs = [
        pl.BlockSpec((1, tb, Tc), lambda i, t: (t, i, 0)),        # mask
        pl.BlockSpec((Tc, tb, Dp), lambda i, t: (t, i, 0)),       # feature
        pl.BlockSpec((Dp, 3 * Hp), lambda i, t: (0, 0)),          # W_ih
        pl.BlockSpec((Hp, 3 * Hp), lambda i, t: (0, 0)),          # W_hh
        pl.BlockSpec((1, 3 * Hp), lambda i, t: (0, 0)),           # folded b_ih
        pl.BlockSpec((1, Hp), lambda i, t: (0, 0)),               # b_hn
        pl.BlockSpec((1, Hp), lambda i, t: (0, 0)),               # attention W
        pl.BlockSpec(memory_space=pltpu.MemorySpace.SMEM),        # attention b
    ]
    out_spec = pl.BlockSpec((tb, Hp), lambda i, t: (i, 0))

    scratch_defs = [
        ((Tc * tb, 3 * Hp), f32),   # per-chunk GX
        ((tb, Hp), f32),            # h carry
        ((tb, 1), f32),             # online-softmax running max
        ((tb, 1), f32),             # online-softmax denom
        ((tb, Hp), f32),            # weighted-sum accumulator
    ]
    scratch_shapes = [pltpu.VMEM(shp, dt) for shp, dt in scratch_defs]

    # VMEM sizing from actual blocks (x2 for double buffering) + headroom;
    # never request v7x's entire 64 MiB physical VMEM.
    est = 0
    for spec_shape, dt in [((1, tb, Tc), f32), ((Tc, tb, Dp), mm_dtype),
                           ((Dp, 3 * Hp), mm_dtype), ((Hp, 3 * Hp), mm_dtype),
                           ((1, 3 * Hp), f32), ((1, Hp), f32), ((1, Hp), f32),
                           ((tb, Hp), f32)]:
        est += 2 * _block_bytes(spec_shape, dt)
    for shp, dt in scratch_defs:
        est += _block_bytes(shp, dt)
    vmem_limit = int(min(max(est + (8 << 20), 24 << 20), 48 << 20))

    out_padded = pl.pallas_call(
        _attention_gru_kernel,
        out_shape=jax.ShapeDtypeStruct((Bp, Hp), f32),
        grid=grid,
        in_specs=in_specs,
        out_specs=out_spec,
        scratch_shapes=scratch_shapes,
        compiler_params=pltpu.CompilerParams(
            dimension_semantics=("parallel", "arbitrary"),
            vmem_limit_bytes=vmem_limit,
        ),
    )(mask, feat, w_ih, w_hh, b_fold, b_hn, attn_w, attn_b)

    return out_padded[:B, :H]


# ----------------------------------------------------------------------------
# Parameters & pure-JAX reference (mirrors the PyTorch forward, eval mode)
# ----------------------------------------------------------------------------
def init_params(key, D, H):
    """Deterministic synthetic parameters (uniform(-1/sqrt(H), 1/sqrt(H)))."""
    k = 1.0 / jnp.sqrt(jnp.float32(H))
    keys = jax.random.split(key, 6)
    u = lambda kk, shape: jax.random.uniform(kk, shape, jnp.float32, -k, k)
    return {
        "w_ih": u(keys[0], (D, 3 * H)),      # transposed torch weight_ih_l0
        "w_hh": u(keys[1], (H, 3 * H)),      # transposed torch weight_hh_l0
        "b_ih": u(keys[2], (1, 3 * H)),
        "b_hh": u(keys[3], (1, 3 * H)),
        "attn_w": u(keys[4], (1, H)),        # torch nn.Linear(H, 1).weight
        "attn_b": u(keys[5], (1, 1)),
    }


def attention_gru_reference(p_mask, feature, params):
    B, T, D = feature.shape
    H = params["w_hh"].shape[0]

    def gru_step(h, x_t):
        gx = x_t @ params["w_ih"] + params["b_ih"]
        gh = h @ params["w_hh"] + params["b_hh"]
        r = jax.nn.sigmoid(gx[:, :H] + gh[:, :H])
        z = jax.nn.sigmoid(gx[:, H:2 * H] + gh[:, H:2 * H])
        n = jnp.tanh(gx[:, 2 * H:] + r * gh[:, 2 * H:])
        h_new = (1.0 - z) * n + z * h
        return h_new, h_new

    xs = jnp.transpose(feature, (1, 0, 2))               # (T, B, D)
    _, outs = lax.scan(gru_step, jnp.zeros((B, H), jnp.float32), xs)
    outs = jnp.transpose(outs, (1, 0, 2))                # (B, T, H)

    scores = jnp.einsum("bth,kh->btk", outs, params["attn_w"]) \
        + params["attn_b"][0, 0]
    attn = jax.nn.softmax(scores, axis=1)                # softmax over time
    attn = attn * p_mask[:, :, None]
    return jnp.sum(outs * attn, axis=1)                  # (B, H)


if __name__ == "__main__":
    B, T, D = 2, 8, 32      # embedding_dim == hidden_dim == 32
    H = D

    key = jax.random.PRNGKey(0)
    k_feat, k_mask, k_param = jax.random.split(key, 3)

    feature = jax.random.normal(k_feat, (B, T, D), jnp.float32)
    p_mask = (jax.random.uniform(k_mask, (B, T)) > 0.2).astype(jnp.float32)
    params = init_params(k_param, D, H)

    ref = attention_gru_reference(p_mask, feature, params)

    # f32 matmul path: tight parity with the f32 reference.
    out_f32 = jax.block_until_ready(
        attention_gru_pallas(p_mask, feature, params,
                             matmul_dtype=jnp.float32))
    assert out_f32.shape == (B, H)
    err32 = float(jnp.max(jnp.abs(out_f32 - ref)))
    assert err32 < 1e-4, f"f32 path max abs err {err32}"

    # Default bf16 matmul path (f32 accumulation / state): loose parity.
    out_bf16 = jax.block_until_ready(
        attention_gru_pallas(p_mask, feature, params))
    assert out_bf16.shape == (B, H)
    errbf = float(jnp.max(jnp.abs(out_bf16 - ref)))
    assert errbf < 1e-1, f"bf16 path max abs err {errbf}"

    print("KERNEL_OK")
</pallas_src>

<mosaic_0001>
module attributes {stable_mosaic.version = 11 : i64} {
  func.func @_attention_gru_kernel(%arg0: i32, %arg1: i32, %arg2: memref<1x8x8xf32, #tpu.memory_space<vmem>>, %arg3: memref<8x8x128xf32, #tpu.memory_space<vmem>>, %arg4: memref<128x384xf32, #tpu.memory_space<vmem>>, %arg5: memref<128x384xf32, #tpu.memory_space<vmem>>, %arg6: memref<1x384xf32, #tpu.memory_space<vmem>>, %arg7: memref<1x128xf32, #tpu.memory_space<vmem>>, %arg8: memref<1x128xf32, #tpu.memory_space<vmem>>, %arg9: memref<1x1xf32, #tpu.memory_space<smem>>, %arg10: memref<8x128xf32, #tpu.memory_space<vmem>>, %arg11: memref<64x384xf32, #tpu.memory_space<vmem>>, %arg12: memref<8x128xf32, #tpu.memory_space<vmem>>, %arg13: memref<8x1xf32, #tpu.memory_space<vmem>>, %arg14: memref<8x1xf32, #tpu.memory_space<vmem>>, %arg15: memref<8x128xf32, #tpu.memory_space<vmem>>) attributes {dimension_semantics = [#tpu.dimension_semantics<parallel>, #tpu.dimension_semantics<arbitrary>], iteration_bounds = array<i64: 1, 1>, scalar_prefetch = 0 : i64, scratch_operands = 5 : i64, tpu.core_type = #tpu.core_type<tc>, window_params = [{transform_indices = @transform_0, window_bounds = array<i64: 1, 8, 8>}, {transform_indices = @transform_1, window_bounds = array<i64: 8, 8, 128>}, {pipeline_mode = #tpu.pipeline_mode<synchronous>, transform_indices = @transform_2, window_bounds = array<i64: 128, 384>}, {pipeline_mode = #tpu.pipeline_mode<synchronous>, transform_indices = @transform_3, window_bounds = array<i64: 128, 384>}, {pipeline_mode = #tpu.pipeline_mode<synchronous>, transform_indices = @transform_4, window_bounds = array<i64: 1, 384>}, {pipeline_mode = #tpu.pipeline_mode<synchronous>, transform_indices = @transform_5, window_bounds = array<i64: 1, 128>}, {pipeline_mode = #tpu.pipeline_mode<synchronous>, transform_indices = @transform_6, window_bounds = array<i64: 1, 128>}, {transform_indices = @transform_7, window_bounds = array<i64: 1, 1>}, {transform_indices = @transform_8, window_bounds = array<i64: 8, 128>}]} {
    %c0_i32 = arith.constant 0 : i32
    %0 = arith.cmpi eq, %arg1, %c0_i32 : i32
    %1 = arith.extui %0 : i1 to i32
    %c0_i32_0 = arith.constant 0 : i32
    %2 = arith.cmpi ne, %1, %c0_i32_0 : i32
    scf.if %2 {
      %cst_131 = arith.constant 0.000000e+00 : f32
      %426 = vector.broadcast %cst_131 : f32 to vector<8x128xf32>
      %c0_132 = arith.constant 0 : index
      %c0_133 = arith.constant 0 : index
      %427 = vector.load %arg12[%c0_132, %c0_133] : memref<8x128xf32, #tpu.memory_space<vmem>>, vector<8x128xf32>
      tpu.vector_store %arg12[%c0_132, %c0_133], %426 {strides = array<i32>} : memref<8x128xf32, #tpu.memory_space<vmem>>, vector<8x128xf32>,
      %cst_134 = arith.constant 0xFF800000 : f32
      %428 = vector.broadcast %cst_134 : f32 to vector<8x1xf32>
      %c0_135 = arith.constant 0 : index
      %c0_136 = arith.constant 0 : index
      %429 = vector.load %arg13[%c0_135, %c0_136] : memref<8x1xf32, #tpu.memory_space<vmem>>, vector<8x1xf32>
      tpu.vector_store %arg13[%c0_135, %c0_136], %428 {strides = array<i32>} : memref<8x1xf32, #tpu.memory_space<vmem>>, vector<8x1xf32>,
      %cst_137 = arith.constant 0.000000e+00 : f32
      %430 = vector.broadcast %cst_137 : f32 to vector<8x1xf32>
      %c0_138 = arith.constant 0 : index
      %c0_139 = arith.constant 0 : index
      %431 = vector.load %arg14[%c0_138, %c0_139] : memref<8x1xf32, #tpu.memory_space<vmem>>, vector<8x1xf32>
      tpu.vector_store %arg14[%c0_138, %c0_139], %430 {strides = array<i32>} : memref<8x1xf32, #tpu.memory_space<vmem>>, vector<8x1xf32>,
      %cst_140 = arith.constant 0.000000e+00 : f32
      %432 = vector.broadcast %cst_140 : f32 to vector<8x128xf32>
      %c0_141 = arith.constant 0 : index
      %c0_142 = arith.constant 0 : index
      %433 = vector.load %arg15[%c0_141, %c0_142] : memref<8x128xf32, #tpu.memory_space<vmem>>, vector<8x128xf32>
      tpu.vector_store %arg15[%c0_141, %c0_142], %432 {strides = array<i32>} : memref<8x128xf32, #tpu.memory_space<vmem>>, vector<8x128xf32>,
    } else {
    }
    %c0 = arith.constant 0 : index
    %c0_1 = arith.constant 0 : index
    %3 = vector.load %arg5[%c0, %c0_1] : memref<128x384xf32, #tpu.memory_space<vmem>>, vector<128x384xf32>
    %c0_2 = arith.constant 0 : index
    %c0_3 = arith.constant 0 : index
    %4 = vector.load %arg6[%c0_2, %c0_3] : memref<1x384xf32, #tpu.memory_space<vmem>>, vector<1x384xf32>
    %c0_4 = arith.constant 0 : index
    %c0_5 = arith.constant 0 : index
    %5 = vector.load %arg7[%c0_4, %c0_5] : memref<1x128xf32, #tpu.memory_space<vmem>>, vector<1x128xf32>
    %c0_6 = arith.constant 0 : index
    %c0_7 = arith.constant 0 : index
    %6 = vector.load %arg8[%c0_6, %c0_7] : memref<1x128xf32, #tpu.memory_space<vmem>>, vector<1x128xf32>
    %c0_8 = arith.constant 0 : index
    %c0_9 = arith.constant 0 : index
    %7 = memref.load %arg9[%c0_8, %c0_9] : memref<1x1xf32, #tpu.memory_space<smem>>
    %c0_10 = arith.constant 0 : index
    %c0_11 = arith.constant 0 : index
    %c0_12 = arith.constant 0 : index
    %8 = vector.load %arg3[%c0_10, %c0_11, %c0_12] : memref<8x8x128xf32, #tpu.memory_space<vmem>>, vector<8x8x128xf32>
    %9 = vector.shape_cast %8 : vector<8x8x128xf32> to vector<64x128xf32>
    %c0_13 = arith.constant 0 : index
    %c0_14 = arith.constant 0 : index
    %10 = vector.load %arg4[%c0_13, %c0_14] : memref<128x384xf32, #tpu.memory_space<vmem>>, vector<128x384xf32>
    %cst = arith.constant dense<0.000000e+00> : vector<64x384xf32>
    %11 = tpu.matmul %9, %10, %cst {dimension_numbers = #tpu.dot_dimension_numbers<[1], [0], [0], [1], [0, 0, 1, 1], [], []>} : vector<64x128xf32>, vector<128x384xf32>, vector<64x384xf32> -> vector<64x384xf32>
    %12 = vector.broadcast %4 : vector<1x384xf32> to vector<64x384xf32>
    %13 = arith.addf %11, %12 : vector<64x384xf32>
    %c0_15 = arith.constant 0 : index
    %c0_16 = arith.constant 0 : index
    %14 = vector.load %arg11[%c0_15, %c0_16] : memref<64x384xf32, #tpu.memory_space<vmem>>, vector<64x384xf32>
    tpu.vector_store %arg11[%c0_15, %c0_16], %13 {strides = array<i32>} : memref<64x384xf32, #tpu.memory_space<vmem>>, vector<64x384xf32>,
    %c0_17 = arith.constant 0 : index
    %c0_18 = arith.constant 0 : index
    %15 = vector.load %arg12[%c0_17, %c0_18] : memref<8x128xf32, #tpu.memory_space<vmem>>, vector<8x128xf32>
    %c0_19 = arith.constant 0 : index
    %c0_20 = arith.constant 0 : index
    %16 = vector.load %arg13[%c0_19, %c0_20] : memref<8x1xf32, #tpu.memory_space<vmem>>, vector<8x1xf32>
    %c0_21 = arith.constant 0 : index
    %c0_22 = arith.constant 0 : index
    %17 = vector.load %arg14[%c0_21, %c0_22] : memref<8x1xf32, #tpu.memory_space<vmem>>, vector<8x1xf32>
    %c0_23 = arith.constant 0 : index
    %c0_24 = arith.constant 0 : index
    %18 = vector.load %arg15[%c0_23, %c0_24] : memref<8x128xf32, #tpu.memory_space<vmem>>, vector<8x128xf32>
    %cst_25 = arith.constant dense<0.000000e+00> : vector<8x384xf32>
    %19 = tpu.matmul %15, %3, %cst_25 {dimension_numbers = #tpu.dot_dimension_numbers<[1], [0], [0], [1], [0, 0, 1, 1], [], []>} : vector<8x128xf32>, vector<128x384xf32>, vector<8x384xf32> -> vector<8x384xf32>
    %c0_26 = arith.constant 0 : index
    %c0_27 = arith.constant 0 : index
    %20 = vector.load %arg11[%c0_26, %c0_27] : memref<64x384xf32, #tpu.memory_space<vmem>>, vector<8x128xf32>
    %21 = vector.extract_strided_slice %19 {offsets = [0, 0], sizes = [8, 128], strides = [1, 1]} : vector<8x384xf32> to vector<8x128xf32>
    %22 = arith.addf %20, %21 : vector<8x128xf32>
    %23 = arith.negf %22 : vector<8x128xf32>
    %24 = math.exp %23 : vector<8x128xf32>
    %cst_28 = arith.constant 1.000000e+00 : f32
    %25 = vector.broadcast %cst_28 : f32 to vector<8x128xf32>
    %26 = arith.addf %25, %24 : vector<8x128xf32>
    %27 = arith.divf %25, %26 : vector<8x128xf32>
    %c0_29 = arith.constant 0 : index
    %c128 = arith.constant 128 : index
    %28 = vector.load %arg11[%c0_29, %c128] : memref<64x384xf32, #tpu.memory_space<vmem>>, vector<8x128xf32>
    %29 = vector.extract_strided_slice %19 {offsets = [0, 128], sizes = [8, 128], strides = [1, 1]} : vector<8x384xf32> to vector<8x128xf32>
    %30 = arith.addf %28, %29 : vector<8x128xf32>
    %31 = arith.negf %30 : vector<8x128xf32>
    %32 = math.exp %31 : vector<8x128xf32>
    %cst_30 = arith.constant 1.000000e+00 : f32
    %33 = vector.broadcast %cst_30 : f32 to vector<8x128xf32>
    %34 = arith.addf %33, %32 : vector<8x128xf32>
    %35 = arith.divf %33, %34 : vector<8x128xf32>
    %c0_31 = arith.constant 0 : index
    %c256 = arith.constant 256 : index
    %36 = vector.load %arg11[%c0_31, %c256] : memref<64x384xf32, #tpu.memory_space<vmem>>, vector<8x128xf32>
    %37 = vector.extract_strided_slice %19 {offsets = [0, 256], sizes = [8, 128], strides = [1, 1]} : vector<8x384xf32> to vector<8x128xf32>
    %38 = vector.broadcast %5 : vector<1x128xf32> to vector<8x128xf32>
    %39 = arith.addf %37, %38 : vector<8x128xf32>
    %40 = arith.mulf %27, %39 : vector<8x128xf32>
    %41 = arith.addf %36, %40 : vector<8x128xf32>
    %42 = math.tanh %41 : vector<8x128xf32>
    %cst_32 = arith.constant 1.000000e+00 : f32
    %43 = vector.broadcast %cst_32 : f32 to vector<8x128xf32>
    %44 = arith.subf %43, %35 : vector<8x128xf32>
    %45 = arith.mulf %44, %42 : vector<8x128xf32>
    %46 = arith.mulf %35, %15 : vector<8x128xf32>
    %47 = arith.addf %45, %46 : vector<8x128xf32>
    %48 = vector.broadcast %6 : vector<1x128xf32> to vector<8x128xf32>
    %49 = arith.mulf %47, %48 : vector<8x128xf32>
    %cst_33 = arith.constant dense<0.000000e+00> : vector<8xf32>
    %50 = vector.multi_reduction <add>, %49, %cst_33 [1] : vector<8x128xf32> to vector<8xf32>
    %51 = vector.shape_cast %50 : vector<8xf32> to vector<8x1xf32>
    %52 = vector.broadcast %7 : f32 to vector<8x1xf32>
    %53 = arith.addf %51, %52 : vector<8x1xf32>
    %54 = arith.maximumf %16, %53 : vector<8x1xf32>
    %55 = arith.subf %16, %54 : vector<8x1xf32>
    %56 = math.exp %55 : vector<8x1xf32>
    %57 = arith.subf %53, %54 : vector<8x1xf32>
    %58 = math.exp %57 : vector<8x1xf32>
    %59 = arith.mulf %56, %17 : vector<8x1xf32>
    %60 = arith.addf %59, %58 : vector<8x1xf32>
    %61 = vector.broadcast %56 : vector<8x1xf32> to vector<8x128xf32>
    %62 = arith.mulf %61, %18 : vector<8x128xf32>
    %c0_34 = arith.constant 0 : index
    %c0_35 = arith.constant 0 : index
    %c0_36 = arith.constant 0 : index
    %63 = vector.load %arg2[%c0_34, %c0_35, %c0_36] : memref<1x8x8xf32, #tpu.memory_space<vmem>>, vector<1x8x1xf32>
    %64 = vector.shape_cast %63 : vector<1x8x1xf32> to vector<8x1xf32>
    %65 = arith.mulf %58, %64 : vector<8x1xf32>
    %66 = vector.broadcast %65 : vector<8x1xf32> to vector<8x128xf32>
    %67 = arith.mulf %66, %47 : vector<8x128xf32>
    %68 = arith.addf %62, %67 : vector<8x128xf32>
    %cst_37 = arith.constant dense<0.000000e+00> : vector<8x384xf32>
    %69 = tpu.matmul %47, %3, %cst_37 {dimension_numbers = #tpu.dot_dimension_numbers<[1], [0], [0], [1], [0, 0, 1, 1], [], []>} : vector<8x128xf32>, vector<128x384xf32>, vector<8x384xf32> -> vector<8x384xf32>
    %c8 = arith.constant 8 : index
    %c0_38 = arith.constant 0 : index
    %70 = vector.load %arg11[%c8, %c0_38] : memref<64x384xf32, #tpu.memory_space<vmem>>, vector<8x128xf32>
    %71 = vector.extract_strided_slice %69 {offsets = [0, 0], sizes = [8, 128], strides = [1, 1]} : vector<8x384xf32> to vector<8x128xf32>
    %72 = arith.addf %70, %71 : vector<8x128xf32>
    %73 = arith.negf %72 : vector<8x128xf32>
    %74 = math.exp %73 : vector<8x128xf32>
    %cst_39 = arith.constant 1.000000e+00 : f32
    %75 = vector.broadcast %cst_39 : f32 to vector<8x128xf32>
    %76 = arith.addf %75, %74 : vector<8x128xf32>
    %77 = arith.divf %75, %76 : vector<8x128xf32>
    %c8_40 = arith.constant 8 : index
    %c128_41 = arith.constant 128 : index
    %78 = vector.load %arg11[%c8_40, %c128_41] : memref<64x384xf32, #tpu.memory_space<vmem>>, vector<8x128xf32>
    %79 = vector.extract_strided_slice %69 {offsets = [0, 128], sizes = [8, 128], strides = [1, 1]} : vector<8x384xf32> to vector<8x128xf32>
    %80 = arith.addf %78, %79 : vector<8x128xf32>
    %81 = arith.negf %80 : vector<8x128xf32>
    %82 = math.exp %81 : vector<8x128xf32>
    %cst_42 = arith.constant 1.000000e+00 : f32
    %83 = vector.broadcast %cst_42 : f32 to vector<8x128xf32>
    %84 = arith.addf %83, %82 : vector<8x128xf32>
    %85 = arith.divf %83, %84 : vector<8x128xf32>
    %c8_43 = arith.constant 8 : index
    %c256_44 = arith.constant 256 : index
    %86 = vector.load %arg11[%c8_43, %c256_44] : memref<64x384xf32, #tpu.memory_space<vmem>>, vector<8x128xf32>
    %87 = vector.extract_strided_slice %69 {offsets = [0, 256], sizes = [8, 128], strides = [1, 1]} : vector<8x384xf32> to vector<8x128xf32>
    %88 = vector.broadcast %5 : vector<1x128xf32> to vector<8x128xf32>
    %89 = arith.addf %87, %88 : vector<8x128xf32>
    %90 = arith.mulf %77, %89 : vector<8x128xf32>
    %91 = arith.addf %86, %90 : vector<8x128xf32>
    %92 = math.tanh %91 : vector<8x128xf32>
    %cst_45 = arith.constant 1.000000e+00 : f32
    %93 = vector.broadcast %cst_45 : f32 to vector<8x128xf32>
    %94 = arith.subf %93, %85 : vector<8x128xf32>
    %95 = arith.mulf %94, %92 : vector<8x128xf32>
    %96 = arith.mulf %85, %47 : vector<8x128xf32>
    %97 = arith.addf %95, %96 : vector<8x128xf32>
    %98 = vector.broadcast %6 : vector<1x128xf32> to vector<8x128xf32>
    %99 = arith.mulf %97, %98 : vector<8x128xf32>
    %cst_46 = arith.constant dense<0.000000e+00> : vector<8xf32>
    %100 = vector.multi_reduction <add>, %99, %cst_46 [1] : vector<8x128xf32> to vector<8xf32>
    %101 = vector.shape_cast %100 : vector<8xf32> to vector<8x1xf32>
    %102 = vector.broadcast %7 : f32 to vector<8x1xf32>
    %103 = arith.addf %101, %102 : vector<8x1xf32>
    %104 = arith.maximumf %54, %103 : vector<8x1xf32>
    %105 = arith.subf %54, %104 : vector<8x1xf32>
    %106 = math.exp %105 : vector<8x1xf32>
    %107 = arith.subf %103, %104 : vector<8x1xf32>
    %108 = math.exp %107 : vector<8x1xf32>
    %109 = arith.mulf %106, %60 : vector<8x1xf32>
    %110 = arith.addf %109, %108 : vector<8x1xf32>
    %111 = vector.broadcast %106 : vector<8x1xf32> to vector<8x128xf32>
    %112 = arith.mulf %111, %68 : vector<8x128xf32>
    %c0_47 = arith.constant 0 : index
    %c0_48 = arith.constant 0 : index
    %c1 = arith.constant 1 : index
    %113 = vector.load %arg2[%c0_47, %c0_48, %c1] : memref<1x8x8xf32, #tpu.memory_space<vmem>>, vector<1x8x1xf32>
    %114 = vector.shape_cast %113 : vector<1x8x1xf32> to vector<8x1xf32>
    %115 = arith.mulf %108, %114 : vector<8x1xf32>
    %116 = vector.broadcast %115 : vector<8x1xf32> to vector<8x128xf32>
    %117 = arith.mulf %116, %97 : vector<8x128xf32>
    %118 = arith.addf %112, %117 : vector<8x128xf32>
    %cst_49 = arith.constant dense<0.000000e+00> : vector<8x384xf32>
    %119 = tpu.matmul %97, %3, %cst_49 {dimension_numbers = #tpu.dot_dimension_numbers<[1], [0], [0], [1], [0, 0, 1, 1], [], []>} : vector<8x128xf32>, vector<128x384xf32>, vector<8x384xf32> -> vector<8x384xf32>
    %c16 = arith.constant 16 : index
    %c0_50 = arith.constant 0 : index
    %120 = vector.load %arg11[%c16, %c0_50] : memref<64x384xf32, #tpu.memory_space<vmem>>, vector<8x128xf32>
    %121 = vector.extract_strided_slice %119 {offsets = [0, 0], sizes = [8, 128], strides = [1, 1]} : vector<8x384xf32> to vector<8x128xf32>
    %122 = arith.addf %120, %121 : vector<8x128xf32>
    %123 = arith.negf %122 : vector<8x128xf32>
    %124 = math.exp %123 : vector<8x128xf32>
    %cst_51 = arith.constant 1.000000e+00 : f32
    %125 = vector.broadcast %cst_51 : f32 to vector<8x128xf32>
    %126 = arith.addf %125, %124 : vector<8x128xf32>
    %127 = arith.divf %125, %126 : vector<8x128xf32>
    %c16_52 = arith.constant 16 : index
    %c128_53 = arith.constant 128 : index
    %128 = vector.load %arg11[%c16_52, %c128_53] : memref<64x384xf32, #tpu.memory_space<vmem>>, vector<8x128xf32>
    %129 = vector.extract_strided_slice %119 {offsets = [0, 128], sizes = [8, 128], strides = [1, 1]} : vector<8x384xf32> to vector<8x128xf32>
    %130 = arith.addf %128, %129 : vector<8x128xf32>
    %131 = arith.negf %130 : vector<8x128xf32>
    %132 = math.exp %131 : vector<8x128xf32>
    %cst_54 = arith.constant 1.000000e+00 : f32
    %133 = vector.broadcast %cst_54 : f32 to vector<8x128xf32>
    %134 = arith.addf %133, %132 : vector<8x128xf32>
    %135 = arith.divf %133, %134 : vector<8x128xf32>
    %c16_55 = arith.constant 16 : index
    %c256_56 = arith.constant 256 : index
    %136 = vector.load %arg11[%c16_55, %c256_56] : memref<64x384xf32, #tpu.memory_space<vmem>>, vector<8x128xf32>
    %137 = vector.extract_strided_slice %119 {offsets = [0, 256], sizes = [8, 128], strides = [1, 1]} : vector<8x384xf32> to vector<8x128xf32>
    %138 = vector.broadcast %5 : vector<1x128xf32> to vector<8x128xf32>
    %139 = arith.addf %137, %138 : vector<8x128xf32>
    %140 = arith.mulf %127, %139 : vector<8x128xf32>
    %141 = arith.addf %136, %140 : vector<8x128xf32>
    %142 = math.tanh %141 : vector<8x128xf32>
    %cst_57 = arith.constant 1.000000e+00 : f32
    %143 = vector.broadcast %cst_57 : f32 to vector<8x128xf32>
    %144 = arith.subf %143, %135 : vector<8x128xf32>
    %145 = arith.mulf %144, %142 : vector<8x128xf32>
    %146 = arith.mulf %135, %97 : vector<8x128xf32>
    %147 = arith.addf %145, %146 : vector<8x128xf32>
    %148 = vector.broadcast %6 : vector<1x128xf32> to vector<8x128xf32>
    %149 = arith.mulf %147, %148 : vector<8x128xf32>
    %cst_58 = arith.constant dense<0.000000e+00> : vector<8xf32>
    %150 = vector.multi_reduction <add>, %149, %cst_58 [1] : vector<8x128xf32> to vector<8xf32>
    %151 = vector.shape_cast %150 : vector<8xf32> to vector<8x1xf32>
    %152 = vector.broadcast %7 : f32 to vector<8x1xf32>
    %153 = arith.addf %151, %152 : vector<8x1xf32>
    %154 = arith.maximumf %104, %153 : vector<8x1xf32>
    %155 = arith.subf %104, %154 : vector<8x1xf32>
    %156 = math.exp %155 : vector<8x1xf32>
    %157 = arith.subf %153, %154 : vector<8x1xf32>
    %158 = math.exp %157 : vector<8x1xf32>
    %159 = arith.mulf %156, %110 : vector<8x1xf32>
    %160 = arith.addf %159, %158 : vector<8x1xf32>
    %161 = vector.broadcast %156 : vector<8x1xf32> to vector<8x128xf32>
    %162 = arith.mulf %161, %118 : vector<8x128xf32>
    %c0_59 = arith.constant 0 : index
    %c0_60 = arith.constant 0 : index
    %c2 = arith.constant 2 : index
    %163 = vector.load %arg2[%c0_59, %c0_60, %c2] : memref<1x8x8xf32, #tpu.memory_space<vmem>>, vector<1x8x1xf32>
    %164 = vector.shape_cast %163 : vector<1x8x1xf32> to vector<8x1xf32>
    %165 = arith.mulf %158, %164 : vector<8x1xf32>
    %166 = vector.broadcast %165 : vector<8x1xf32> to vector<8x128xf32>
    %167 = arith.mulf %166, %147 : vector<8x128xf32>
    %168 = arith.addf %162, %167 : vector<8x128xf32>
    %cst_61 = arith.constant dense<0.000000e+00> : vector<8x384xf32>
    %169 = tpu.matmul %147, %3, %cst_61 {dimension_numbers = #tpu.dot_dimension_numbers<[1], [0], [0], [1], [0, 0, 1, 1], [], []>} : vector<8x128xf32>, vector<128x384xf32>, vector<8x384xf32> -> vector<8x384xf32>
    %c24 = arith.constant 24 : index
    %c0_62 = arith.constant 0 : index
    %170 = vector.load %arg11[%c24, %c0_62] : memref<64x384xf32, #tpu.memory_space<vmem>>, vector<8x128xf32>
    %171 = vector.extract_strided_slice %169 {offsets = [0, 0], sizes = [8, 128], strides = [1, 1]} : vector<8x384xf32> to vector<8x128xf32>
    %172 = arith.addf %170, %171 : vector<8x128xf32>
    %173 = arith.negf %172 : vector<8x128xf32>
    %174 = math.exp %173 : vector<8x128xf32>
    %cst_63 = arith.constant 1.000000e+00 : f32
    %175 = vector.broadcast %cst_63 : f32 to vector<8x128xf32>
    %176 = arith.addf %175, %174 : vector<8x128xf32>
    %177 = arith.divf %175, %176 : vector<8x128xf32>
    %c24_64 = arith.constant 24 : index
    %c128_65 = arith.constant 128 : index
    %178 = vector.load %arg11[%c24_64, %c128_65] : memref<64x384xf32, #tpu.memory_space<vmem>>, vector<8x128xf32>
    %179 = vector.extract_strided_slice %169 {offsets = [0, 128], sizes = [8, 128], strides = [1, 1]} : vector<8x384xf32> to vector<8x128xf32>
    %180 = arith.addf %178, %179 : vector<8x128xf32>
    %181 = arith.negf %180 : vector<8x128xf32>
    %182 = math.exp %181 : vector<8x128xf32>
    %cst_66 = arith.constant 1.000000e+00 : f32
    %183 = vector.broadcast %cst_66 : f32 to vector<8x128xf32>
    %184 = arith.addf %183, %182 : vector<8x128xf32>
    %185 = arith.divf %183, %184 : vector<8x128xf32>
    %c24_67 = arith.constant 24 : index
    %c256_68 = arith.constant 256 : index
    %186 = vector.load %arg11[%c24_67, %c256_68] : memref<64x384xf32, #tpu.memory_space<vmem>>, vector<8x128xf32>
    %187 = vector.extract_strided_slice %169 {offsets = [0, 256], sizes = [8, 128], strides = [1, 1]} : vector<8x384xf32> to vector<8x128xf32>
    %188 = vector.broadcast %5 : vector<1x128xf32> to vector<8x128xf32>
    %189 = arith.addf %187, %188 : vector<8x128xf32>
    %190 = arith.mulf %177, %189 : vector<8x128xf32>
    %191 = arith.addf %186, %190 : vector<8x128xf32>
    %192 = math.tanh %191 : vector<8x128xf32>
    %cst_69 = arith.constant 1.000000e+00 : f32
    %193 = vector.broadcast %cst_69 : f32 to vector<8x128xf32>
    %194 = arith.subf %193, %185 : vector<8x128xf32>
    %195 = arith.mulf %194, %192 : vector<8x128xf32>
    %196 = arith.mulf %185, %147 : vector<8x128xf32>
    %197 = arith.addf %195, %196 : vector<8x128xf32>
    %198 = vector.broadcast %6 : vector<1x128xf32> to vector<8x128xf32>
    %199 = arith.mulf %197, %198 : vector<8x128xf32>
    %cst_70 = arith.constant dense<0.000000e+00> : vector<8xf32>
    %200 = vector.multi_reduction <add>, %199, %cst_70 [1] : vector<8x128xf32> to vector<8xf32>
    %201 = vector.shape_cast %200 : vector<8xf32> to vector<8x1xf32>
    %202 = vector.broadcast %7 : f32 to vector<8x1xf32>
    %203 = arith.addf %201, %202 : vector<8x1xf32>
    %204 = arith.maximumf %154, %203 : vector<8x1xf32>
    %205 = arith.subf %154, %204 : vector<8x1xf32>
    %206 = math.exp %205 : vector<8x1xf32>
    %207 = arith.subf %203, %204 : vector<8x1xf32>
    %208 = math.exp %207 : vector<8x1xf32>
    %209 = arith.mulf %206, %160 : vector<8x1xf32>
    %210 = arith.addf %209, %208 : vector<8x1xf32>
    %211 = vector.broadcast %206 : vector<8x1xf32> to vector<8x128xf32>
    %212 = arith.mulf %211, %168 : vector<8x128xf32>
    %c0_71 = arith.constant 0 : index
    %c0_72 = arith.constant 0 : index
    %c3 = arith.constant 3 : index
    %213 = vector.load %arg2[%c0_71, %c0_72, %c3] : memref<1x8x8xf32, #tpu.memory_space<vmem>>, vector<1x8x1xf32>
    %214 = vector.shape_cast %213 : vector<1x8x1xf32> to vector<8x1xf32>
    %215 = arith.mulf %208, %214 : vector<8x1xf32>
    %216 = vector.broadcast %215 : vector<8x1xf32> to vector<8x128xf32>
    %217 = arith.mulf %216, %197 : vector<8x128xf32>
    %218 = arith.addf %212, %217 : vector<8x128xf32>
    %cst_73 = arith.constant dense<0.000000e+00> : vector<8x384xf32>
    %219 = tpu.matmul %197, %3, %cst_73 {dimension_numbers = #tpu.dot_dimension_numbers<[1], [0], [0], [1], [0, 0, 1, 1], [], []>} : vector<8x128xf32>, vector<128x384xf32>, vector<8x384xf32> -> vector<8x384xf32>
    %c32 = arith.constant 32 : index
    %c0_74 = arith.constant 0 : index
    %220 = vector.load %arg11[%c32, %c0_74] : memref<64x384xf32, #tpu.memory_space<vmem>>, vector<8x128xf32>
    %221 = vector.extract_strided_slice %219 {offsets = [0, 0], sizes = [8, 128], strides = [1, 1]} : vector<8x384xf32> to vector<8x128xf32>
    %222 = arith.addf %220, %221 : vector<8x128xf32>
    %223 = arith.negf %222 : vector<8x128xf32>
    %224 = math.exp %223 : vector<8x128xf32>
    %cst_75 = arith.constant 1.000000e+00 : f32
    %225 = vector.broadcast %cst_75 : f32 to vector<8x128xf32>
    %226 = arith.addf %225, %224 : vector<8x128xf32>
    %227 = arith.divf %225, %226 : vector<8x128xf32>
    %c32_76 = arith.constant 32 : index
    %c128_77 = arith.constant 128 : index
    %228 = vector.load %arg11[%c32_76, %c128_77] : memref<64x384xf32, #tpu.memory_space<vmem>>, vector<8x128xf32>
    %229 = vector.extract_strided_slice %219 {offsets = [0, 128], sizes = [8, 128], strides = [1, 1]} : vector<8x384xf32> to vector<8x128xf32>
    %230 = arith.addf %228, %229 : vector<8x128xf32>
    %231 = arith.negf %230 : vector<8x128xf32>
    %232 = math.exp %231 : vector<8x128xf32>
    %cst_78 = arith.constant 1.000000e+00 : f32
    %233 = vector.broadcast %cst_78 : f32 to vector<8x128xf32>
    %234 = arith.addf %233, %232 : vector<8x128xf32>
    %235 = arith.divf %233, %234 : vector<8x128xf32>
    %c32_79 = arith.constant 32 : index
    %c256_80 = arith.constant 256 : index
    %236 = vector.load %arg11[%c32_79, %c256_80] : memref<64x384xf32, #tpu.memory_space<vmem>>, vector<8x128xf32>
    %237 = vector.extract_strided_slice %219 {offsets = [0, 256], sizes = [8, 128], strides = [1, 1]} : vector<8x384xf32> to vector<8x128xf32>
    %238 = vector.broadcast %5 : vector<1x128xf32> to vector<8x128xf32>
    %239 = arith.addf %237, %238 : vector<8x128xf32>
    %240 = arith.mulf %227, %239 : vector<8x128xf32>
    %241 = arith.addf %236, %240 : vector<8x128xf32>
    %242 = math.tanh %241 : vector<8x128xf32>
    %cst_81 = arith.constant 1.000000e+00 : f32
    %243 = vector.broadcast %cst_81 : f32 to vector<8x128xf32>
    %244 = arith.subf %243, %235 : vector<8x128xf32>
    %245 = arith.mulf %244, %242 : vector<8x128xf32>
    %246 = arith.mulf %235, %197 : vector<8x128xf32>
    %247 = arith.addf %245, %246 : vector<8x128xf32>
    %248 = vector.broadcast %6 : vector<1x128xf32> to vector<8x128xf32>
    %249 = arith.mulf %247, %248 : vector<8x128xf32>
    %cst_82 = arith.constant dense<0.000000e+00> : vector<8xf32>
    %250 = vector.multi_reduction <add>, %249, %cst_82 [1] : vector<8x128xf32> to vector<8xf32>
    %251 = vector.shape_cast %250 : vector<8xf32> to vector<8x1xf32>
    %252 = vector.broadcast %7 : f32 to vector<8x1xf32>
    %253 = arith.addf %251, %252 : vector<8x1xf32>
    %254 = arith.maximumf %204, %253 : vector<8x1xf32>
    %255 = arith.subf %204, %254 : vector<8x1xf32>
    %256 = math.exp %255 : vector<8x1xf32>
    %257 = arith.subf %253, %254 : vector<8x1xf32>
    %258 = math.exp %257 : vector<8x1xf32>
    %259 = arith.mulf %256, %210 : vector<8x1xf32>
    %260 = arith.addf %259, %258 : vector<8x1xf32>
    %261 = vector.broadcast %256 : vector<8x1xf32> to vector<8x128xf32>
    %262 = arith.mulf %261, %218 : vector<8x128xf32>
    %c0_83 = arith.constant 0 : index
    %c0_84 = arith.constant 0 : index
    %c4 = arith.constant 4 : index
    %263 = vector.load %arg2[%c0_83, %c0_84, %c4] : memref<1x8x8xf32, #tpu.memory_space<vmem>>, vector<1x8x1xf32>
    %264 = vector.shape_cast %263 : vector<1x8x1xf32> to vector<8x1xf32>
    %265 = arith.mulf %258, %264 : vector<8x1xf32>
    %266 = vector.broadcast %265 : vector<8x1xf32> to vector<8x128xf32>
    %267 = arith.mulf %266, %247 : vector<8x128xf32>
    %268 = arith.addf %262, %267 : vector<8x128xf32>
    %cst_85 = arith.constant dense<0.000000e+00> : vector<8x384xf32>
    %269 = tpu.matmul %247, %3, %cst_85 {dimension_numbers = #tpu.dot_dimension_numbers<[1], [0], [0], [1], [0, 0, 1, 1], [], []>} : vector<8x128xf32>, vector<128x384xf32>, vector<8x384xf32> -> vector<8x384xf32>
    %c40 = arith.constant 40 : index
    %c0_86 = arith.constant 0 : index
    %270 = vector.load %arg11[%c40, %c0_86] : memref<64x384xf32, #tpu.memory_space<vmem>>, vector<8x128xf32>
    %271 = vector.extract_strided_slice %269 {offsets = [0, 0], sizes = [8, 128], strides = [1, 1]} : vector<8x384xf32> to vector<8x128xf32>
    %272 = arith.addf %270, %271 : vector<8x128xf32>
    %273 = arith.negf %272 : vector<8x128xf32>
    %274 = math.exp %273 : vector<8x128xf32>
    %cst_87 = arith.constant 1.000000e+00 : f32
    %275 = vector.broadcast %cst_87 : f32 to vector<8x128xf32>
    %276 = arith.addf %275, %274 : vector<8x128xf32>
    %277 = arith.divf %275, %276 : vector<8x128xf32>
    %c40_88 = arith.constant 40 : index
    %c128_89 = arith.constant 128 : index
    %278 = vector.load %arg11[%c40_88, %c128_89] : memref<64x384xf32, #tpu.memory_space<vmem>>, vector<8x128xf32>
    %279 = vector.extract_strided_slice %269 {offsets = [0, 128], sizes = [8, 128], strides = [1, 1]} : vector<8x384xf32> to vector<8x128xf32>
    %280 = arith.addf %278, %279 : vector<8x128xf32>
    %281 = arith.negf %280 : vector<8x128xf32>
    %282 = math.exp %281 : vector<8x128xf32>
    %cst_90 = arith.constant 1.000000e+00 : f32
    %283 = vector.broadcast %cst_90 : f32 to vector<8x128xf32>
    %284 = arith.addf %283, %282 : vector<8x128xf32>
    %285 = arith.divf %283, %284 : vector<8x128xf32>
    %c40_91 = arith.constant 40 : index
    %c256_92 = arith.constant 256 : index
    %286 = vector.load %arg11[%c40_91, %c256_92] : memref<64x384xf32, #tpu.memory_space<vmem>>, vector<8x128xf32>
    %287 = vector.extract_strided_slice %269 {offsets = [0, 256], sizes = [8, 128], strides = [1, 1]} : vector<8x384xf32> to vector<8x128xf32>
    %288 = vector.broadcast %5 : vector<1x128xf32> to vector<8x128xf32>
    %289 = arith.addf %287, %288 : vector<8x128xf32>
    %290 = arith.mulf %277, %289 : vector<8x128xf32>
    %291 = arith.addf %286, %290 : vector<8x128xf32>
    %292 = math.tanh %291 : vector<8x128xf32>
    %cst_93 = arith.constant 1.000000e+00 : f32
    %293 = vector.broadcast %cst_93 : f32 to vector<8x128xf32>
    %294 = arith.subf %293, %285 : vector<8x128xf32>
    %295 = arith.mulf %294, %292 : vector<8x128xf32>
    %296 = arith.mulf %285, %247 : vector<8x128xf32>
    %297 = arith.addf %295, %296 : vector<8x128xf32>
    %298 = vector.broadcast %6 : vector<1x128xf32> to vector<8x128xf32>
    %299 = arith.mulf %297, %298 : vector<8x128xf32>
    %cst_94 = arith.constant dense<0.000000e+00> : vector<8xf32>
    %300 = vector.multi_reduction <add>, %299, %cst_94 [1] : vector<8x128xf32> to vector<8xf32>
    %301 = vector.shape_cast %300 : vector<8xf32> to vector<8x1xf32>
    %302 = vector.broadcast %7 : f32 to vector<8x1xf32>
    %303 = arith.addf %301, %302 : vector<8x1xf32>
    %304 = arith.maximumf %254, %303 : vector<8x1xf32>
    %305 = arith.subf %254, %304 : vector<8x1xf32>
    %306 = math.exp %305 : vector<8x1xf32>
    %307 = arith.subf %303, %304 : vector<8x1xf32>
    %308 = math.exp %307 : vector<8x1xf32>
    %309 = arith.mulf %306, %260 : vector<8x1xf32>
    %310 = arith.addf %309, %308 : vector<8x1xf32>
    %311 = vector.broadcast %306 : vector<8x1xf32> to vector<8x128xf32>
    %312 = arith.mulf %311, %268 : vector<8x128xf32>
    %c0_95 = arith.constant 0 : index
    %c0_96 = arith.constant 0 : index
    %c5 = arith.constant 5 : index
    %313 = vector.load %arg2[%c0_95, %c0_96, %c5] : memref<1x8x8xf32, #tpu.memory_space<vmem>>, vector<1x8x1xf32>
    %314 = vector.shape_cast %313 : vector<1x8x1xf32> to vector<8x1xf32>
    %315 = arith.mulf %308, %314 : vector<8x1xf32>
    %316 = vector.broadcast %315 : vector<8x1xf32> to vector<8x128xf32>
    %317 = arith.mulf %316, %297 : vector<8x128xf32>
    %318 = arith.addf %312, %317 : vector<8x128xf32>
    %cst_97 = arith.constant dense<0.000000e+00> : vector<8x384xf32>
    %319 = tpu.matmul %297, %3, %cst_97 {dimension_numbers = #tpu.dot_dimension_numbers<[1], [0], [0], [1], [0, 0, 1, 1], [], []>} : vector<8x128xf32>, vector<128x384xf32>, vector<8x384xf32> -> vector<8x384xf32>
    %c48 = arith.constant 48 : index
    %c0_98 = arith.constant 0 : index
    %320 = vector.load %arg11[%c48, %c0_98] : memref<64x384xf32, #tpu.memory_space<vmem>>, vector<8x128xf32>
    %321 = vector.extract_strided_slice %319 {offsets = [0, 0], sizes = [8, 128], strides = [1, 1]} : vector<8x384xf32> to vector<8x128xf32>
    %322 = arith.addf %320, %321 : vector<8x128xf32>
    %323 = arith.negf %322 : vector<8x128xf32>
    %324 = math.exp %323 : vector<8x128xf32>
    %cst_99 = arith.constant 1.000000e+00 : f32
    %325 = vector.broadcast %cst_99 : f32 to vector<8x128xf32>
    %326 = arith.addf %325, %324 : vector<8x128xf32>
    %327 = arith.divf %325, %326 : vector<8x128xf32>
    %c48_100 = arith.constant 48 : index
    %c128_101 = arith.constant 128 : index
    %328 = vector.load %arg11[%c48_100, %c128_101] : memref<64x384xf32, #tpu.memory_space<vmem>>, vector<8x128xf32>
    %329 = vector.extract_strided_slice %319 {offsets = [0, 128], sizes = [8, 128], strides = [1, 1]} : vector<8x384xf32> to vector<8x128xf32>
    %330 = arith.addf %328, %329 : vector<8x128xf32>
    %331 = arith.negf %330 : vector<8x128xf32>
    %332 = math.exp %331 : vector<8x128xf32>
    %cst_102 = arith.constant 1.000000e+00 : f32
    %333 = vector.broadcast %cst_102 : f32 to vector<8x128xf32>
    %334 = arith.addf %333, %332 : vector<8x128xf32>
    %335 = arith.divf %333, %334 : vector<8x128xf32>
    %c48_103 = arith.constant 48 : index
    %c256_104 = arith.constant 256 : index
    %336 = vector.load %arg11[%c48_103, %c256_104] : memref<64x384xf32, #tpu.memory_space<vmem>>, vector<8x128xf32>
    %337 = vector.extract_strided_slice %319 {offsets = [0, 256], sizes = [8, 128], strides = [1, 1]} : vector<8x384xf32> to vector<8x128xf32>
    %338 = vector.broadcast %5 : vector<1x128xf32> to vector<8x128xf32>
    %339 = arith.addf %337, %338 : vector<8x128xf32>
    %340 = arith.mulf %327, %339 : vector<8x128xf32>
    %341 = arith.addf %336, %340 : vector<8x128xf32>
    %342 = math.tanh %341 : vector<8x128xf32>
    %cst_105 = arith.constant 1.000000e+00 : f32
    %343 = vector.broadcast %cst_105 : f32 to vector<8x128xf32>
    %344 = arith.subf %343, %335 : vector<8x128xf32>
    %345 = arith.mulf %344, %342 : vector<8x128xf32>
    %346 = arith.mulf %335, %297 : vector<8x128xf32>
    %347 = arith.addf %345, %346 : vector<8x128xf32>
    %348 = vector.broadcast %6 : vector<1x128xf32> to vector<8x128xf32>
    %349 = arith.mulf %347, %348 : vector<8x128xf32>
    %cst_106 = arith.constant dense<0.000000e+00> : vector<8xf32>
    %350 = vector.multi_reduction <add>, %349, %cst_106 [1] : vector<8x128xf32> to vector<8xf32>
    %351 = vector.shape_cast %350 : vector<8xf32> to vector<8x1xf32>
    %352 = vector.broadcast %7 : f32 to vector<8x1xf32>
    %353 = arith.addf %351, %352 : vector<8x1xf32>
    %354 = arith.maximumf %304, %353 : vector<8x1xf32>
    %355 = arith.subf %304, %354 : vector<8x1xf32>
    %356 = math.exp %355 : vector<8x1xf32>
    %357 = arith.subf %353, %354 : vector<8x1xf32>
    %358 = math.exp %357 : vector<8x1xf32>
    %359 = arith.mulf %356, %310 : vector<8x1xf32>
    %360 = arith.addf %359, %358 : vector<8x1xf32>
    %361 = vector.broadcast %356 : vector<8x1xf32> to vector<8x128xf32>
    %362 = arith.mulf %361, %318 : vector<8x128xf32>
    %c0_107 = arith.constant 0 : index
    %c0_108 = arith.constant 0 : index
    %c6 = arith.constant 6 : index
    %363 = vector.load %arg2[%c0_107, %c0_108, %c6] : memref<1x8x8xf32, #tpu.memory_space<vmem>>, vector<1x8x1xf32>
    %364 = vector.shape_cast %363 : vector<1x8x1xf32> to vector<8x1xf32>
    %365 = arith.mulf %358, %364 : vector<8x1xf32>
    %366 = vector.broadcast %365 : vector<8x1xf32> to vector<8x128xf32>
    %367 = arith.mulf %366, %347 : vector<8x128xf32>
    %368 = arith.addf %362, %367 : vector<8x128xf32>
    %cst_109 = arith.constant dense<0.000000e+00> : vector<8x384xf32>
    %369 = tpu.matmul %347, %3, %cst_109 {dimension_numbers = #tpu.dot_dimension_numbers<[1], [0], [0], [1], [0, 0, 1, 1], [], []>} : vector<8x128xf32>, vector<128x384xf32>, vector<8x384xf32> -> vector<8x384xf32>
    %c56 = arith.constant 56 : index
    %c0_110 = arith.constant 0 : index
    %370 = vector.load %arg11[%c56, %c0_110] : memref<64x384xf32, #tpu.memory_space<vmem>>, vector<8x128xf32>
    %371 = vector.extract_strided_slice %369 {offsets = [0, 0], sizes = [8, 128], strides = [1, 1]} : vector<8x384xf32> to vector<8x128xf32>
    %372 = arith.addf %370, %371 : vector<8x128xf32>
    %373 = arith.negf %372 : vector<8x128xf32>
    %374 = math.exp %373 : vector<8x128xf32>
    %cst_111 = arith.constant 1.000000e+00 : f32
    %375 = vector.broadcast %cst_111 : f32 to vector<8x128xf32>
    %376 = arith.addf %375, %374 : vector<8x128xf32>
    %377 = arith.divf %375, %376 : vector<8x128xf32>
    %c56_112 = arith.constant 56 : index
    %c128_113 = arith.constant 128 : index
    %378 = vector.load %arg11[%c56_112, %c128_113] : memref<64x384xf32, #tpu.memory_space<vmem>>, vector<8x128xf32>
    %379 = vector.extract_strided_slice %369 {offsets = [0, 128], sizes = [8, 128], strides = [1, 1]} : vector<8x384xf32> to vector<8x128xf32>
    %380 = arith.addf %378, %379 : vector<8x128xf32>
    %381 = arith.negf %380 : vector<8x128xf32>
    %382 = math.exp %381 : vector<8x128xf32>
    %cst_114 = arith.constant 1.000000e+00 : f32
    %383 = vector.broadcast %cst_114 : f32 to vector<8x128xf32>
    %384 = arith.addf %383, %382 : vector<8x128xf32>
    %385 = arith.divf %383, %384 : vector<8x128xf32>
    %c56_115 = arith.constant 56 : index
    %c256_116 = arith.constant 256 : index
    %386 = vector.load %arg11[%c56_115, %c256_116] : memref<64x384xf32, #tpu.memory_space<vmem>>, vector<8x128xf32>
    %387 = vector.extract_strided_slice %369 {offsets = [0, 256], sizes = [8, 128], strides = [1, 1]} : vector<8x384xf32> to vector<8x128xf32>
    %388 = vector.broadcast %5 : vector<1x128xf32> to vector<8x128xf32>
    %389 = arith.addf %387, %388 : vector<8x128xf32>
    %390 = arith.mulf %377, %389 : vector<8x128xf32>
    %391 = arith.addf %386, %390 : vector<8x128xf32>
    %392 = math.tanh %391 : vector<8x128xf32>
    %cst_117 = arith.constant 1.000000e+00 : f32
    %393 = vector.broadcast %cst_117 : f32 to vector<8x128xf32>
    %394 = arith.subf %393, %385 : vector<8x128xf32>
    %395 = arith.mulf %394, %392 : vector<8x128xf32>
    %396 = arith.mulf %385, %347 : vector<8x128xf32>
    %397 = arith.addf %395, %396 : vector<8x128xf32>
    %398 = vector.broadcast %6 : vector<1x128xf32> to vector<8x128xf32>
    %399 = arith.mulf %397, %398 : vector<8x128xf32>
    %cst_118 = arith.constant dense<0.000000e+00> : vector<8xf32>
    %400 = vector.multi_reduction <add>, %399, %cst_118 [1] : vector<8x128xf32> to vector<8xf32>
    %401 = vector.shape_cast %400 : vector<8xf32> to vector<8x1xf32>
    %402 = vector.broadcast %7 : f32 to vector<8x1xf32>
    %403 = arith.addf %401, %402 : vector<8x1xf32>
    %404 = arith.maximumf %354, %403 : vector<8x1xf32>
    %405 = arith.subf %354, %404 : vector<8x1xf32>
    %406 = math.exp %405 : vector<8x1xf32>
    %407 = arith.subf %403, %404 : vector<8x1xf32>
    %408 = math.exp %407 : vector<8x1xf32>
    %409 = arith.mulf %406, %360 : vector<8x1xf32>
    %410 = arith.addf %409, %408 : vector<8x1xf32>
    %411 = vector.broadcast %406 : vector<8x1xf32> to vector<8x128xf32>
    %412 = arith.mulf %411, %368 : vector<8x128xf32>
    %c0_119 = arith.constant 0 : index
    %c0_120 = arith.constant 0 : index
    %c7 = arith.constant 7 : index
    %413 = vector.load %arg2[%c0_119, %c0_120, %c7] : memref<1x8x8xf32, #tpu.memory_space<vmem>>, vector<1x8x1xf32>
    %414 = vector.shape_cast %413 : vector<1x8x1xf32> to vector<8x1xf32>
    %415 = arith.mulf %408, %414 : vector<8x1xf32>
    %416 = vector.broadcast %415 : vector<8x1xf32> to vector<8x128xf32>
    %417 = arith.mulf %416, %397 : vector<8x128xf32>
    %418 = arith.addf %412, %417 : vector<8x128xf32>
    %c0_121 = arith.constant 0 : index
    %c0_122 = arith.constant 0 : index
    %419 = vector.load %arg12[%c0_121, %c0_122] : memref<8x128xf32, #tpu.memory_space<vmem>>, vector<8x128xf32>
    tpu.vector_store %arg12[%c0_121, %c0_122], %397 {strides = array<i32>} : memref<8x128xf32, #tpu.memory_space<vmem>>, vector<8x128xf32>,
    %c0_123 = arith.constant 0 : index
    %c0_124 = arith.constant 0 : index
    %420 = vector.load %arg13[%c0_123, %c0_124] : memref<8x1xf32, #tpu.memory_space<vmem>>, vector<8x1xf32>
    tpu.vector_store %arg13[%c0_123, %c0_124], %404 {strides = array<i32>} : memref<8x1xf32, #tpu.memory_space<vmem>>, vector<8x1xf32>,
    %c0_125 = arith.constant 0 : index
    %c0_126 = arith.constant 0 : index
    %421 = vector.load %arg14[%c0_125, %c0_126] : memref<8x1xf32, #tpu.memory_space<vmem>>, vector<8x1xf32>
    tpu.vector_store %arg14[%c0_125, %c0_126], %410 {strides = array<i32>} : memref<8x1xf32, #tpu.memory_space<vmem>>, vector<8x1xf32>,
    %c0_127 = arith.constant 0 : index
    %c0_128 = arith.constant 0 : index
    %422 = vector.load %arg15[%c0_127, %c0_128] : memref<8x128xf32, #tpu.memory_space<vmem>>, vector<8x128xf32>
    tpu.vector_store %arg15[%c0_127, %c0_128], %418 {strides = array<i32>} : memref<8x128xf32, #tpu.memory_space<vmem>>, vector<8x128xf32>,
    %c0_i32_129 = arith.constant 0 : i32
    %423 = arith.cmpi eq, %arg1, %c0_i32_129 : i32
    %424 = arith.extui %423 : i1 to i32
    %c0_i32_130 = arith.constant 0 : i32
    %425 = arith.cmpi ne, %424, %c0_i32_130 : i32
    scf.if %425 {
      %426 = vector.broadcast %410 : vector<8x1xf32> to vector<8x128xf32>
      %427 = arith.divf %418, %426 : vector<8x128xf32>
      %c0_131 = arith.constant 0 : index
      %c0_132 = arith.constant 0 : index
      %428 = vector.load %arg10[%c0_131, %c0_132] : memref<8x128xf32, #tpu.memory_space<vmem>>, vector<8x128xf32>
      tpu.vector_store %arg10[%c0_131, %c0_132], %427 {strides = array<i32>} : memref<8x128xf32, #tpu.memory_space<vmem>>, vector<8x128xf32>,
    } else {
    }
    return
  }
  func.func @transform_0(%arg0: i32, %arg1: i32) -> (i32, i32, i32) {
    %c0_i32 = arith.constant 0 : i32
    %c0_i32_0 = arith.constant 0 : i32
    return %arg1, %arg0, %c0_i32 : i32, i32, i32
  }
  func.func @transform_1(%arg0: i32, %arg1: i32) -> (i32, i32, i32) {
    %c0_i32 = arith.constant 0 : i32
    %c0_i32_0 = arith.constant 0 : i32
    return %arg1, %arg0, %c0_i32 : i32, i32, i32
  }
  func.func @transform_2(%arg0: i32, %arg1: i32) -> (i32, i32) {
    %c0_i32 = arith.constant 0 : i32
    %c0_i32_0 = arith.constant 0 : i32
    %c0_i32_1 = arith.constant 0 : i32
    return %c0_i32, %c0_i32_0 : i32, i32
  }
  func.func @transform_3(%arg0: i32, %arg1: i32) -> (i32, i32) {
    %c0_i32 = arith.constant 0 : i32
    %c0_i32_0 = arith.constant 0 : i32
    %c0_i32_1 = arith.constant 0 : i32
    return %c0_i32, %c0_i32_0 : i32, i32
  }
  func.func @transform_4(%arg0: i32, %arg1: i32) -> (i32, i32) {
    %c0_i32 = arith.constant 0 : i32
    %c0_i32_0 = arith.constant 0 : i32
    %c0_i32_1 = arith.constant 0 : i32
    return %c0_i32, %c0_i32_0 : i32, i32
  }
  func.func @transform_5(%arg0: i32, %arg1: i32) -> (i32, i32) {
    %c0_i32 = arith.constant 0 : i32
    %c0_i32_0 = arith.constant 0 : i32
    %c0_i32_1 = arith.constant 0 : i32
    return %c0_i32, %c0_i32_0 : i32, i32
  }
  func.func @transform_6(%arg0: i32, %arg1: i32) -> (i32, i32) {
    %c0_i32 = arith.constant 0 : i32
    %c0_i32_0 = arith.constant 0 : i32
    %c0_i32_1 = arith.constant 0 : i32
    return %c0_i32, %c0_i32_0 : i32, i32
  }
  func.func @transform_7(%arg0: i32, %arg1: i32) -> (i32, i32) {
    %c0_i32 = arith.constant 0 : i32
    %c0_i32_0 = arith.constant 0 : i32
    %c0_i32_1 = arith.constant 0 : i32
    return %c0_i32, %c0_i32_0 : i32, i32
  }
  func.func @transform_8(%arg0: i32, %arg1: i32) -> (i32, i32) {
    %c0_i32 = arith.constant 0 : i32
    %c0_i32_0 = arith.constant 0 : i32
    return %arg0, %c0_i32 : i32, i32
  }
}

</mosaic_0001>

<bundles_post_ra>
// kernel: tpu_custom_call.1
= control target key start
LH: loop header
LB: loop body
LE: loop exit
PB: predicated region body
PF: predicated region fallthrough
CT: control target
= control target key end

     0   :  { %14 = vsyncpa [#allocation9], 0  ;;  %s2877_s0 = inlined_call_operand.hbm [shape: f32[1,8,8], index: 0, kind: input, shape index: {}]   ;;  %s2878_s1 = inlined_call_operand.hbm [shape: f32[8,8,128], index: 1, kind: input, shape index: {}]   ;;  %s2879_s2 = inlined_call_operand.hbm [shape: f32[128,384], index: 2, kind: input, shape index: {}]   ;;  %s2880_s3 = inlined_call_operand.hbm [shape: f32[128,384], index: 3, kind: input, shape index: {}]   ;;  %s2881_s4 = inlined_call_operand.vmem [shape: f32[1,384], index: 4, kind: input, shape index: {}]   ;;  %s2882_s5 = inlined_call_operand.vmem [shape: f32[1,128], index: 5, kind: input, shape index: {}]   ;;  %s2883_s6 = inlined_call_operand.vmem [shape: f32[1,128], index: 6, kind: input, shape index: {}]   ;;  %s2884_s7 = inlined_call_operand.<no memory space> [shape: f32[1,1], index: 7, kind: input, shape index: {}]   ;;  %s2885_s8 = inlined_call_operand.hbm [shape: f32[8,128], index: 8, kind: output, shape index: {}]  }
   0x1   :  { %15 = vsyncpa [#allocation12], 0 }
   0x2   :  { %16 = vsyncpa [#allocation15], 0  ;;  %s33_s29 = sshll.u32 %s2878_s1, 4  ;;  %s34_s29 = int_to_ptr.hbm [resolvable:$true] %s33_s29 }
   0x3   :  { %17 = vsyncpa [#allocation10], 0  ;;  %s1882_s30 = smov [#allocation11]   ;;  %s23_s12 = sshll.u32 %s2877_s0, 4  ;;  %s24_s12 = int_to_ptr.hbm [resolvable:$true] %s23_s12 }
   0x4   :  { %s35_s9 = sshll.u32 %s1882_s30, 4  ;;  %s1883_s13 = smov 128   ;;  %s36_s9 = int_to_ptr.vmem [resolvable:$true] %s35_s9 }
   0x5   :  { %s1884_s14 = smov 8   ;;  %s1885_s15 = smov [#allocation8]  }
   0x6   :  { %41 = dma.hbm_to_vmem [thread:$0]  %s34_s29, 1024, %s36_s9, [#allocation12], %s1883_s13, %s1883_s13, %s1884_s14  }
   0x7   :  { %s25_s16 = sshll.u32 %s1885_s15, 4  ;;  %s46_s19 = sshll.u32 %s2879_s2, 4  ;;  %s26_s16 = int_to_ptr.vmem [resolvable:$true] %s25_s16  ;;  %s47_s19 = int_to_ptr.hbm [resolvable:$true] %s46_s19 }
   0x8   :  { %28 = dma.hbm_to_vmem [thread:$0]  %s24_s12, 128, %s26_s16, [#allocation9]  }
   0x9   :  { %s1886_s1 = smov [#allocation13]   ;;  %s59_s0 = sshll.u32 %s2880_s3, 4  ;;  %s60_s0 = int_to_ptr.hbm [resolvable:$true] %s59_s0 }
   0xa   :  { %s48_s20 = sshll.u32 %s1886_s1, 4  ;;  %s1887_s23 = smov 384   ;;  %s49_s20 = int_to_ptr.vmem [resolvable:$true] %s48_s20 }
   0xb   :  { %s1888_s24 = smov 24   ;;  %s1889_s25 = smov [#allocation14]  }
   0xc   :  { %54 = dma.hbm_to_vmem [thread:$0]  %s47_s19, 6144, %s49_s20, [#allocation12], %s1887_s23, %s1887_s23, %s1888_s24  }
   0xd   :  { %s61_s26 = sshll.u32 %s1889_s25, 4  ;;  %s62_s26 = int_to_ptr.vmem [resolvable:$true] %s61_s26 }
   0xe   :  { %67 = dma.hbm_to_vmem [thread:$0]  %s60_s0, 6144, %s62_s26, [#allocation15], %s1887_s23, %s1887_s23, %s1888_s24  }
   0xf   :  { %1874 = dma.done.wait [#allocation9], 128  }
  0x10   :  { %1875 = vsyncadd [#allocation9], 4294967168 }
  0x11   :  { %1876 = dma.done.wait [#allocation12], 7168  }
  0x12   :  { %1877 = vsyncadd [#allocation12], 4294960128 }
  0x13   :  { %1878 = dma.done.wait [#allocation15], 6144  }
  0x14   :  { %1879 = vsyncadd [#allocation15], 4294961152  ;;  %v206_v0 = vld [vmem:[#allocation13 + $0x168] sm:$0xff]  ;;  %v203_v2 = vld [vmem:[#allocation13 + $0x150] sm:$0xff]  ;;  %vm97_vm0 = vcmask 7168   ;;  %v1890_v4 = vmov -inf  }
  0x15   :  { %v1958_v1 = vld [vmem:[#allocation14 + $0x168] sm:$0xff]  ;;  %216 = vmatpush.msra.mxu0 %v206_v0  ;;  %v1961_v3 = vld [vmem:[#allocation14 + $0x150] sm:$0xff]  ;;  %98 = vst.msk [vmem:[#allocation4] sm:$0xff] %vm97_vm0, %v1890_v4  ;;  %v200_v5 = vld [vmem:[#allocation13 + $0x138] sm:$0xff]  ;;  %v1891_v7 = vmov 0.0   ;;  %s1892_s30 = smov 126  }
  0x16   :  { %367 = vmatpush.msra.mxu3 %v1958_v1  ;;  %v1964_v6 = vld [vmem:[#allocation14 + $0x138] sm:$0xff]  ;;  %99 = vst.msk [vmem:[#allocation5] sm:$0xff] %vm97_vm0, %v1891_v7  ;;  %v197_v8 = vld [vmem:[#allocation13 + $0x120] sm:$0xff]  ;;  %v194_v10 = vld [vmem:[#allocation13 + $0x108] sm:$0xff]  ;;  %s1893_s9 = smov 127   ;;  %s1894_s10 = smov 125  }
  0x17   :  { %217 = vmatpush.msra.mxu0 %v203_v2  ;;  %v1969_v9 = vld [vmem:[#allocation14 + $0x120] sm:$0xff]  ;;  %v1972_v11 = vld [vmem:[#allocation14 + $0x108] sm:$0xff]  ;;  %v191_v12 = vld [vmem:[#allocation13 + $0xf0] sm:$0xff]  ;;  %s1898_s16 = smov 123   ;;  %s1899_s17 = smov 121  }
  0x18   :  { %368 = vmatpush.msra.mxu3 %v1961_v3  ;;  %v1975_v13 = vld [vmem:[#allocation14 + $0xf0] sm:$0xff]  ;;  %v188_v14 = vld [vmem:[#allocation13 + $0xd8] sm:$0xff]  ;;  %v185_v16 = vld [vmem:[#allocation13 + $0xc0] sm:$0xff]  ;;  %s1900_s18 = smov [#allocation16]   ;;  %s1537_s21 = sshll.u32 %s2885_s8, 4  ;;  %s1538_s21 = int_to_ptr.hbm [resolvable:$true] %s1537_s21 }
  0x19   :  { %218 = vmatpush.msra.mxu0 %v200_v5  ;;  %v1978_v15 = vld [vmem:[#allocation14 + $0xd8] sm:$0xff]  ;;  %v1981_v17 = vld [vmem:[#allocation14 + $0xc0] sm:$0xff]  ;;  %v207_v18 = vld [vmem:[#allocation13 + $0x170] sm:$0xff]  ;;  %s1535_s19 = sshll.u32 %s1900_s18, 4  ;;  %s1536_s19 = int_to_ptr.vmem [resolvable:$true] %s1535_s19 }
  0x1a   :  { %369 = vmatpush.msra.mxu3 %v1964_v6  ;;  %v204_v19 = vld [vmem:[#allocation13 + $0x158] sm:$0xff]  ;;  %v182_v20 = vld [vmem:[#allocation13 + $0xa8] sm:$0xff]  ;;  %257 = vmatpush.msra.mxu1 %v207_v18  ;;  %v201_v22 = vld [vmem:[#allocation13 + $0x140] sm:$0xff] }
  0x1b   :  { %219 = vmatpush.msra.mxu0 %v197_v8  ;;  %v1984_v21 = vld [vmem:[#allocation14 + $0xa8] sm:$0xff]  ;;  %v179_v23 = vld [vmem:[#allocation13 + $0x90] sm:$0xff]  ;;  %v176_v26 = vld [vmem:[#allocation13 + $0x78] sm:$0xff] }
  0x1c   :  { %370 = vmatpush.msra.mxu3 %v1969_v9  ;;  %v1987_v24 = vld [vmem:[#allocation14 + $0x90] sm:$0xff]  ;;  %258 = vmatpush.msra.mxu1 %v204_v19  ;;  %v198_v25 = vld [vmem:[#allocation13 + $0x128] sm:$0xff]  ;;  %v1990_v27 = vld [vmem:[#allocation14 + $0x78] sm:$0xff] }
  0x1d   :  { %220 = vmatpush.msra.mxu0 %v194_v10  ;;  %v173_v28 = vld [vmem:[#allocation13 + $0x60] sm:$0xff]  ;;  %v195_v29 = vld [vmem:[#allocation13 + $0x110] sm:$0xff]  ;;  %v192_v31 = vld [vmem:[#allocation13 + $0xf8] sm:$0xff] }
  0x1e   :  { %371 = vmatpush.msra.mxu3 %v1972_v11  ;;  %259 = vmatpush.msra.mxu1 %v201_v22  ;;  %v1993_v30 = vld [vmem:[#allocation14 + $0x60] sm:$0xff]  ;;  %v170_v32 = vld [vmem:[#allocation13 + $0x48] sm:$0xff]  ;;  %v167_v35 = vld [vmem:[#allocation13 + $0x30] sm:$0xff] }
  0x1f   :  { %221 = vmatpush.msra.mxu0 %v191_v12  ;;  %v1996_v33 = vld [vmem:[#allocation14 + $0x48] sm:$0xff]  ;;  %v189_v34 = vld [vmem:[#allocation13 + $0xe0] sm:$0xff]  ;;  %v1999_v36 = vld [vmem:[#allocation14 + $0x30] sm:$0xff] }
  0x20   :  { %372 = vmatpush.msra.mxu3 %v1975_v13  ;;  %260 = vmatpush.msra.mxu1 %v198_v25  ;;  %2922 = vst [vmem:[#allocation21_spill] sm:$0xff] %v1999_v36  ;;  %v186_v37 = vld [vmem:[#allocation13 + $0xc8] sm:$0xff]  ;;  %v164_v38 = vld [vmem:[#allocation13 + $0x18] sm:$0xff]  ;;  %v183_v40 = vld [vmem:[#allocation13 + $0xb0] sm:$0xff] }
  0x21   :  { %222 = vmatpush.msra.mxu0 %v188_v14  ;;  %v2002_v39 = vld [vmem:[#allocation14 + $0x18] sm:$0xff]  ;;  %v161_v41 = vld [vmem:[#allocation13] sm:$0xff]  ;;  %v2010_v45 = vld [vmem:[#allocation14 + $0x170] sm:$0xff] }
  0x22   :  { %373 = vmatpush.msra.mxu3 %v1978_v15  ;;  %261 = vmatpush.msra.mxu1 %v195_v29  ;;  %2923 = vst [vmem:[#allocation22_spill] sm:$0xff] %v2002_v39  ;;  %v2005_v42 = vld [vmem:[#allocation14] sm:$0xff]  ;;  %v208_v44 = vld [vmem:[#allocation13 + $0x178] sm:$0xff]  ;;  %v202_v52 = vld [vmem:[#allocation13 + $0x148] sm:$0xff] }
  0x23   :  { %223 = vmatpush.msra.mxu0 %v185_v16  ;;  %2924 = vst [vmem:[#allocation23_spill] sm:$0xff] %v2005_v42  ;;  %v2008_v43 = vld [vmem:[#allocation11] sm:$0xff]  ;;  %v2012_v46 = vld [vmem:[#allocation14 + $0x178] sm:$0xff]  ;;  %298 = vmatpush.msra.mxu2 %v208_v44  ;;  %v2025_v54 = vld [vmem:[#allocation14 + $0x148] sm:$0xff] }
  0x24   :  { %374 = vmatpush.msra.mxu3 %v1981_v17  ;;  %262 = vmatpush.msra.mxu1 %v192_v31  ;;  %v180_v47 = vld [vmem:[#allocation13 + $0x98] sm:$0xff]  ;;  %v205_v48 = vld [vmem:[#allocation13 + $0x160] sm:$0xff]  ;;  %v174_v55 = vld [vmem:[#allocation13 + $0x68] sm:$0xff] }
  0x25   :  { %224 = vmatpush.msra.mxu0 %v182_v20  ;;  %v2017_v49 = vld [vmem:[#allocation14 + $0x158] sm:$0xff]  ;;  %v2019_v50 = vld [vmem:[#allocation14 + $0x160] sm:$0xff]  ;;  %299 = vmatpush.msra.mxu2 %v205_v48  ;;  %v199_v56 = vld [vmem:[#allocation13 + $0x130] sm:$0xff] }
  0x26   :  { %375 = vmatpush.msra.mxu3 %v1984_v21  ;;  %263 = vmatpush.msra.mxu1 %v189_v34  ;;  %v177_v51 = vld [vmem:[#allocation13 + $0x80] sm:$0xff]  ;;  %v2029_v57 = vld [vmem:[#allocation14 + $0x128] sm:$0xff]  ;;  %v2031_v58 = vld [vmem:[#allocation14 + $0x130] sm:$0xff] }
  0x27   :  { %225 = vmatpush.msra.mxu0 %v179_v23  ;;  %v2023_v53 = vld [vmem:[#allocation14 + $0x140] sm:$0xff]  ;;  %300 = vmatpush.msra.mxu2 %v202_v52  ;;  %v2034_v59 = vld [vmem:[#allocation11 + $0x8] sm:$0xff]  ;;  %v171_v60 = vld [vmem:[#allocation13 + $0x50] sm:$0xff] }
  0x28   :  { %376 = vmatpush.msra.mxu3 %v1987_v24  ;;  %264 = vmatpush.msra.mxu1 %v186_v37  ;;  %v2037_v61 = vld [vmem:[#allocation14 + $0x110] sm:$0xff]  ;;  %v2039_v62 = vld [vmem:[#allocation14 + $0x118] sm:$0xff]  ;;  %v2046_v4 = vld [vmem:[#allocation14 + $0x100] sm:$0xff] }
  0x29   :  { %226 = vmatpush.msra.mxu0 %v176_v26  ;;  %301 = vmatpush.msra.mxu2 %v199_v56  ;;  %v168_v63 = vld [vmem:[#allocation13 + $0x38] sm:$0xff]  ;;  %v165_v5 = vld [vmem:[#allocation13 + $0x20] sm:$0xff]  ;;  %v2052_v12 = vld [vmem:[#allocation14 + $0xe8] sm:$0xff] }
  0x2a   :  { %377 = vmatpush.msra.mxu3 %v1990_v27  ;;  %265 = vmatpush.msra.mxu1 %v183_v40  ;;  %v196_v0 = vld [vmem:[#allocation13 + $0x118] sm:$0xff]  ;;  %v193_v8 = vld [vmem:[#allocation13 + $0x100] sm:$0xff]  ;;  %v162_v14 = vld [vmem:[#allocation13 + $0x8] sm:$0xff] }
  0x2b   :  { %227 = vmatpush.msra.mxu0 %v173_v28  ;;  %v2044_v2 = vld [vmem:[#allocation14 + $0xf8] sm:$0xff]  ;;  %v2050_v10 = vld [vmem:[#allocation14 + $0xe0] sm:$0xff]  ;;  %302 = vmatpush.msra.mxu2 %v196_v0  ;;  %v190_v16 = vld [vmem:[#allocation13 + $0xe8] sm:$0xff] }
  0x2c   :  { %378 = vmatpush.msra.mxu3 %v1993_v30  ;;  %266 = vmatpush.msra.mxu1 %v180_v47  ;;  %v2056_v18 = vld [vmem:[#allocation14 + $0xc8] sm:$0xff]  ;;  %v2058_v19 = vld [vmem:[#allocation14 + $0xd0] sm:$0xff]  ;;  %v2066_v23 = vld [vmem:[#allocation14 + $0xb8] sm:$0xff] }
  0x2d   :  { %228 = vmatpush.msra.mxu0 %v170_v32  ;;  %303 = vmatpush.msra.mxu2 %v193_v8  ;;  %v2061_v20 = vld [vmem:[#allocation11 + $0x10] sm:$0xff]  ;;  %v2071_v26 = vld [vmem:[#allocation14 + $0x98] sm:$0xff]  ;;  %v2074_v28 = vld [vmem:[#allocation14 + $0xa0] sm:$0xff] }
  0x2e   :  { %379 = vmatpush.msra.mxu3 %v1996_v33  ;;  %267 = vmatpush.msra.mxu1 %v177_v51  ;;  %v2064_v22 = vld [vmem:[#allocation14 + $0xb0] sm:$0xff]  ;;  %v184_v29 = vld [vmem:[#allocation13 + $0xb8] sm:$0xff]  ;;  %v2078_v31 = vld [vmem:[#allocation14 + $0x80] sm:$0xff] }
  0x2f   :  { %229 = vmatpush.msra.mxu0 %v167_v35  ;;  %304 = vmatpush.msra.mxu2 %v190_v16  ;;  %v187_v25 = vld [vmem:[#allocation13 + $0xd0] sm:$0xff]  ;;  %v2080_v32 = vld [vmem:[#allocation14 + $0x88] sm:$0xff]  ;;  %v181_v34 = vld [vmem:[#allocation13 + $0xa0] sm:$0xff] }
  0x30   :  { %380 = vmatpush.msra.mxu3 %v1999_v36  ;;  %268 = vmatpush.msra.mxu1 %v174_v55  ;;  %v2085_v35 = vld [vmem:[#allocation14 + $0x68] sm:$0xff]  ;;  %v2087_v37 = vld [vmem:[#allocation14 + $0x70] sm:$0xff]  ;;  %v2096_v44 = vld [vmem:[#allocation14 + $0x58] sm:$0xff] }
  0x31   :  { %230 = vmatpush.msra.mxu0 %v164_v38  ;;  %305 = vmatpush.msra.mxu2 %v187_v25  ;;  %v2091_v38 = vld [vmem:[#allocation11 + $0x18] sm:$0xff]  ;;  %v178_v40 = vld [vmem:[#allocation13 + $0x88] sm:$0xff]  ;;  %v175_v47 = vld [vmem:[#allocation13 + $0x70] sm:$0xff] }
  0x32   :  { %381 = vmatpush.msra.mxu3 %v2002_v39  ;;  %269 = vmatpush.msra.mxu1 %v171_v60  ;;  %v2102_v48 = vld [vmem:[#allocation14 + $0x38] sm:$0xff]  ;;  %v2104_v51 = vld [vmem:[#allocation14 + $0x40] sm:$0xff]  ;;  %v2110_v56 = vld [vmem:[#allocation14 + $0x28] sm:$0xff] }
  0x33   :  { %231 = vmatpush.msra.mxu0 %v161_v41  ;;  %306 = vmatpush.msra.mxu2 %v184_v29  ;;  %v2094_v41 = vld [vmem:[#allocation14 + $0x50] sm:$0xff]  ;;  %2925 = vst [vmem:[#allocation24_spill] sm:$0xff] %v2102_v48  ;;  %v172_v52 = vld [vmem:[#allocation13 + $0x58] sm:$0xff]  ;;  %v2108_v55 = vld [vmem:[#allocation14 + $0x20] sm:$0xff] }
  0x34   :  { %382 = vmatpush.msra.mxu3 %v2005_v42  ;;  %232 = vmatmul.f32.vlgmr.msra.gmra.mxu0 %v2008_v43  ;;  %2926 = vst [vmem:[#allocation25_spill] sm:$0xff] %v2108_v55  ;;  %v169_v60 = vld [vmem:[#allocation13 + $0x40] sm:$0xff]  ;;  %v2117_v0 = vld [vmem:[#allocation14 + $0x10] sm:$0xff]  ;;  %v166_v8 = vld [vmem:[#allocation13 + $0x28] sm:$0xff] }
  0x35   :  { %383 = vmatmul.f32.vlgmr.msra.gmra.mxu3 %v1891_v7  ;;  %407 = vmatpush.msrb.mxu0 %v2012_v46  ;;  %2927 = vst [vmem:[#allocation26_spill] sm:$0xff] %v2110_v56  ;;  %v2135_v16 = vld [vmem:[#allocation11 + $0x28] sm:$0xff] }
  0x36   :  { %387 = vmatpush.msrb.mxu3 %v2010_v45  ;;  %270 = vmatpush.msra.mxu1 %v168_v63  ;;  %v2115_v63 = vld [vmem:[#allocation14 + $0x8] sm:$0xff]  ;;  %2929 = vst [vmem:[#allocation28_spill] sm:$0xff] %v2117_v0 }
  0x37   :  { %408 = vmatpush.msrb.mxu0 %v2019_v50  ;;  %307 = vmatpush.msra.mxu2 %v181_v34  ;;  %2928 = vst [vmem:[#allocation27_spill] sm:$0xff] %v2115_v63 }
  0x38   :  { %388 = vmatpush.msrb.mxu3 %v2017_v49  ;;  %271 = vmatpush.msra.mxu1 %v165_v5  ;;  %v2121_v5 = vld [vmem:[#allocation11 + $0x20] sm:$0xff] }
  0x39   :  { %409 = vmatpush.msrb.mxu0 %v2025_v54  ;;  %308 = vmatpush.msra.mxu2 %v178_v40 }
  0x3a   :  { %389 = vmatpush.msrb.mxu3 %v2023_v53  ;;  %272 = vmatpush.msra.mxu1 %v162_v14  ;;  %v163_v14 = vld [vmem:[#allocation13 + $0x10] sm:$0xff] }
  0x3b   :  { %410 = vmatpush.msrb.mxu0 %v2031_v58  ;;  %273 = vmatmul.f32.vlgmr.msra.gmra.mxu1 %v2008_v43 }
  0x3c   :  { %390 = vmatpush.msrb.mxu3 %v2029_v57  ;;  %235 = vmatmul.f32.gmra.mxu0 %v2034_v59 }
  0x3d   :  { %411 = vmatpush.msrb.mxu0 %v2039_v62  ;;  %513 = vmatpush.msrb.mxu1 %v1958_v1 }
  0x3e   :  { %391 = vmatpush.msrb.mxu3 %v2037_v61  ;;  %309 = vmatpush.msra.mxu2 %v175_v47 }
  0x3f   :  { %412 = vmatpush.msrb.mxu0 %v2046_v4  ;;  %514 = vmatpush.msrb.mxu1 %v1961_v3 }
  0x40   :  { %392 = vmatpush.msrb.mxu3 %v2044_v2  ;;  %310 = vmatpush.msra.mxu2 %v172_v52 }
  0x41   :  { %413 = vmatpush.msrb.mxu0 %v2052_v12  ;;  %515 = vmatpush.msrb.mxu1 %v1964_v6 }
  0x42   :  { %393 = vmatpush.msrb.mxu3 %v2050_v10  ;;  %311 = vmatpush.msra.mxu2 %v169_v60 }
  0x43   :  { %414 = vmatpush.msrb.mxu0 %v2058_v19  ;;  %276 = vmatmul.f32.gmra.mxu1 %v2034_v59 }
  0x44   :  { %394 = vmatpush.msrb.mxu3 %v2056_v18  ;;  %238 = vmatmul.f32.gmra.mxu0 %v2061_v20 }
  0x45   :  { %415 = vmatpush.msrb.mxu0 %v2066_v23  ;;  %516 = vmatpush.msrb.mxu1 %v1969_v9 }
  0x46   :  { %395 = vmatpush.msrb.mxu3 %v2064_v22  ;;  %312 = vmatpush.msra.mxu2 %v166_v8 }
  0x47   :  { %416 = vmatpush.msrb.mxu0 %v2074_v28  ;;  %517 = vmatpush.msrb.mxu1 %v1972_v11 }
  0x48   :  { %396 = vmatpush.msrb.mxu3 %v2071_v26  ;;  %313 = vmatpush.msra.mxu2 %v163_v14 }
  0x49   :  { %417 = vmatpush.msrb.mxu0 %v2080_v32  ;;  %518 = vmatpush.msrb.mxu1 %v1975_v13 }
  0x4a   :  { %397 = vmatpush.msrb.mxu3 %v2078_v31  ;;  %314 = vmatmul.f32.vlgmr.msra.gmra.mxu2 %v2008_v43  ;;  %v2153_v43 = vld [vmem:[#allocation11 + $0x30] sm:$0xff] }
  0x4b   :  { %418 = vmatpush.msrb.mxu0 %v2087_v37  ;;  %279 = vmatmul.f32.gmra.mxu1 %v2061_v20 }
  0x4c   :  { %398 = vmatpush.msrb.mxu3 %v2085_v35  ;;  %241 = vmatmul.f32.gmra.mxu0 %v2091_v38 }
  0x4d   :  { %419 = vmatpush.msrb.mxu0 %v2096_v44  ;;  %519 = vmatpush.msrb.mxu1 %v1978_v15 }
  0x4e   :  { %399 = vmatpush.msrb.mxu3 %v2094_v41  ;;  %533 = vmatpush.msrb.mxu2 %v2010_v45 }
  0x4f   :  { %420 = vmatpush.msrb.mxu0 %v2104_v51  ;;  %520 = vmatpush.msrb.mxu1 %v1981_v17 }
  0x50   :  { %400 = vmatpush.msrb.mxu3 %v2102_v48  ;;  %534 = vmatpush.msrb.mxu2 %v2017_v49 }
  0x51   :  { %421 = vmatpush.msrb.mxu0 %v2110_v56  ;;  %521 = vmatpush.msrb.mxu1 %v1984_v21 }
  0x52   :  { %401 = vmatpush.msrb.mxu3 %v2108_v55  ;;  %535 = vmatpush.msrb.mxu2 %v2023_v53 }
  0x53   :  { %422 = vmatpush.msrb.mxu0 %v2117_v0  ;;  %522 = vmatpush.msrb.mxu1 %v1987_v24 }
  0x54   :  { %402 = vmatpush.msrb.mxu3 %v2115_v63  ;;  %244 = vmatmul.f32.gmra.mxu0 %v2121_v5 }
  0x55   :  { %403 = vmatmul.f32.vlgmr.msrb.gmra.mxu3 %v1891_v7  ;;  %655 = vmatpush.msra.mxu0 %v1958_v1 }
  0x56   :  { %553 = vmatpush.msra.mxu3 %v2012_v46  ;;  %282 = vmatmul.f32.gmra.mxu1 %v2091_v38 }
  0x57   :  { %536 = vmatpush.msrb.mxu2 %v2029_v57  ;;  %523 = vmatpush.msrb.mxu1 %v1990_v27 }
  0x58   :  { %554 = vmatpush.msra.mxu3 %v2019_v50  ;;  %317 = vmatmul.f32.gmra.mxu2 %v2034_v59  ;;  %v2171_v59 = vld [vmem:[#allocation11 + $0x38] sm:$0xff] }
  0x59   :  { %537 = vmatpush.msrb.mxu2 %v2037_v61  ;;  %524 = vmatpush.msrb.mxu1 %v1993_v30 }
  0x5a   :  { %555 = vmatpush.msra.mxu3 %v2025_v54  ;;  %656 = vmatpush.msra.mxu0 %v1961_v3 }
  0x5b   :  { %538 = vmatpush.msrb.mxu2 %v2044_v2  ;;  %525 = vmatpush.msrb.mxu1 %v1996_v33 }
  0x5c   :  { %247 = vmatmul.f32.gmra.mxu0 %v2135_v16  ;;  %556 = vmatpush.msra.mxu3 %v2031_v58 }
  0x5d   :  { %539 = vmatpush.msrb.mxu2 %v2050_v10  ;;  %526 = vmatpush.msrb.mxu1 %v1999_v36 }
  0x5e   :  { %557 = vmatpush.msra.mxu3 %v2039_v62  ;;  %285 = vmatmul.f32.gmra.mxu1 %v2121_v5 }
  0x5f   :  { %540 = vmatpush.msrb.mxu2 %v2056_v18  ;;  %527 = vmatpush.msrb.mxu1 %v2002_v39 }
  0x60   :  { %558 = vmatpush.msra.mxu3 %v2046_v4  ;;  %320 = vmatmul.f32.gmra.mxu2 %v2061_v20  ;;  %v149_v20 = vld [vmem:[%s2881_s4] sm:$0x7] }
  0x61   :  { %541 = vmatpush.msrb.mxu2 %v2064_v22  ;;  %528 = vmatpush.msrb.mxu1 %v2005_v42  ;;  %v210_v25 = vperm.slane %v149_v20, 0 }
  0x62   :  { %559 = vmatpush.msra.mxu3 %v2052_v12  ;;  %657 = vmatpush.msra.mxu0 %v1964_v6 }
  0x63   :  { %675 = vmatpush.msra.mxu1 %v2010_v45  ;;  %542 = vmatpush.msrb.mxu2 %v2071_v26 }
  0x64   :  { %250 = vmatmul.f32.gmra.mxu0 %v2153_v43  ;;  %560 = vmatpush.msra.mxu3 %v2058_v19 }
  0x65   :  { %543 = vmatpush.msrb.mxu2 %v2078_v31  ;;  %676 = vmatpush.msra.mxu1 %v2017_v49 }
  0x66   :  { %561 = vmatpush.msra.mxu3 %v2066_v23  ;;  %288 = vmatmul.f32.gmra.mxu1 %v2135_v16 }
  0x67   :  { %544 = vmatpush.msrb.mxu2 %v2085_v35  ;;  %677 = vmatpush.msra.mxu1 %v2023_v53 }
  0x68   :  { %562 = vmatpush.msra.mxu3 %v2074_v28  ;;  %323 = vmatmul.f32.gmra.mxu2 %v2091_v38 }
  0x69   :  { %545 = vmatpush.msrb.mxu2 %v2094_v41  ;;  %658 = vmatpush.msra.mxu0 %v1969_v9 }
  0x6a   :  { %563 = vmatpush.msra.mxu3 %v2080_v32  ;;  %678 = vmatpush.msra.mxu1 %v2029_v57 }
  0x6b   :  { %546 = vmatpush.msrb.mxu2 %v2102_v48  ;;  %659 = vmatpush.msra.mxu0 %v1972_v11 }
  0x6c   :  { %253 = vmatmul.f32.gmra.mxu0 %v2171_v59  ;;  %564 = vmatpush.msra.mxu3 %v2087_v37 }
  0x6d   :  { %547 = vmatpush.msrb.mxu2 %v2108_v55  ;;  %679 = vmatpush.msra.mxu1 %v2037_v61 }
  0x6e   :  { %565 = vmatpush.msra.mxu3 %v2096_v44  ;;  %291 = vmatmul.f32.gmra.mxu1 %v2153_v43 }
  0x6f   :  { %660 = vmatpush.msra.mxu0 %v1975_v13  ;;  %548 = vmatpush.msrb.mxu2 %v2115_v63 }
  0x70   :  { %566 = vmatpush.msra.mxu3 %v2104_v51  ;;  %680 = vmatpush.msra.mxu1 %v2044_v2 }
  0x71   :  { %326 = vmatmul.f32.gmra.mxu2 %v2121_v5  ;;  %661 = vmatpush.msra.mxu0 %v1978_v15 }
  0x72   :  { %567 = vmatpush.msra.mxu3 %v2110_v56  ;;  %695 = vmatpush.msra.mxu2 %v2012_v46 }
  0x73   :  { %681 = vmatpush.msra.mxu1 %v2050_v10  ;;  %662 = vmatpush.msra.mxu0 %v1981_v17 }
  0x74   :  { %423 = vmatmul.f32.vlgmr.msrb.gmra.mxu0 %v1891_v7  ;;  %568 = vmatpush.msra.mxu3 %v2117_v0 }
  0x75   :  { %696 = vmatpush.msra.mxu2 %v2019_v50  ;;  %682 = vmatpush.msra.mxu1 %v2056_v18 }
  0x76   :  { %796 = vmatpush.msrb.mxu3 %v1958_v1  ;;  %663 = vmatpush.msra.mxu0 %v1984_v21 }
  0x77   :  { %697 = vmatpush.msra.mxu2 %v2025_v54  ;;  %683 = vmatpush.msra.mxu1 %v2064_v22 }
  0x78   :  { %797 = vmatpush.msrb.mxu3 %v1961_v3  ;;  %294 = vmatmul.f32.gmra.mxu1 %v2171_v59 }
  0x79   :  { %664 = vmatpush.msra.mxu0 %v1987_v24  ;;  %698 = vmatpush.msra.mxu2 %v2031_v58 }
  0x7a   :  { %684 = vmatpush.msra.mxu1 %v2071_v26  ;;  %329 = vmatmul.f32.gmra.mxu2 %v2135_v16 }
  0x7b   :  { %665 = vmatpush.msra.mxu0 %v1990_v27  ;;  %699 = vmatpush.msra.mxu2 %v2039_v62 }
  0x7c   :  { %685 = vmatpush.msra.mxu1 %v2078_v31  ;;  %798 = vmatpush.msrb.mxu3 %v1964_v6 }
  0x7d   :  { %666 = vmatpush.msra.mxu0 %v1993_v30  ;;  %700 = vmatpush.msra.mxu2 %v2046_v4 }
  0x7e   :  { %686 = vmatpush.msra.mxu1 %v2085_v35  ;;  %799 = vmatpush.msrb.mxu3 %v1969_v9 }
  0x7f   :  { %667 = vmatpush.msra.mxu0 %v1996_v33  ;;  %701 = vmatpush.msra.mxu2 %v2052_v12 }
  0x80   :  { %687 = vmatpush.msra.mxu1 %v2094_v41  ;;  %800 = vmatpush.msrb.mxu3 %v1972_v11 }
  0x81   :  { %668 = vmatpush.msra.mxu0 %v1999_v36  ;;  %702 = vmatpush.msra.mxu2 %v2058_v19 }
  0x82   :  { %688 = vmatpush.msra.mxu1 %v2102_v48  ;;  %332 = vmatmul.f32.gmra.mxu2 %v2153_v43  ;;  %v2285_v43 = vperm.slane %v149_v20, 1 }
  0x83   :  { %669 = vmatpush.msra.mxu0 %v2002_v39  ;;  %703 = vmatpush.msra.mxu2 %v2066_v23 }
  0x84   :  { %689 = vmatpush.msra.mxu1 %v2108_v55  ;;  %801 = vmatpush.msrb.mxu3 %v1975_v13  ;;  %2933 = vst [vmem:[#allocation32_spill] sm:$0xff] %v2285_v43 }
  0x85   :  { %670 = vmatpush.msra.mxu0 %v2005_v42  ;;  %704 = vmatpush.msra.mxu2 %v2074_v28 }
  0x86   :  { %690 = vmatpush.msra.mxu1 %v2115_v63  ;;  %802 = vmatpush.msrb.mxu3 %v1978_v15 }
  0x87   :  { %816 = vmatpush.msrb.mxu0 %v2010_v45  ;;  %705 = vmatpush.msra.mxu2 %v2080_v32 }
  0x88   :  { %803 = vmatpush.msrb.mxu3 %v1981_v17 }
  0x89   :  { %817 = vmatpush.msrb.mxu0 %v2017_v49  ;;  %706 = vmatpush.msra.mxu2 %v2087_v37 }
  0x8a   :  { %335 = vmatmul.f32.gmra.mxu2 %v2171_v59  ;;  %804 = vmatpush.msrb.mxu3 %v1984_v21 }
  0x8b   :  { %818 = vmatpush.msrb.mxu0 %v2023_v53  ;;  %707 = vmatpush.msra.mxu2 %v2096_v44 }
  0x8c   :  { %805 = vmatpush.msrb.mxu3 %v1987_v24 }
  0x8d   :  { %819 = vmatpush.msrb.mxu0 %v2029_v57  ;;  %708 = vmatpush.msra.mxu2 %v2104_v51 }
  0x8e   :  { %806 = vmatpush.msrb.mxu3 %v1990_v27 }
  0x8f   :  { %820 = vmatpush.msrb.mxu0 %v2037_v61  ;;  %709 = vmatpush.msra.mxu2 %v2110_v56 }
  0x90   :  { %807 = vmatpush.msrb.mxu3 %v1993_v30 }
  0x91   :  { %821 = vmatpush.msrb.mxu0 %v2044_v2  ;;  %710 = vmatpush.msra.mxu2 %v2117_v0 }
  0x92   :  { %808 = vmatpush.msrb.mxu3 %v1996_v33 }
  0x93   :  { %822 = vmatpush.msrb.mxu0 %v2050_v10 }
  0x94   :  { %809 = vmatpush.msrb.mxu3 %v1999_v36 }
  0x95   :  { %823 = vmatpush.msrb.mxu0 %v2056_v18 }
  0x96   :  { %810 = vmatpush.msrb.mxu3 %v2002_v39 }
  0x97   :  { %824 = vmatpush.msrb.mxu0 %v2064_v22 }
  0x98   :  { %811 = vmatpush.msrb.mxu3 %v2005_v42 }
  0x99   :  { %825 = vmatpush.msrb.mxu0 %v2071_v26 }
  0x9b   :  { %826 = vmatpush.msrb.mxu0 %v2078_v31 }
  0x9d   :  { %827 = vmatpush.msrb.mxu0 %v2085_v35 }
  0x9f   :  { %828 = vmatpush.msrb.mxu0 %v2094_v41 }
  0xa1   :  { %829 = vmatpush.msrb.mxu0 %v2102_v48 }
  0xa3   :  { %830 = vmatpush.msrb.mxu0 %v2108_v55 }
  0xa5   :  { %831 = vmatpush.msrb.mxu0 %v2115_v63 }
  0xb1   :  { %v233_v7 = vpop.f32.mrf.mxu0 }
  0xb2   :  { %v234_v40 = vadd.f32 %v233_v7, %v210_v25 }
  0xb8   :  { %v384_v38 = vpop.f32.mrf.mxu3  ;;  %v274_v63 = vpop.f32.mrf.mxu1 }
  0xb9   :  { %v236_v29 = vpop.f32.mrf.mxu0  ;;  %v428_v52 = vadd.f32 %v384_v38, %v234_v40 }
  0xba   :  { %v2279_v34 = vadd.f32 %v236_v29, %v210_v25 }
  0xbb   :  { %v1549_v5 = vmul.f32 -1.442695, %v428_v52 }
  0xbc   :  { %2930 = vst [vmem:[#allocation29_spill] sm:$0xff] %v2279_v34  ;;  %v275_v34 = vadd.f32 %v274_v63, %v2285_v43 }
  0xbd   :  { %1589 = vpow2.f32 %v1549_v5 }
  0xc1   :  { %v239_v47 = vpop.f32.mrf.mxu0 }
  0xc2   :  { %v2281_v60 = vadd.f32 %v239_v47, %v210_v25 }
  0xc3   :  { %v1590_v16 = vpop.eup %1589 }
  0xc4   :  { %2931 = vst [vmem:[#allocation30_spill] sm:$0xff] %v2281_v60  ;;  %v432_v29 = vadd.f32 1.0, %v1590_v16 }
  0xc6   :  { %1591 = vrcp.f32 %v432_v29  ;;  %vm438_vm2 = vweird.f32 %v432_v29 }
  0xc9   :  { %v242_v8 = vpop.f32.mrf.mxu0 }
  0xca   :  { %v2283_v14 = vadd.f32 %v242_v8, %v210_v25 }
  0xcc   :  { %2932 = vst [vmem:[#allocation31_spill] sm:$0xff] %v2283_v14  ;;  %v1592_v5 = vpop.eup %1591 }
  0xcd   :  { %v434_v8 = vmul.f32 %v1592_v5, %v432_v29  ;;  %vm439_vm1 = vweird.f32 %v1592_v5 }
  0xce   :  { %vm440_vm3 = vmor %vm438_vm2, %vm439_vm1 }
  0xd1   :  { %v245_v59 = vpop.f32.mrf.mxu0 }
  0xd2   :  { %v2287_v42 = vadd.f32 %v245_v59, %v210_v25  ;;  %v435_v59 = vsub.f32 1.0, %v434_v8  ;;  %v315_v8 = vpop.f32.mrf.mxu2 }
  0xd4   :  { %2934 = vst [vmem:[#allocation33_spill] sm:$0xff] %v2287_v42  ;;  %v436_v16 = vmul.f32 %v1592_v5, %v435_v59 }
  0xd8   :  { %v404_v7 = vpop.f32.mrf.mxu3 }
  0xd9   :  { %v449_v38 = vadd.f32 %v404_v7, %v275_v34  ;;  %v248_v40 = vpop.f32.mrf.mxu0  ;;  %v437_v7 = vadd.f32 %v1592_v5, %v436_v16 }
  0xda   :  { %v2290_v52 = vadd.f32 %v248_v40, %v210_v25 }
  0xdb   :  { %v1550_v47 = vmul.f32 -1.442695, %v449_v38  ;;  %v444_v38 = vand.u32 2147483648, %v432_v29 }
  0xdc   :  { %2935 = vst [vmem:[#allocation34_spill] sm:$0xff] %v2290_v52 }
  0xdd   :  { %1593 = vpow2.f32 %v1550_v47  ;;  %v442_v47 = vand.u32 2147483647, %v432_v29 }
  0xdf   :  { %vm443_vm4 = vcmp.eq.f32.partialorder %v442_v47, 8.507059e+37 }
  0xe1   :  { %v251_v14 = vpop.f32.mrf.mxu0 }
  0xe2   :  { %v2292_v55 = vadd.f32 %v251_v14, %v210_v25  ;;  %v2299_v14 = vld [vmem:[%s2882_s5] ss:$0 sm:$0xff] }
  0xe3   :  { %v1594_v60 = vpop.eup %1593 }
  0xe4   :  { %2936 = vst [vmem:[#allocation35_spill] sm:$0xff] %v2292_v55  ;;  %v453_v0 = vadd.f32 1.0, %v1594_v60  ;;  %v2301_v60 = vperm.slane %v149_v20, 2 }
  0xe6   :  { %1595 = vrcp.f32 %v453_v0  ;;  %vm459_vm5 = vweird.f32 %v453_v0  ;;  %v465_v52 = vand.u32 2147483648, %v453_v0  ;;  %v463_v48 = vand.u32 2147483647, %v453_v0 }
  0xe8   :  { %v466_v36 = vor.u32 1.1754944e-38, %v465_v52  ;;  %vm464_vm8 = vcmp.eq.f32.partialorder %v463_v48, 8.507059e+37  ;;  %v1895_v52 = vmov 0  }
  0xe9   :  { %v254_v42 = vpop.f32.mrf.mxu0  ;;  %1584 = vset.pattern.permute.xlu0 %v1895_v52  ;;  %1585 = vset.pattern.permute.xlu1 %v1895_v52 }
  0xea   :  { %v2294_v63 = vadd.f32 %v254_v42, %v210_v25  ;;  %v441_v42 = vsel %vm440_vm3, %v1592_v5, %v437_v7  ;;  %1586 = vset.pattern.permute.xlu2 %v1895_v52 }
  0xec   :  { %2937 = vst [vmem:[#allocation36_spill] sm:$0xff] %v2294_v63  ;;  %v1596_v43 = vpop.eup %1595  ;;  %v445_v63 = vor.u32 1.1754944e-38, %v444_v38 }
  0xed   :  { %v455_v34 = vmul.f32 %v1596_v43, %v453_v0  ;;  %vm460_vm6 = vweird.f32 %v1596_v43 }
  0xee   :  { %v446_v29 = vsel %vm443_vm4, %v445_v63, %v441_v42  ;;  %vm461_vm7 = vmor %vm459_vm5, %vm460_vm6 }
  0xef   :  { %v456_v40 = vsub.f32 1.0, %v455_v34  ;;  %v316_v34 = vadd.f32 %v315_v8, %v2301_v60  ;;  %v2308_v8 = vld [vmem:[%s2883_s6] ss:$0 sm:$0xff] }
  0xf1   :  { %v457_v59 = vmul.f32 %v1596_v43, %v456_v40  ;;  %v424_v25 = vpop.f32.mrf.mxu0 }
  0xf2   :  { %v473_v16 = vadd.f32 %v2299_v14, %v424_v25 }
  0xf3   :  { %v458_v55 = vadd.f32 %v1596_v43, %v457_v59 }
  0xf4   :  { %v474_v39 = vmul.f32 %v473_v16, %v446_v29  ;;  %v2397_v16 = vstv %s2884_s7  ;;  %v364_v29 = vld [vmem:[#allocation4] sm:$0xff]  ;;  %s1896_s7 = smov 124  }
  0xf5   :  { %v462_v56 = vsel %vm461_vm7, %v1596_v43, %v458_v55  ;;  %v2377_v55 = vld [vmem:[#allocation8] sm:$0xff]  ;;  %2956 = vst [vmem:[#allocation39_spill] sm:$0xff] %v2397_v16 }
  0xf6   :  { %v475_v20 = vadd.f32 %v474_v39, %v316_v34  ;;  %v467_v5 = vsel %vm464_vm8, %v466_v36, %v462_v56  ;;  %785 = vrot.lane.b32.xlu1 %v2377_v55, %s1892_s30  ;;  %644 = vrot.lane.b32.xlu2 %v2377_v55, %s1893_s9 }
  0xf7   :  { %v477_v7 = vsub.f32 1.0, %v467_v5  ;;  %v479_v47 = vmul.f32 0.0, %v467_v5 }
  0xf8   :  { %1597 = vtanh.f32 %v475_v20 }
  0xfe   :  { %v1598_v38 = vpop.eup %1597  ;;  %926 = vrot.lane.b32.xlu1 %v2377_v55, %s1894_s10 }
  0xff   :  { %v478_v40 = vmul.f32 %v1598_v38, %v477_v7 }
 0x101   :  { %v2310_v63 = vadd.f32 %v479_v47, %v478_v40 }
 0x103   :  { %529 = vmatmul.f32.vlgmr.msrb.gmra.mxu1 %v2310_v63  ;;  %549 = vmatmul.f32.vlgmr.msrb.gmra.mxu2 %v2310_v63  ;;  %v484_v39 = vmul.f32 %v2308_v8, %v2310_v63 }
 0x104   :  { %569 = vmatmul.f32.vlgmr.msra.gmra.mxu3 %v2310_v63  ;;  %836 = vmatpush.msrb.mxu1 %v2012_v46 }
 0x105   :  { %485 = vadd.xlane.f32.xlu0 %v484_v39  ;;  %937 = vmatpush.msrb.mxu2 %v1958_v1  ;;  %v2938_v1 = vld [vmem:[#allocation21_spill] sm:$0xff] }
 0x106   :  { %837 = vmatpush.msrb.mxu1 %v2019_v50  ;;  %957 = vmatpush.msra.mxu3 %v2010_v45 }
 0x107   :  { %938 = vmatpush.msrb.mxu2 %v1961_v3  ;;  %v2939_v3 = vld [vmem:[#allocation26_spill] sm:$0xff] }
 0x108   :  { %838 = vmatpush.msrb.mxu1 %v2025_v54  ;;  %958 = vmatpush.msra.mxu3 %v2017_v49 }
 0x109   :  { %939 = vmatpush.msrb.mxu2 %v1964_v6  ;;  %v2940_v6 = vld [vmem:[#allocation24_spill] sm:$0xff] }
 0x10a   :  { %839 = vmatpush.msrb.mxu1 %v2031_v58  ;;  %959 = vmatpush.msra.mxu3 %v2023_v53 }
 0x10b   :  { %940 = vmatpush.msrb.mxu2 %v1969_v9  ;;  %v2941_v9 = vld [vmem:[#allocation22_spill] sm:$0xff] }
 0x10c   :  { %840 = vmatpush.msrb.mxu1 %v2039_v62  ;;  %960 = vmatpush.msra.mxu3 %v2029_v57  ;;  %2949 = vst [vmem:[#allocation22_spill] sm:$0xff] %v2377_v55 }
 0x10d   :  { %941 = vmatpush.msrb.mxu2 %v1972_v11  ;;  %v2942_v11 = vld [vmem:[#allocation28_spill] sm:$0xff] }
 0x10e   :  { %841 = vmatpush.msrb.mxu1 %v2046_v4  ;;  %961 = vmatpush.msra.mxu3 %v2037_v61 }
 0x10f   :  { %942 = vmatpush.msrb.mxu2 %v1975_v13  ;;  %v2943_v13 = vld [vmem:[#allocation25_spill] sm:$0xff] }
 0x110   :  { %842 = vmatpush.msrb.mxu1 %v2052_v12  ;;  %962 = vmatpush.msra.mxu3 %v2044_v2 }
 0x111   :  { %943 = vmatpush.msrb.mxu2 %v1978_v15  ;;  %v2944_v15 = vld [vmem:[#allocation23_spill] sm:$0xff] }
 0x112   :  { %843 = vmatpush.msrb.mxu1 %v2058_v19  ;;  %963 = vmatpush.msra.mxu3 %v2050_v10 }
 0x113   :  { %944 = vmatpush.msrb.mxu2 %v1981_v17  ;;  %v2945_v17 = vld [vmem:[#allocation27_spill] sm:$0xff] }
 0x114   :  { %844 = vmatpush.msrb.mxu1 %v2066_v23  ;;  %964 = vmatpush.msra.mxu3 %v2056_v18 }
 0x115   :  { %945 = vmatpush.msrb.mxu2 %v1984_v21  ;;  %v277_v21 = vpop.f32.mrf.mxu1 }
 0x116   :  { %845 = vmatpush.msrb.mxu1 %v2074_v28  ;;  %965 = vmatpush.msra.mxu3 %v2064_v22 }
 0x117   :  { %946 = vmatpush.msrb.mxu2 %v1987_v24  ;;  %v2365_v24 = vpop.f32.mrf.mxu2 }
 0x118   :  { %846 = vmatpush.msrb.mxu1 %v2080_v32  ;;  %966 = vmatpush.msra.mxu3 %v2071_v26 }
 0x119   :  { %947 = vmatpush.msrb.mxu2 %v1990_v27 }
 0x11a   :  { %847 = vmatpush.msrb.mxu1 %v2087_v37  ;;  %967 = vmatpush.msra.mxu3 %v2078_v31 }
 0x11b   :  { %948 = vmatpush.msrb.mxu2 %v1993_v30 }
 0x11c   :  { %848 = vmatpush.msrb.mxu1 %v2096_v44  ;;  %968 = vmatpush.msra.mxu3 %v2085_v35 }
 0x11d   :  { %949 = vmatpush.msrb.mxu2 %v1996_v33  ;;  %v2367_v27 = vpop.f32.mrf.mxu1 }
 0x11e   :  { %849 = vmatpush.msrb.mxu1 %v2104_v51  ;;  %969 = vmatpush.msra.mxu3 %v2094_v41 }
 0x11f   :  { %950 = vmatpush.msrb.mxu2 %v2938_v1  ;;  %v2369_v30 = vpop.f32.mrf.mxu2 }
 0x120   :  { %850 = vmatpush.msrb.mxu1 %v2939_v3  ;;  %970 = vmatpush.msra.mxu3 %v2940_v6 }
 0x121   :  { %951 = vmatpush.msrb.mxu2 %v2941_v9  ;;  %v2958_v9 = vld [vmem:[#allocation29_spill] sm:$0xff] }
 0x122   :  { %851 = vmatpush.msrb.mxu1 %v2942_v11  ;;  %971 = vmatpush.msra.mxu3 %v2943_v13 }
 0x123   :  { %952 = vmatpush.msrb.mxu2 %v2944_v15 }
 0x124   :  { %972 = vmatpush.msra.mxu3 %v2945_v17 }
 0x125   :  { %v2371_v33 = vpop.f32.mrf.mxu1 }
 0x126   :  { %2946 = vst [vmem:[#allocation21_spill] sm:$0xff] %v2371_v33 }
 0x127   :  { %v2373_v36 = vpop.f32.mrf.mxu2 }
 0x128   :  { %2947 = vst [vmem:[#allocation26_spill] sm:$0xff] %v2373_v36 }
 0x12d   :  { %v2375_v48 = vpop.f32.mrf.mxu1 }
 0x12e   :  { %2948 = vst [vmem:[#allocation24_spill] sm:$0xff] %v2375_v48 }
 0x12f   :  { %v2381_v56 = vpop.f32.mrf.mxu2 }
 0x130   :  { %2950 = vst [vmem:[#allocation28_spill] sm:$0xff] %v2381_v56 }
 0x135   :  { %v2383_v0 = vpop.f32.mrf.mxu1 }
 0x136   :  { %2951 = vst [vmem:[#allocation25_spill] sm:$0xff] %v2383_v0 }
 0x137   :  { %v2386_v43 = vpop.f32.mrf.mxu2 }
 0x138   :  { %2952 = vst [vmem:[#allocation23_spill] sm:$0xff] %v2386_v43 }
 0x13d   :  { %v2388_v59 = vpop.f32.mrf.mxu1 }
 0x13e   :  { %2953 = vst [vmem:[#allocation27_spill] sm:$0xff] %v2388_v59  ;;  %v365_v59 = vld [vmem:[#allocation5] sm:$0xff] }
 0x13f   :  { %v2390_v42 = vpop.f32.mrf.mxu2 }
 0x140   :  { %2954 = vst [vmem:[#allocation37_spill] sm:$0xff] %v2390_v42 }
 0x145   :  { %v2392_v25 = vpop.f32.mrf.mxu1 }
 0x146   :  { %2955 = vst [vmem:[#allocation38_spill] sm:$0xff] %v2392_v25  ;;  %v2959_v25 = vld [vmem:[#allocation32_spill] sm:$0xff] }
 0x147   :  { %v2402_v7 = vpop.f32.mrf.mxu2  ;;  %v278_v42 = vadd.f32 %v277_v21, %v2959_v25 }
 0x148   :  { %2957 = vst [vmem:[#allocation40_spill] sm:$0xff] %v2402_v7 }
 0x178   :  { %v486_v34 = vpop.xlane.xlu0 %485 }
 0x179   :  { %v488_v20 = vadd.f32 %v2397_v16, %v486_v34 }
 0x17b   :  { %v2400_v5 = vmax.f32 %v364_v29, %v488_v20 }
 0x17d   :  { %v490_v38 = vsub.f32 %v364_v29, %v2400_v5  ;;  %v493_v40 = vsub.f32 %v488_v20, %v2400_v5 }
 0x17f   :  { %v491_v47 = vmul.f32 1.442695, %v490_v38  ;;  %v494_v39 = vmul.f32 1.442695, %v493_v40 }
 0x180   :  { %v530_v1 = vpop.f32.mrf.mxu1 }
 0x181   :  { %1599 = vpow2.f32 %v491_v47  ;;  %v574_v15 = vadd.f32 %v530_v1, %v2958_v9 }
 0x182   :  { %1601 = vpow2.f32 %v494_v39 }
 0x183   :  { %v1551_v52 = vmul.f32 -1.442695, %v574_v15 }
 0x185   :  { %1603 = vpow2.f32 %v1551_v52 }
 0x186   :  { %v550_v34 = vpop.f32.mrf.mxu2 }
 0x187   :  { %v1600_v43 = vpop.eup %1599  ;;  %v595_v0 = vadd.f32 %v550_v34, %v278_v42 }
 0x188   :  { %v1602_v7 = vpop.eup %1601  ;;  %v496_v56 = vmul.f32 %v1600_v43, %v365_v59  ;;  %500 = vperm.xlu0 %1584, %v1600_v43   ;;  %v570_v59 = vpop.f32.mrf.mxu3 }
 0x189   :  { %v1552_v29 = vmul.f32 -1.442695, %v595_v0  ;;  %v505_v20 = vmul.f32 %v1602_v7, %v2377_v55 }
 0x18a   :  { %v2409_v38 = vadd.f32 %v1602_v7, %v496_v56 }
 0x18b   :  { %v1604_v40 = vpop.eup %1603  ;;  %1605 = vpow2.f32 %v1552_v29  ;;  %508 = vperm.xlu1 %1585, %v505_v20  }
 0x18c   :  { %v578_v47 = vadd.f32 1.0, %v1604_v40  ;;  %v616_v40 = vadd.f32 %v2299_v14, %v570_v59 }
 0x18e   :  { %1607 = vrcp.f32 %v578_v47  ;;  %v590_v42 = vand.u32 2147483648, %v578_v47  ;;  %v588_v43 = vand.u32 2147483647, %v578_v47  ;;  %vm584_vm10 = vweird.f32 %v578_v47 }
 0x190   :  { %v591_v7 = vor.u32 1.1754944e-38, %v590_v42  ;;  %vm589_vm12 = vcmp.eq.f32.partialorder %v588_v43, 8.507059e+37 }
 0x191   :  { %v1606_v39 = vpop.eup %1605 }
 0x192   :  { %v599_v21 = vadd.f32 1.0, %v1606_v39  ;;  %v319_v39 = vadd.f32 %v2365_v24, %v2301_v60 }
 0x194   :  { %v1608_v1 = vpop.eup %1607  ;;  %1609 = vrcp.f32 %v599_v21  ;;  %v609_v36 = vand.u32 2147483647, %v599_v21  ;;  %vm605_vm14 = vweird.f32 %v599_v21 }
 0x195   :  { %v580_v9 = vmul.f32 %v1608_v1, %v578_v47  ;;  %vm585_vm9 = vweird.f32 %v1608_v1 }
 0x196   :  { %vm586_vm11 = vmor %vm584_vm10, %vm585_vm9  ;;  %vm610_vm1 = vcmp.eq.f32.partialorder %v609_v36, 8.507059e+37 }
 0x197   :  { %v581_v15 = vsub.f32 1.0, %v580_v9 }
 0x199   :  { %v582_v52 = vmul.f32 %v1608_v1, %v581_v15  ;;  %v611_v15 = vand.u32 2147483648, %v599_v21 }
 0x19a   :  { %v1610_v0 = vpop.eup %1609 }
 0x19b   :  { %v601_v34 = vmul.f32 %v1610_v0, %v599_v21  ;;  %v583_v56 = vadd.f32 %v1608_v1, %v582_v52  ;;  %vm606_vm13 = vweird.f32 %v1610_v0  ;;  %v612_v47 = vor.u32 1.1754944e-38, %v611_v15 }
 0x19c   :  { %vm607_vm15 = vmor %vm605_vm14, %vm606_vm13 }
 0x19d   :  { %v602_v29 = vsub.f32 1.0, %v601_v34  ;;  %v587_v20 = vsel %vm586_vm11, %v1608_v1, %v583_v56 }
 0x19e   :  { %v592_v9 = vsel %vm589_vm12, %v591_v7, %v587_v20 }
 0x19f   :  { %v603_v48 = vmul.f32 %v1610_v0, %v602_v29  ;;  %v617_v55 = vmul.f32 %v616_v40, %v592_v9  ;;  %v645_v40 = vpop.permute.xlu2 %644 }
 0x1a1   :  { %v604_v33 = vadd.f32 %v1610_v0, %v603_v48  ;;  %v618_v52 = vadd.f32 %v617_v55, %v319_v39  ;;  %v2421_v48 = vld [vmem:[#allocation14 + $0x168] sm:$0xff] }
 0x1a3   :  { %v608_v42 = vsel %vm607_vm15, %v1610_v0, %v604_v33  ;;  %1611 = vtanh.f32 %v618_v52  ;;  %v2426_v33 = vld [vmem:[#allocation14 + $0x150] sm:$0xff] }
 0x1a4   :  { %v613_v1 = vsel %vm610_vm1, %v612_v47, %v608_v42 }
 0x1a5   :  { %v620_v43 = vsub.f32 1.0, %v613_v1  ;;  %v622_v24 = vmul.f32 %v613_v1, %v2310_v63 }
 0x1a9   :  { %v1612_v59 = vpop.eup %1611 }
 0x1aa   :  { %v621_v34 = vmul.f32 %v1612_v59, %v620_v43 }
 0x1ac   :  { %v2415_v56 = vadd.f32 %v622_v24, %v621_v34 }
 0x1ae   :  { %2960 = vst [vmem:[#allocation29_spill] sm:$0xff] %v2415_v56  ;;  %671 = vmatmul.f32.vlgmr.msra.gmra.mxu0 %v2415_v56  ;;  %691 = vmatmul.f32.vlgmr.msra.gmra.mxu1 %v2415_v56  ;;  %v624_v36 = vmul.f32 %v2308_v8, %v2415_v56 }
 0x1af   :  { %711 = vmatmul.f32.vlgmr.msra.gmra.mxu2 %v2415_v56  ;;  %977 = vmatpush.msra.mxu0 %v2012_v46  ;;  %v2433_v46 = vld [vmem:[#allocation14 + $0x138] sm:$0xff] }
 0x1b0   :  { %1078 = vmatpush.msra.mxu1 %v2421_v48  ;;  %1098 = vmatpush.msra.mxu2 %v2010_v45  ;;  %v2438_v45 = vld [vmem:[#allocation14 + $0x120] sm:$0xff] }
 0x1b1   :  { %978 = vmatpush.msra.mxu0 %v2019_v50  ;;  %v2448_v50 = vld [vmem:[#allocation14 + $0xf0] sm:$0xff] }
 0x1b2   :  { %1079 = vmatpush.msra.mxu1 %v2426_v33  ;;  %1099 = vmatpush.msra.mxu2 %v2017_v49  ;;  %v2443_v49 = vld [vmem:[#allocation14 + $0x108] sm:$0xff] }
 0x1b3   :  { %979 = vmatpush.msra.mxu0 %v2025_v54  ;;  %v2458_v54 = vld [vmem:[#allocation14 + $0xc0] sm:$0xff] }
 0x1b4   :  { %1080 = vmatpush.msra.mxu1 %v2433_v46  ;;  %1100 = vmatpush.msra.mxu2 %v2023_v53  ;;  %v2453_v53 = vld [vmem:[#allocation14 + $0xd8] sm:$0xff] }
 0x1b5   :  { %625 = vadd.xlane.f32.xlu1 %v624_v36  ;;  %980 = vmatpush.msra.mxu0 %v2031_v58  ;;  %v2468_v58 = vld [vmem:[#allocation14 + $0x90] sm:$0xff] }
 0x1b6   :  { %1081 = vmatpush.msra.mxu1 %v2438_v45  ;;  %1101 = vmatpush.msra.mxu2 %v2029_v57  ;;  %v2463_v57 = vld [vmem:[#allocation14 + $0xa8] sm:$0xff] }
 0x1b7   :  { %981 = vmatpush.msra.mxu0 %v2039_v62  ;;  %v2478_v62 = vld [vmem:[#allocation14 + $0x60] sm:$0xff] }
 0x1b8   :  { %1082 = vmatpush.msra.mxu1 %v2443_v49  ;;  %1102 = vmatpush.msra.mxu2 %v2037_v61  ;;  %v2473_v61 = vld [vmem:[#allocation14 + $0x78] sm:$0xff] }
 0x1b9   :  { %982 = vmatpush.msra.mxu0 %v2046_v4  ;;  %v2488_v4 = vld [vmem:[#allocation14 + $0x30] sm:$0xff] }
 0x1ba   :  { %1083 = vmatpush.msra.mxu1 %v2448_v50  ;;  %1103 = vmatpush.msra.mxu2 %v2044_v2  ;;  %v2483_v2 = vld [vmem:[#allocation14 + $0x48] sm:$0xff]  ;;  %2962 = vst [vmem:[#allocation42_spill] sm:$0xff] %v2488_v4 }
 0x1bb   :  { %983 = vmatpush.msra.mxu0 %v2052_v12  ;;  %2961 = vst [vmem:[#allocation41_spill] sm:$0xff] %v2483_v2  ;;  %v2498_v12 = vld [vmem:[#allocation14] sm:$0xff] }
 0x1bc   :  { %1084 = vmatpush.msra.mxu1 %v2453_v53  ;;  %1104 = vmatpush.msra.mxu2 %v2050_v10  ;;  %v2493_v10 = vld [vmem:[#allocation14 + $0x18] sm:$0xff]  ;;  %2964 = vst [vmem:[#allocation44_spill] sm:$0xff] %v2498_v12 }
 0x1bd   :  { %984 = vmatpush.msra.mxu0 %v2058_v19  ;;  %2963 = vst [vmem:[#allocation43_spill] sm:$0xff] %v2493_v10 }
 0x1be   :  { %1085 = vmatpush.msra.mxu1 %v2458_v54  ;;  %1105 = vmatpush.msra.mxu2 %v2056_v18  ;;  %v2502_v18 = vpop.permute.xlu1 %785 }
 0x1bf   :  { %985 = vmatpush.msra.mxu0 %v2066_v23 }
 0x1c0   :  { %1086 = vmatpush.msra.mxu1 %v2463_v57  ;;  %1106 = vmatpush.msra.mxu2 %v2064_v22 }
 0x1c1   :  { %986 = vmatpush.msra.mxu0 %v2074_v28  ;;  %v281_v28 = vadd.f32 %v2367_v27, %v2959_v25 }
 0x1c2   :  { %1087 = vmatpush.msra.mxu1 %v2468_v58  ;;  %1107 = vmatpush.msra.mxu2 %v2071_v26 }
 0x1c3   :  { %987 = vmatpush.msra.mxu0 %v2080_v32 }
 0x1c4   :  { %1088 = vmatpush.msra.mxu1 %v2473_v61  ;;  %1108 = vmatpush.msra.mxu2 %v2078_v31 }
 0x1c5   :  { %988 = vmatpush.msra.mxu0 %v2087_v37  ;;  %v2966_v37 = vld [vmem:[#allocation30_spill] sm:$0xff] }
 0x1c6   :  { %1089 = vmatpush.msra.mxu1 %v2478_v62  ;;  %1109 = vmatpush.msra.mxu2 %v2085_v35  ;;  %v2504_v19 = vpop.permute.xlu1 %926 }
 0x1c7   :  { %989 = vmatpush.msra.mxu0 %v2096_v44  ;;  %2965 = vst [vmem:[#allocation45_spill] sm:$0xff] %v2504_v19 }
 0x1c8   :  { %1090 = vmatpush.msra.mxu1 %v2483_v2  ;;  %1110 = vmatpush.msra.mxu2 %v2094_v41 }
 0x1c9   :  { %990 = vmatpush.msra.mxu0 %v2104_v51 }
 0x1ca   :  { %1091 = vmatpush.msra.mxu1 %v2488_v4  ;;  %1111 = vmatpush.msra.mxu2 %v2940_v6 }
 0x1cb   :  { %991 = vmatpush.msra.mxu0 %v2939_v3 }
 0x1cc   :  { %1092 = vmatpush.msra.mxu1 %v2493_v10  ;;  %1112 = vmatpush.msra.mxu2 %v2943_v13 }
 0x1cd   :  { %992 = vmatpush.msra.mxu0 %v2942_v11 }
 0x1ce   :  { %1093 = vmatpush.msra.mxu1 %v2498_v12  ;;  %1113 = vmatpush.msra.mxu2 %v2945_v17 }
 0x1fd   :  { %v2506_v22 = vpop.permute.xlu1 %508 }
 0x228   :  { %v626_v23 = vpop.xlane.xlu1 %625 }
 0x229   :  { %v627_v26 = vadd.f32 %v626_v23, %v2397_v16 }
 0x22b   :  { %v2512_v31 = vmax.f32 %v2400_v5, %v627_v26  ;;  %v672_v32 = vpop.f32.mrf.mxu0  ;;  %v692_v35 = vpop.f32.mrf.mxu1 }
 0x22c   :  { %v716_v41 = vadd.f32 %v672_v32, %v2966_v37  ;;  %v737_v44 = vadd.f32 %v692_v35, %v281_v28  ;;  %v322_v37 = vadd.f32 %v2369_v30, %v2301_v60  ;;  %v2530_v30 = vld [vmem:[#allocation14 + $0x178] sm:$0xff] }
 0x22d   :  { %v629_v51 = vsub.f32 %v2400_v5, %v2512_v31  ;;  %v632_v3 = vsub.f32 %v627_v26, %v2512_v31 }
 0x22e   :  { %v1553_v6 = vmul.f32 -1.442695, %v716_v41  ;;  %v1554_v17 = vmul.f32 -1.442695, %v737_v44 }
 0x22f   :  { %v630_v11 = vmul.f32 1.442695, %v629_v51  ;;  %v633_v13 = vmul.f32 1.442695, %v632_v3 }
 0x230   :  { %1613 = vpow2.f32 %v1553_v6 }
 0x231   :  { %1615 = vpow2.f32 %v630_v11 }
 0x232   :  { %1617 = vpow2.f32 %v633_v13  ;;  %v712_v34 = vpop.f32.mrf.mxu2 }
 0x233   :  { %1619 = vpow2.f32 %v1554_v17  ;;  %v758_v28 = vadd.f32 %v2299_v14, %v712_v34  ;;  %v2581_v34 = vld [vmem:[#allocation14 + $0xd0] sm:$0xff] }
 0x236   :  { %v1614_v27 = vpop.eup %1613 }
 0x237   :  { %v1616_v55 = vpop.eup %1615  ;;  %v720_v21 = vadd.f32 1.0, %v1614_v27 }
 0x238   :  { %v1618_v0 = vpop.eup %1617  ;;  %v635_v7 = vmul.f32 %v1616_v55, %v2409_v38  ;;  %639 = vperm.xlu2 %1586, %v1616_v55  }
 0x239   :  { %v1620_v29 = vpop.eup %1619  ;;  %1621 = vrcp.f32 %v720_v21  ;;  %v647_v39 = vmul.f32 %v1618_v0, %v645_v40  ;;  %v732_v1 = vand.u32 2147483648, %v720_v21  ;;  %v730_v59 = vand.u32 2147483647, %v720_v21  ;;  %v2544_v40 = vld [vmem:[#allocation14 + $0x148] sm:$0xff] }
 0x23a   :  { %v2519_v5 = vadd.f32 %v1618_v0, %v635_v7  ;;  %v741_v20 = vadd.f32 1.0, %v1620_v29  ;;  %vm726_vm3 = vweird.f32 %v720_v21  ;;  %v2534_v7 = vld [vmem:[#allocation14 + $0x170] sm:$0xff]  ;;  %v2537_v29 = vld [vmem:[#allocation14 + $0x160] sm:$0xff] }
 0x23b   :  { %v733_v23 = vor.u32 1.1754944e-38, %v732_v1  ;;  %vm731_vm5 = vcmp.eq.f32.partialorder %v730_v59, 8.507059e+37  ;;  %v2569_v1 = vld [vmem:[#allocation14 + $0xf8] sm:$0xff] }
 0x23c   :  { %1623 = vrcp.f32 %v741_v20  ;;  %v753_v41 = vand.u32 2147483648, %v741_v20  ;;  %vm747_vm7 = vweird.f32 %v741_v20  ;;  %v751_v51 = vand.u32 2147483647, %v741_v20 }
 0x23e   :  { %v754_v11 = vor.u32 1.1754944e-38, %v753_v41  ;;  %vm752_vm9 = vcmp.eq.f32.partialorder %v751_v51, 8.507059e+37  ;;  %v2613_v41 = vld [vmem:[#allocation14 + $0x58] sm:$0xff]  ;;  %v2620_v51 = vld [vmem:[#allocation14 + $0x40] sm:$0xff] }
 0x23f   :  { %v1622_v9 = vpop.eup %1621  ;;  %2967 = vst [vmem:[#allocation30_spill] sm:$0xff] %v2620_v51 }
 0x240   :  { %v722_v15 = vmul.f32 %v1622_v9, %v720_v21  ;;  %650 = vperm.xlu2 %1586, %v647_v39   ;;  %vm727_vm2 = vweird.f32 %v1622_v9  ;;  %v2548_v39 = vld [vmem:[#allocation14 + $0x140] sm:$0xff] }
 0x241   :  { %vm728_vm4 = vmor %vm726_vm3, %vm727_vm2 }
 0x242   :  { %v1624_v52 = vpop.eup %1623  ;;  %v723_v47 = vsub.f32 1.0, %v722_v15  ;;  %v2555_v15 = vld [vmem:[#allocation14 + $0x128] sm:$0xff] }
 0x243   :  { %v743_v42 = vmul.f32 %v1624_v52, %v741_v20  ;;  %vm748_vm6 = vweird.f32 %v1624_v52  ;;  %v2541_v20 = vld [vmem:[#allocation14 + $0x158] sm:$0xff] }
 0x244   :  { %v724_v43 = vmul.f32 %v1622_v9, %v723_v47  ;;  %vm749_vm8 = vmor %vm747_vm7, %vm748_vm6  ;;  %v2562_v47 = vld [vmem:[#allocation14 + $0x110] sm:$0xff] }
 0x245   :  { %v744_v38 = vsub.f32 1.0, %v743_v42  ;;  %v2565_v42 = vld [vmem:[#allocation14 + $0x100] sm:$0xff] }
 0x246   :  { %v725_v24 = vadd.f32 %v1622_v9, %v724_v43  ;;  %v2572_v43 = vld [vmem:[#allocation14 + $0xe8] sm:$0xff] }
 0x247   :  { %v745_v36 = vmul.f32 %v1624_v52, %v744_v38  ;;  %v2578_v38 = vld [vmem:[#allocation14 + $0xe0] sm:$0xff] }
 0x248   :  { %v729_v26 = vsel %vm728_vm4, %v1622_v9, %v725_v24  ;;  %v2551_v9 = vld [vmem:[#allocation14 + $0x130] sm:$0xff]  ;;  %v2585_v24 = vld [vmem:[#allocation14 + $0xb8] sm:$0xff] }
 0x249   :  { %v746_v32 = vadd.f32 %v1624_v52, %v745_v36  ;;  %v734_v35 = vsel %vm731_vm5, %v733_v23, %v729_v26  ;;  %v2588_v36 = vld [vmem:[#allocation14 + $0xc8] sm:$0xff]  ;;  %v2592_v23 = vld [vmem:[#allocation14 + $0xa0] sm:$0xff]  ;;  %v2595_v26 = vld [vmem:[#allocation14 + $0xb0] sm:$0xff] }
 0x24a   :  { %v759_v44 = vmul.f32 %v758_v28, %v734_v35  ;;  %v2599_v28 = vld [vmem:[#allocation14 + $0x88] sm:$0xff]  ;;  %v2606_v35 = vld [vmem:[#allocation14 + $0x70] sm:$0xff] }
 0x24b   :  { %v750_v6 = vsel %vm749_vm8, %v1624_v52, %v746_v32  ;;  %v2558_v52 = vld [vmem:[#allocation14 + $0x118] sm:$0xff] }
 0x24c   :  { %v760_v3 = vadd.f32 %v759_v44, %v322_v37  ;;  %v755_v13 = vsel %vm752_vm9, %v754_v11, %v750_v6  ;;  %v2602_v32 = vld [vmem:[#allocation14 + $0x98] sm:$0xff]  ;;  %v2609_v37 = vld [vmem:[#allocation14 + $0x80] sm:$0xff]  ;;  %v2616_v44 = vld [vmem:[#allocation14 + $0x68] sm:$0xff] }
 0x24d   :  { %v762_v17 = vsub.f32 1.0, %v755_v13  ;;  %v764_v21 = vmul.f32 %v755_v13, %v2415_v56  ;;  %v2627_v6 = vld [vmem:[#allocation14 + $0x28] sm:$0xff]  ;;  %v2630_v11 = vld [vmem:[#allocation14 + $0x38] sm:$0xff]  ;;  %v2634_v13 = vld [vmem:[#allocation14 + $0x10] sm:$0xff] }
 0x24e   :  { %1625 = vtanh.f32 %v760_v3  ;;  %v2623_v3 = vld [vmem:[#allocation14 + $0x50] sm:$0xff]  ;;  %2969 = vst [vmem:[#allocation47_spill] sm:$0xff] %v2627_v6 }
 0x24f   :  { %2968 = vst [vmem:[#allocation46_spill] sm:$0xff] %v2623_v3 }
 0x250   :  { %2970 = vst [vmem:[#allocation48_spill] sm:$0xff] %v2630_v11 }
 0x251   :  { %2971 = vst [vmem:[#allocation49_spill] sm:$0xff] %v2634_v13 }
 0x254   :  { %v1626_v27 = vpop.eup %1625 }
 0x255   :  { %v763_v55 = vmul.f32 %v1626_v27, %v762_v17  ;;  %v2637_v17 = vld [vmem:[#allocation14 + $0x20] sm:$0xff]  ;;  %v2641_v27 = vld [vmem:[#allocation14 + $0x8] sm:$0xff] }
 0x256   :  { %2972 = vst [vmem:[#allocation50_spill] sm:$0xff] %v2637_v17 }
 0x257   :  { %v2525_v0 = vadd.f32 %v764_v21, %v763_v55  ;;  %2973 = vst [vmem:[#allocation51_spill] sm:$0xff] %v2641_v27  ;;  %v501_v55 = vpop.permute.xlu0 %500  ;;  %v511_v21 = vmul.f32 %v2506_v22, %v2310_v63 }
 0x259   :  { %812 = vmatmul.f32.vlgmr.msrb.gmra.mxu3 %v2525_v0  ;;  %832 = vmatmul.f32.vlgmr.msrb.gmra.mxu0 %v2525_v0  ;;  %v766_v59 = vmul.f32 %v2308_v8, %v2525_v0 }
 0x25a   :  { %852 = vmatmul.f32.vlgmr.msrb.gmra.mxu1 %v2525_v0  ;;  %1118 = vmatpush.msrb.mxu3 %v2530_v30 }
 0x25b   :  { %1219 = vmatpush.msrb.mxu0 %v2421_v48  ;;  %1239 = vmatpush.msrb.mxu1 %v2534_v7 }
 0x25c   :  { %1119 = vmatpush.msrb.mxu3 %v2537_v29 }
 0x25d   :  { %1220 = vmatpush.msrb.mxu0 %v2426_v33  ;;  %1240 = vmatpush.msrb.mxu1 %v2541_v20 }
 0x25e   :  { %1120 = vmatpush.msrb.mxu3 %v2544_v40 }
 0x25f   :  { %1221 = vmatpush.msrb.mxu0 %v2433_v46  ;;  %1241 = vmatpush.msrb.mxu1 %v2548_v39 }
 0x260   :  { %1121 = vmatpush.msrb.mxu3 %v2551_v9 }
 0x261   :  { %1222 = vmatpush.msrb.mxu0 %v2438_v45  ;;  %1242 = vmatpush.msrb.mxu1 %v2555_v15 }
 0x262   :  { %1122 = vmatpush.msrb.mxu3 %v2558_v52 }
 0x263   :  { %1223 = vmatpush.msrb.mxu0 %v2443_v49  ;;  %1243 = vmatpush.msrb.mxu1 %v2562_v47 }
 0x264   :  { %1123 = vmatpush.msrb.mxu3 %v2565_v42 }
 0x265   :  { %1224 = vmatpush.msrb.mxu0 %v2448_v50  ;;  %1244 = vmatpush.msrb.mxu1 %v2569_v1 }
 0x266   :  { %1124 = vmatpush.msrb.mxu3 %v2572_v43 }
 0x267   :  { %1225 = vmatpush.msrb.mxu0 %v2453_v53  ;;  %1245 = vmatpush.msrb.mxu1 %v2578_v38 }
 0x268   :  { %1125 = vmatpush.msrb.mxu3 %v2581_v34 }
 0x269   :  { %767 = vadd.xlane.f32.xlu2 %v766_v59  ;;  %1226 = vmatpush.msrb.mxu0 %v2458_v54  ;;  %v503_v59 = vmul.f32 0.0, %v501_v55 }
 0x26a   :  { %1126 = vmatpush.msrb.mxu3 %v2585_v24  ;;  %1246 = vmatpush.msrb.mxu1 %v2588_v36 }
 0x26b   :  { %1227 = vmatpush.msrb.mxu0 %v2463_v57  ;;  %v512_v19 = vadd.f32 %v511_v21, %v503_v59 }
 0x26c   :  { %1127 = vmatpush.msrb.mxu3 %v2592_v23  ;;  %1247 = vmatpush.msrb.mxu1 %v2595_v26 }
 0x26d   :  { %1228 = vmatpush.msrb.mxu0 %v2468_v58 }
 0x26e   :  { %1128 = vmatpush.msrb.mxu3 %v2599_v28  ;;  %1248 = vmatpush.msrb.mxu1 %v2602_v32 }
 0x26f   :  { %1229 = vmatpush.msrb.mxu0 %v2473_v61 }
 0x270   :  { %1129 = vmatpush.msrb.mxu3 %v2606_v35  ;;  %1249 = vmatpush.msrb.mxu1 %v2609_v37 }
 0x271   :  { %1230 = vmatpush.msrb.mxu0 %v2478_v62 }
 0x272   :  { %1130 = vmatpush.msrb.mxu3 %v2613_v41  ;;  %1250 = vmatpush.msrb.mxu1 %v2616_v44 }
 0x273   :  { %1231 = vmatpush.msrb.mxu0 %v2483_v2  ;;  %v2975_v2 = vld [vmem:[#allocation31_spill] sm:$0xff] }
 0x274   :  { %1131 = vmatpush.msrb.mxu3 %v2620_v51  ;;  %1251 = vmatpush.msrb.mxu1 %v2623_v3 }
 0x275   :  { %1232 = vmatpush.msrb.mxu0 %v2488_v4 }
 0x276   :  { %1132 = vmatpush.msrb.mxu3 %v2627_v6  ;;  %1252 = vmatpush.msrb.mxu1 %v2630_v11  ;;  %v2974_v11 = vld [vmem:[#allocation21_spill] sm:$0xff] }
 0x277   :  { %1233 = vmatpush.msrb.mxu0 %v2493_v10 }
 0x278   :  { %1133 = vmatpush.msrb.mxu3 %v2634_v13  ;;  %1253 = vmatpush.msrb.mxu1 %v2637_v17  ;;  %v284_v17 = vadd.f32 %v2974_v11, %v2959_v25 }
 0x279   :  { %1234 = vmatpush.msrb.mxu0 %v2498_v12 }
 0x27a   :  { %1254 = vmatpush.msrb.mxu1 %v2641_v27 }
 0x292   :  { %v640_v56 = vpop.permute.xlu2 %639 }
 0x293   :  { %v2646_v10 = vmul.f32 %v640_v56, %v512_v19 }
 0x29a   :  { %v2648_v13 = vpop.permute.xlu2 %650 }
 0x2d6   :  { %v833_v6 = vpop.f32.mrf.mxu0 }
 0x2d7   :  { %v878_v12 = vadd.f32 %v833_v6, %v284_v17 }
 0x2d9   :  { %v1556_v4 = vmul.f32 -1.442695, %v878_v12 }
 0x2db   :  { %1627 = vpow2.f32 %v1556_v4 }
 0x2dc   :  { %v768_v3 = vpop.xlane.xlu2 %767  ;;  %v813_v27 = vpop.f32.mrf.mxu3 }
 0x2dd   :  { %v769_v51 = vadd.f32 %v768_v3, %v2397_v16  ;;  %v857_v63 = vadd.f32 %v813_v27, %v2975_v2  ;;  %v853_v16 = vpop.f32.mrf.mxu1 }
 0x2df   :  { %v2655_v22 = vmax.f32 %v2512_v31, %v769_v51  ;;  %v1555_v56 = vmul.f32 -1.442695, %v857_v63 }
 0x2e1   :  { %2976 = vst [vmem:[#allocation21_spill] sm:$0xff] %v2655_v22  ;;  %v1628_v19 = vpop.eup %1627  ;;  %v771_v55 = vsub.f32 %v2512_v31, %v2655_v22  ;;  %v774_v11 = vsub.f32 %v769_v51, %v2655_v22  ;;  %1629 = vpow2.f32 %v1555_v56 }
 0x2e2   :  { %v882_v6 = vadd.f32 1.0, %v1628_v19 }
 0x2e3   :  { %v772_v12 = vmul.f32 1.442695, %v771_v55  ;;  %v775_v4 = vmul.f32 1.442695, %v774_v11 }
 0x2e4   :  { %1631 = vrcp.f32 %v882_v6  ;;  %vm888_vm15 = vweird.f32 %v882_v6 }
 0x2e5   :  { %1633 = vpow2.f32 %v772_v12 }
 0x2e6   :  { %1635 = vpow2.f32 %v775_v4 }
 0x2e7   :  { %v1630_v17 = vpop.eup %1629 }
 0x2e8   :  { %v861_v3 = vadd.f32 1.0, %v1630_v17 }
 0x2ea   :  { %v1632_v2 = vpop.eup %1631  ;;  %1637 = vrcp.f32 %v861_v3  ;;  %v873_v12 = vand.u32 2147483648, %v861_v3  ;;  %v871_v17 = vand.u32 2147483647, %v861_v3  ;;  %vm867_vm11 = vweird.f32 %v861_v3 }
 0x2eb   :  { %v1634_v27 = vpop.eup %1633  ;;  %v884_v63 = vmul.f32 %v1632_v2, %v882_v6  ;;  %vm889_vm14 = vweird.f32 %v1632_v2 }
 0x2ec   :  { %v777_v21 = vmul.f32 %v1634_v27, %v2519_v5  ;;  %781 = vperm.xlu0 %1584, %v1634_v27   ;;  %v1636_v59 = vpop.eup %1635  ;;  %v874_v5 = vor.u32 1.1754944e-38, %v873_v12  ;;  %v899_v27 = vadd.f32 %v2299_v14, %v853_v16  ;;  %vm872_vm13 = vcmp.eq.f32.partialorder %v871_v17, 8.507059e+37  ;;  %vm890_vm1 = vmor %vm888_vm15, %vm889_vm14 }
 0x2ed   :  { %v885_v19 = vsub.f32 1.0, %v884_v63  ;;  %v788_v55 = vmul.f32 %v1636_v59, %v2502_v18  ;;  %v2978_v18 = vld [vmem:[#allocation26_spill] sm:$0xff] }
 0x2ee   :  { %v2661_v31 = vadd.f32 %v1636_v59, %v777_v21  ;;  %v325_v59 = vadd.f32 %v2978_v18, %v2301_v60 }
 0x2ef   :  { %v886_v22 = vmul.f32 %v1632_v2, %v885_v19 }
 0x2f0   :  { %2977 = vst [vmem:[#allocation31_spill] sm:$0xff] %v2661_v31  ;;  %v1638_v51 = vpop.eup %1637 }
 0x2f1   :  { %v863_v56 = vmul.f32 %v1638_v51, %v861_v3  ;;  %vm868_vm10 = vweird.f32 %v1638_v51  ;;  %v887_v31 = vadd.f32 %v1632_v2, %v886_v22 }
 0x2f2   :  { %vm869_vm12 = vmor %vm867_vm11, %vm868_vm10 }
 0x2f3   :  { %v864_v11 = vsub.f32 1.0, %v863_v56  ;;  %v894_v56 = vand.u32 2147483648, %v882_v6 }
 0x2f4   :  { %791 = vperm.xlu0 %1584, %v788_v55  }
 0x2f5   :  { %v865_v4 = vmul.f32 %v1638_v51, %v864_v11  ;;  %v892_v11 = vand.u32 2147483647, %v882_v6  ;;  %v895_v3 = vor.u32 1.1754944e-38, %v894_v56 }
 0x2f7   :  { %v866_v25 = vadd.f32 %v1638_v51, %v865_v4  ;;  %v891_v4 = vsel %vm890_vm1, %v1632_v2, %v887_v31  ;;  %vm893_vm2 = vcmp.eq.f32.partialorder %v892_v11, 8.507059e+37  ;;  %v2994_v2 = vld [vmem:[#allocation33_spill] sm:$0xff] }
 0x2f8   :  { %v896_v12 = vsel %vm893_vm2, %v895_v3, %v891_v4 }
 0x2f9   :  { %v870_v21 = vsel %vm869_vm12, %v1638_v51, %v866_v25  ;;  %v903_v14 = vsub.f32 1.0, %v896_v12  ;;  %v905_v22 = vmul.f32 %v896_v12, %v2525_v0 }
 0x2fa   :  { %v875_v63 = vsel %vm872_vm13, %v874_v5, %v870_v21 }
 0x2fb   :  { %v900_v55 = vmul.f32 %v899_v27, %v875_v63  ;;  %v2996_v63 = vld [vmem:[#allocation21_spill] sm:$0xff] }
 0x2fd   :  { %v901_v19 = vadd.f32 %v900_v55, %v325_v59 }
 0x2ff   :  { %1639 = vtanh.f32 %v901_v19 }
 0x305   :  { %v1640_v25 = vpop.eup %1639 }
 0x306   :  { %v904_v16 = vmul.f32 %v1640_v25, %v903_v14  ;;  %v2997_v25 = vld [vmem:[#allocation31_spill] sm:$0xff] }
 0x308   :  { %v2668_v51 = vadd.f32 %v905_v22, %v904_v16 }
 0x30a   :  { %953 = vmatmul.f32.vlgmr.msrb.gmra.mxu2 %v2668_v51  ;;  %973 = vmatmul.f32.vlgmr.msra.gmra.mxu3 %v2668_v51 }
 0x30b   :  { %993 = vmatmul.f32.vlgmr.msra.gmra.mxu0 %v2668_v51  ;;  %1259 = vmatpush.msrb.mxu2 %v2530_v30 }
 0x30c   :  { %1360 = vmatpush.msra.mxu3 %v2421_v48  ;;  %1380 = vmatpush.msra.mxu0 %v2534_v7  ;;  %v907_v48 = vmul.f32 %v2308_v8, %v2668_v51  ;;  %v2979_v8 = vld [vmem:[#allocation41_spill] sm:$0xff] }
 0x30d   :  { %1260 = vmatpush.msrb.mxu2 %v2537_v29  ;;  %v2991_v7 = vld [vmem:[#allocation29_spill] sm:$0xff] }
 0x30e   :  { %1361 = vmatpush.msra.mxu3 %v2426_v33  ;;  %1381 = vmatpush.msra.mxu0 %v2541_v20  ;;  %v2980_v33 = vld [vmem:[#allocation30_spill] sm:$0xff]  ;;  %v653_v20 = vmul.f32 %v2648_v13, %v2991_v7 }
 0x30f   :  { %1261 = vmatpush.msrb.mxu2 %v2544_v40 }
 0x310   :  { %1362 = vmatpush.msra.mxu3 %v2433_v46  ;;  %1382 = vmatpush.msra.mxu0 %v2548_v39  ;;  %v2981_v46 = vld [vmem:[#allocation46_spill] sm:$0xff]  ;;  %v654_v39 = vadd.f32 %v653_v20, %v2646_v10  ;;  %v2995_v10 = vld [vmem:[#allocation39_spill] sm:$0xff] }
 0x311   :  { %1262 = vmatpush.msrb.mxu2 %v2551_v9 }
 0x312   :  { %1363 = vmatpush.msra.mxu3 %v2438_v45  ;;  %1383 = vmatpush.msra.mxu0 %v2555_v15  ;;  %v2982_v45 = vld [vmem:[#allocation42_spill] sm:$0xff] }
 0x313   :  { %1263 = vmatpush.msrb.mxu2 %v2558_v52 }
 0x314   :  { %1364 = vmatpush.msra.mxu3 %v2443_v49  ;;  %1384 = vmatpush.msra.mxu0 %v2562_v47  ;;  %v2983_v49 = vld [vmem:[#allocation47_spill] sm:$0xff] }
 0x315   :  { %1264 = vmatpush.msrb.mxu2 %v2565_v42 }
 0x316   :  { %1365 = vmatpush.msra.mxu3 %v2448_v50  ;;  %1385 = vmatpush.msra.mxu0 %v2569_v1  ;;  %v2984_v50 = vld [vmem:[#allocation48_spill] sm:$0xff] }
 0x317   :  { %1265 = vmatpush.msrb.mxu2 %v2572_v43 }
 0x318   :  { %1366 = vmatpush.msra.mxu3 %v2453_v53  ;;  %1386 = vmatpush.msra.mxu0 %v2578_v38  ;;  %v2985_v53 = vld [vmem:[#allocation43_spill] sm:$0xff] }
 0x319   :  { %1266 = vmatpush.msrb.mxu2 %v2581_v34 }
 0x31a   :  { %1367 = vmatpush.msra.mxu3 %v2458_v54  ;;  %1387 = vmatpush.msra.mxu0 %v2588_v36  ;;  %v2986_v54 = vld [vmem:[#allocation49_spill] sm:$0xff] }
 0x31b   :  { %1267 = vmatpush.msrb.mxu2 %v2585_v24 }
 0x31c   :  { %1368 = vmatpush.msra.mxu3 %v2463_v57  ;;  %1388 = vmatpush.msra.mxu0 %v2595_v26  ;;  %v2987_v57 = vld [vmem:[#allocation50_spill] sm:$0xff]  ;;  %v2992_v26 = vld [vmem:[#allocation32_spill] sm:$0xff] }
 0x31d   :  { %1268 = vmatpush.msrb.mxu2 %v2592_v23 }
 0x31e   :  { %908 = vadd.xlane.f32.xlu0 %v907_v48  ;;  %1369 = vmatpush.msra.mxu3 %v2468_v58  ;;  %v2988_v58 = vld [vmem:[#allocation44_spill] sm:$0xff] }
 0x31f   :  { %1269 = vmatpush.msrb.mxu2 %v2599_v28  ;;  %1389 = vmatpush.msra.mxu0 %v2602_v32  ;;  %v2993_v32 = vld [vmem:[#allocation24_spill] sm:$0xff] }
 0x320   :  { %1370 = vmatpush.msra.mxu3 %v2473_v61  ;;  %v2989_v61 = vld [vmem:[#allocation51_spill] sm:$0xff] }
 0x321   :  { %1270 = vmatpush.msrb.mxu2 %v2606_v35  ;;  %1390 = vmatpush.msra.mxu0 %v2609_v37  ;;  %v287_v37 = vadd.f32 %v2993_v32, %v2992_v26 }
 0x322   :  { %1371 = vmatpush.msra.mxu3 %v2478_v62  ;;  %v2990_v62 = vld [vmem:[#allocation22_spill] sm:$0xff] }
 0x323   :  { %1271 = vmatpush.msrb.mxu2 %v2613_v41  ;;  %1391 = vmatpush.msra.mxu0 %v2616_v44 }
 0x324   :  { %1372 = vmatpush.msra.mxu3 %v2979_v8 }
 0x325   :  { %1272 = vmatpush.msrb.mxu2 %v2980_v33  ;;  %1392 = vmatpush.msra.mxu0 %v2981_v46 }
 0x326   :  { %1373 = vmatpush.msra.mxu3 %v2982_v45 }
 0x327   :  { %1273 = vmatpush.msrb.mxu2 %v2983_v49  ;;  %1393 = vmatpush.msra.mxu0 %v2984_v50 }
 0x328   :  { %1374 = vmatpush.msra.mxu3 %v2985_v53  ;;  %v2998_v53 = vld [vmem:[#allocation45_spill] sm:$0xff] }
 0x329   :  { %1274 = vmatpush.msrb.mxu2 %v2986_v54  ;;  %1394 = vmatpush.msra.mxu0 %v2987_v57 }
 0x32a   :  { %1375 = vmatpush.msra.mxu3 %v2988_v58 }
 0x32b   :  { %1395 = vmatpush.msra.mxu0 %v2989_v61 }
 0x332   :  { %1067 = vrot.lane.b32.xlu0 %v2990_v62, %s1896_s7 }
 0x35e   :  { %v782_v15 = vpop.permute.xlu0 %781 }
 0x35f   :  { %v784_v47 = vmul.f32 %v782_v15, %v654_v39 }
 0x366   :  { %v792_v1 = vpop.permute.xlu0 %791 }
 0x367   :  { %v794_v38 = vmul.f32 %v792_v1, %v2525_v0  ;;  %v2750_v1 = vld [vmem:[%s2882_s5] ss:$0 sm:$0xff] }
 0x369   :  { %v2728_v36 = vadd.f32 %v794_v38, %v784_v47 }
 0x388   :  { %v994_v20 = vpop.f32.mrf.mxu0 }
 0x389   :  { %v1040_v38 = vadd.f32 %v2750_v1, %v994_v20 }
 0x38d   :  { %v954_v44 = vpop.f32.mrf.mxu2  ;;  %v974_v6 = vpop.f32.mrf.mxu3 }
 0x38e   :  { %v998_v31 = vadd.f32 %v954_v44, %v2994_v2  ;;  %v1019_v17 = vadd.f32 %v974_v6, %v287_v37  ;;  %v2999_v6 = vld [vmem:[#allocation28_spill] sm:$0xff] }
 0x38f   :  { %v328_v2 = vadd.f32 %v2999_v6, %v2301_v60 }
 0x390   :  { %v1557_v5 = vmul.f32 -1.442695, %v998_v31  ;;  %v1558_v27 = vmul.f32 -1.442695, %v1019_v17 }
 0x391   :  { %v909_v13 = vpop.xlane.xlu0 %908 }
 0x392   :  { %1641 = vpow2.f32 %v1557_v5  ;;  %v910_v21 = vadd.f32 %v909_v13, %v2995_v10 }
 0x393   :  { %1643 = vpow2.f32 %v1558_v27 }
 0x394   :  { %v2735_v18 = vmax.f32 %v2996_v63, %v910_v21 }
 0x396   :  { %v912_v0 = vsub.f32 %v2996_v63, %v2735_v18  ;;  %v915_v59 = vsub.f32 %v910_v21, %v2735_v18 }
 0x398   :  { %v1642_v56 = vpop.eup %1641  ;;  %v913_v55 = vmul.f32 1.442695, %v912_v0  ;;  %v916_v4 = vmul.f32 1.442695, %v915_v59 }
 0x399   :  { %v1644_v11 = vpop.eup %1643  ;;  %v1002_v19 = vadd.f32 1.0, %v1642_v56 }
 0x39a   :  { %v1023_v3 = vadd.f32 1.0, %v1644_v11  ;;  %1645 = vpow2.f32 %v913_v55 }
 0x39b   :  { %1647 = vrcp.f32 %v1002_v19  ;;  %v1014_v58 = vand.u32 2147483648, %v1002_v19  ;;  %v1012_v7 = vand.u32 2147483647, %v1002_v19  ;;  %vm1008_vm4 = vweird.f32 %v1002_v19 }
 0x39c   :  { %1649 = vrcp.f32 %v1023_v3  ;;  %v1035_v17 = vand.u32 2147483648, %v1023_v3  ;;  %vm1029_vm8 = vweird.f32 %v1023_v3  ;;  %v1033_v5 = vand.u32 2147483647, %v1023_v3 }
 0x39d   :  { %1651 = vpow2.f32 %v916_v4  ;;  %v1015_v47 = vor.u32 1.1754944e-38, %v1014_v58  ;;  %vm1013_vm6 = vcmp.eq.f32.partialorder %v1012_v7, 8.507059e+37 }
 0x39e   :  { %v1036_v21 = vor.u32 1.1754944e-38, %v1035_v17  ;;  %vm1034_vm10 = vcmp.eq.f32.partialorder %v1033_v5, 8.507059e+37 }
 0x3a0   :  { %v2740_v12 = vpop.eup %1645 }
 0x3a1   :  { %v1648_v14 = vpop.eup %1647  ;;  %v918_v16 = vmul.f32 %v2740_v12, %v2997_v25 }
 0x3a2   :  { %v1650_v22 = vpop.eup %1649  ;;  %v1004_v48 = vmul.f32 %v1648_v14, %v1002_v19  ;;  %vm1009_vm3 = vweird.f32 %v1648_v14  ;;  %v2763_v19 = vld [vmem:[%s2883_s6] ss:$0 sm:$0xff]  ;;  %s1897_s6 = smov 122  }
 0x3a3   :  { %v1652_v8 = vpop.eup %1651  ;;  %v1025_v46 = vmul.f32 %v1650_v22, %v1023_v3  ;;  %vm1010_vm5 = vmor %vm1008_vm4, %vm1009_vm3  ;;  %vm1030_vm7 = vweird.f32 %v1650_v22 }
 0x3a4   :  { %v1005_v45 = vsub.f32 1.0, %v1004_v48  ;;  %v2744_v50 = vadd.f32 %v1652_v8, %v918_v16  ;;  %v929_v57 = vmul.f32 %v1652_v8, %v2998_v53  ;;  %vm1031_vm9 = vmor %vm1029_vm8, %vm1030_vm7 }
 0x3a5   :  { %v1026_v61 = vsub.f32 1.0, %v1025_v46 }
 0x3a6   :  { %v1006_v62 = vmul.f32 %v1648_v14, %v1005_v45  ;;  %932 = vperm.xlu1 %1585, %v929_v57  }
 0x3a7   :  { %v1027_v39 = vmul.f32 %v1650_v22, %v1026_v61 }
 0x3a8   :  { %v1007_v15 = vadd.f32 %v1648_v14, %v1006_v62 }
 0x3a9   :  { %v1028_v44 = vadd.f32 %v1650_v22, %v1027_v39 }
 0x3aa   :  { %v1011_v32 = vsel %vm1010_vm5, %v1648_v14, %v1007_v15 }
 0x3ab   :  { %v1016_v37 = vsel %vm1013_vm6, %v1015_v47, %v1011_v32  ;;  %v1032_v13 = vsel %vm1031_vm9, %v1650_v22, %v1028_v44 }
 0x3ac   :  { %v1041_v31 = vmul.f32 %v1040_v38, %v1016_v37  ;;  %v1037_v63 = vsel %vm1034_vm10, %v1036_v21, %v1032_v13  ;;  %v3002_v37 = vld [vmem:[#allocation23_spill] sm:$0xff] }
 0x3ad   :  { %v1044_v0 = vsub.f32 1.0, %v1037_v63  ;;  %v1046_v55 = vmul.f32 %v1037_v63, %v2668_v51  ;;  %v331_v44 = vadd.f32 %v3002_v37, %v2301_v60 }
 0x3ae   :  { %v1042_v27 = vadd.f32 %v1041_v31, %v328_v2 }
 0x3b0   :  { %1653 = vtanh.f32 %v1042_v27 }
 0x3b6   :  { %v1654_v59 = vpop.eup %1653 }
 0x3b7   :  { %v1045_v56 = vmul.f32 %v1654_v59, %v1044_v0 }
 0x3b9   :  { %v2756_v11 = vadd.f32 %v1046_v55, %v1045_v56 }
 0x3bb   :  { %1094 = vmatmul.f32.vlgmr.msra.gmra.mxu1 %v2756_v11  ;;  %1114 = vmatmul.f32.vlgmr.msra.gmra.mxu2 %v2756_v11  ;;  %v1048_v4 = vmul.f32 %v2763_v19, %v2756_v11 }
 0x3bc   :  { %1134 = vmatmul.f32.vlgmr.msrb.gmra.mxu3 %v2756_v11  ;;  %1400 = vmatpush.msra.mxu1 %v2530_v30 }
 0x3bd   :  { %1049 = vadd.xlane.f32.xlu2 %v1048_v4 }
 0x3be   :  { %1401 = vmatpush.msra.mxu1 %v2537_v29 }
 0x3c0   :  { %1402 = vmatpush.msra.mxu1 %v2544_v40 }
 0x3c2   :  { %1403 = vmatpush.msra.mxu1 %v2551_v9 }
 0x3c4   :  { %1404 = vmatpush.msra.mxu1 %v2558_v52 }
 0x3c6   :  { %1405 = vmatpush.msra.mxu1 %v2565_v42 }
 0x3c8   :  { %1406 = vmatpush.msra.mxu1 %v2572_v43 }
 0x3ca   :  { %1407 = vmatpush.msra.mxu1 %v2581_v34 }
 0x3cc   :  { %1408 = vmatpush.msra.mxu1 %v2585_v24  ;;  %v3000_v24 = vld [vmem:[#allocation34_spill] sm:$0xff] }
 0x3ce   :  { %1409 = vmatpush.msra.mxu1 %v2592_v23 }
 0x3d0   :  { %1410 = vmatpush.msra.mxu1 %v2599_v28 }
 0x3d2   :  { %1411 = vmatpush.msra.mxu1 %v2606_v35  ;;  %v3001_v35 = vld [vmem:[#allocation25_spill] sm:$0xff] }
 0x3d4   :  { %1412 = vmatpush.msra.mxu1 %v2613_v41  ;;  %v290_v41 = vadd.f32 %v3001_v35, %v2992_v26 }
 0x3d5   :  { %922 = vperm.xlu2 %1586, %v2740_v12  }
 0x3d6   :  { %1413 = vmatpush.msra.mxu1 %v2980_v33 }
 0x3d8   :  { %1414 = vmatpush.msra.mxu1 %v2983_v49  ;;  %v1068_v49 = vpop.permute.xlu0 %1067 }
 0x3da   :  { %1415 = vmatpush.msra.mxu1 %v2986_v54 }
 0x430   :  { %v1050_v30 = vpop.xlane.xlu2 %1049 }
 0x431   :  { %v1051_v29 = vadd.f32 %v1050_v30, %v2995_v10 }
 0x433   :  { %v2787_v40 = vmax.f32 %v2735_v18, %v1051_v29 }
 0x435   :  { %v1053_v9 = vsub.f32 %v2735_v18, %v2787_v40  ;;  %v1056_v52 = vsub.f32 %v1051_v29, %v2787_v40 }
 0x437   :  { %v1054_v42 = vmul.f32 1.442695, %v1053_v9  ;;  %v1057_v43 = vmul.f32 1.442695, %v1056_v52  ;;  %v2809_v9 = vld [vmem:[#allocation8] sm:$0xff]  ;;  %v933_v52 = vpop.permute.xlu1 %932 }
 0x438   :  { %v1095_v34 = vpop.f32.mrf.mxu1  ;;  %1349 = vrot.lane.b32.xlu0 %v2809_v9, %s1897_s6 }
 0x439   :  { %1655 = vpow2.f32 %v1054_v42  ;;  %v1139_v23 = vadd.f32 %v1095_v34, %v3000_v24  ;;  %v923_v42 = vpop.permute.xlu2 %922  ;;  %v935_v34 = vmul.f32 %v933_v52, %v2668_v51 }
 0x43a   :  { %1657 = vpow2.f32 %v1057_v43  ;;  %v925_v43 = vmul.f32 %v923_v42, %v2728_v36 }
 0x43b   :  { %v1559_v28 = vmul.f32 -1.442695, %v1139_v23 }
 0x43c   :  { %v936_v24 = vadd.f32 %v935_v34, %v925_v43 }
 0x43d   :  { %1659 = vpow2.f32 %v1559_v28 }
 0x43e   :  { %v1115_v33 = vpop.f32.mrf.mxu2 }
 0x43f   :  { %v1656_v54 = vpop.eup %1655  ;;  %v1160_v3 = vadd.f32 %v1115_v33, %v290_v41  ;;  %v1135_v7 = vpop.f32.mrf.mxu3 }
 0x440   :  { %v1658_v12 = vpop.eup %1657  ;;  %v1059_v18 = vmul.f32 %v1656_v54, %v2744_v50  ;;  %1063 = vperm.xlu1 %1585, %v1656_v54   ;;  %v1181_v32 = vadd.f32 %v2750_v1, %v1135_v7 }
 0x441   :  { %v1560_v14 = vmul.f32 -1.442695, %v1160_v3  ;;  %v1070_v25 = vmul.f32 %v1658_v12, %v1068_v49  ;;  %v3003_v49 = vld [vmem:[#allocation27_spill] sm:$0xff] }
 0x442   :  { %v2796_v16 = vadd.f32 %v1658_v12, %v1059_v18  ;;  %v293_v54 = vadd.f32 %v3003_v49, %v2992_v26 }
 0x443   :  { %v1660_v22 = vpop.eup %1659  ;;  %1661 = vpow2.f32 %v1560_v14  ;;  %1073 = vperm.xlu2 %1586, %v1070_v25   ;;  %v3004_v25 = vld [vmem:[#allocation35_spill] sm:$0xff] }
 0x444   :  { %v1143_v48 = vadd.f32 1.0, %v1660_v22 }
 0x446   :  { %1663 = vrcp.f32 %v1143_v48  ;;  %v1155_v58 = vand.u32 2147483648, %v1143_v48  ;;  %v1153_v50 = vand.u32 2147483647, %v1143_v48  ;;  %vm1149_vm12 = vweird.f32 %v1143_v48 }
 0x448   :  { %v1156_v15 = vor.u32 1.1754944e-38, %v1155_v58  ;;  %vm1154_vm14 = vcmp.eq.f32.partialorder %v1153_v50, 8.507059e+37 }
 0x449   :  { %v1662_v8 = vpop.eup %1661 }
 0x44a   :  { %v1164_v46 = vadd.f32 1.0, %v1662_v8 }
 0x44c   :  { %v1664_v45 = vpop.eup %1663  ;;  %1665 = vrcp.f32 %v1164_v46  ;;  %v1176_v31 = vand.u32 2147483648, %v1164_v46  ;;  %v1174_v5 = vand.u32 2147483647, %v1164_v46  ;;  %vm1170_vm1 = vweird.f32 %v1164_v46 }
 0x44d   :  { %v1145_v53 = vmul.f32 %v1664_v45, %v1143_v48  ;;  %vm1150_vm11 = vweird.f32 %v1664_v45 }
 0x44e   :  { %vm1151_vm13 = vmor %vm1149_vm12, %vm1150_vm11  ;;  %v1177_v21 = vor.u32 1.1754944e-38, %v1176_v31  ;;  %vm1175_vm3 = vcmp.eq.f32.partialorder %v1174_v5, 8.507059e+37 }
 0x44f   :  { %v1146_v57 = vsub.f32 1.0, %v1145_v53 }
 0x451   :  { %v1147_v61 = vmul.f32 %v1664_v45, %v1146_v57 }
 0x452   :  { %v1666_v62 = vpop.eup %1665 }
 0x453   :  { %v1166_v20 = vmul.f32 %v1666_v62, %v1164_v46  ;;  %v1148_v39 = vadd.f32 %v1664_v45, %v1147_v61  ;;  %vm1171_vm15 = vweird.f32 %v1666_v62 }
 0x454   :  { %vm1172_vm2 = vmor %vm1170_vm1, %vm1171_vm15 }
 0x455   :  { %v1167_v47 = vsub.f32 1.0, %v1166_v20  ;;  %v1152_v38 = vsel %vm1151_vm13, %v1664_v45, %v1148_v39 }
 0x456   :  { %v1157_v6 = vsel %vm1154_vm14, %v1156_v15, %v1152_v38 }
 0x457   :  { %v1168_v2 = vmul.f32 %v1666_v62, %v1167_v47  ;;  %v1182_v17 = vmul.f32 %v1181_v32, %v1157_v6 }
 0x459   :  { %v1169_v27 = vadd.f32 %v1666_v62, %v1168_v2  ;;  %v1183_v13 = vadd.f32 %v1182_v17, %v331_v44 }
 0x45b   :  { %v1173_v63 = vsel %vm1172_vm2, %v1666_v62, %v1169_v27  ;;  %1667 = vtanh.f32 %v1183_v13 }
 0x45c   :  { %v1178_v0 = vsel %vm1175_vm3, %v1177_v21, %v1173_v63  ;;  %v3005_v21 = vld [vmem:[#allocation37_spill] sm:$0xff] }
 0x45d   :  { %v1185_v59 = vsub.f32 1.0, %v1178_v0  ;;  %v1187_v4 = vmul.f32 %v1178_v0, %v2756_v11  ;;  %v334_v63 = vadd.f32 %v3005_v21, %v2301_v60 }
 0x461   :  { %v1668_v56 = vpop.eup %1667 }
 0x462   :  { %v1186_v55 = vmul.f32 %v1668_v56, %v1185_v59 }
 0x464   :  { %v2802_v30 = vadd.f32 %v1187_v4, %v1186_v55 }
 0x466   :  { %1235 = vmatmul.f32.vlgmr.msrb.gmra.mxu0 %v2802_v30  ;;  %1255 = vmatmul.f32.vlgmr.msrb.gmra.mxu1 %v2802_v30  ;;  %v1189_v29 = vmul.f32 %v2763_v19, %v2802_v30 }
 0x467   :  { %1275 = vmatmul.f32.vlgmr.msrb.gmra.mxu2 %v2802_v30 }
 0x46a   :  { %1190 = vadd.xlane.f32.xlu1 %v1189_v29 }
 0x483   :  { %1208 = vrot.lane.b32.xlu1 %v2809_v9, %s1898_s16 }
 0x4b2   :  { %v1064_v23 = vpop.permute.xlu1 %1063 }
 0x4b3   :  { %v2815_v28 = vmul.f32 %v1064_v23, %v936_v24 }
 0x4dd   :  { %v1191_v35 = vpop.xlane.xlu1 %1190 }
 0x4de   :  { %v1192_v41 = vadd.f32 %v1191_v35, %v2995_v10 }
 0x4e0   :  { %v2819_v33 = vmax.f32 %v2787_v40, %v1192_v41 }
 0x4e2   :  { %v1194_v3 = vsub.f32 %v2787_v40, %v2819_v33  ;;  %v1197_v36 = vsub.f32 %v1192_v41, %v2819_v33  ;;  %v1350_v41 = vpop.permute.xlu0 %1349 }
 0x4e3   :  { %v1236_v12 = vpop.f32.mrf.mxu0  ;;  %v1256_v51 = vpop.f32.mrf.mxu1 }
 0x4e4   :  { %v1195_v18 = vmul.f32 1.442695, %v1194_v3  ;;  %v1198_v14 = vmul.f32 1.442695, %v1197_v36  ;;  %v1280_v22 = vadd.f32 %v1236_v12, %v3004_v25  ;;  %v1301_v48 = vadd.f32 %v1256_v51, %v293_v54  ;;  %v3006_v51 = vld [vmem:[#allocation38_spill] sm:$0xff] }
 0x4e6   :  { %1669 = vpow2.f32 %v1195_v18  ;;  %v1561_v8 = vmul.f32 -1.442695, %v1280_v22  ;;  %v1562_v46 = vmul.f32 -1.442695, %v1301_v48  ;;  %v296_v18 = vadd.f32 %v3006_v51, %v2992_v26 }
 0x4e7   :  { %1671 = vpow2.f32 %v1198_v14 }
 0x4e8   :  { %1673 = vpow2.f32 %v1561_v8 }
 0x4e9   :  { %1675 = vpow2.f32 %v1562_v46 }
 0x4ea   :  { %v1276_v6 = vpop.f32.mrf.mxu2 }
 0x4eb   :  { %v1322_v5 = vadd.f32 %v2750_v1, %v1276_v6 }
 0x4ec   :  { %v1670_v45 = vpop.eup %1669 }
 0x4ed   :  { %v2827_v53 = vpop.eup %1671  ;;  %v1200_v40 = vmul.f32 %v1670_v45, %v2796_v16  ;;  %1204 = vperm.xlu2 %1586, %v1670_v45  }
 0x4ee   :  { %v1674_v57 = vpop.eup %1673 }
 0x4ef   :  { %v1676_v58 = vpop.eup %1675  ;;  %v2831_v61 = vadd.f32 %v2827_v53, %v1200_v40  ;;  %v1284_v50 = vadd.f32 1.0, %v1674_v57  ;;  %v3007_v40 = vld [vmem:[#allocation36_spill] sm:$0xff] }
 0x4f0   :  { %v1305_v62 = vadd.f32 1.0, %v1676_v58 }
 0x4f1   :  { %1677 = vrcp.f32 %v1284_v50  ;;  %v1296_v32 = vand.u32 2147483648, %v1284_v50  ;;  %v1294_v16 = vand.u32 2147483647, %v1284_v50  ;;  %vm1290_vm5 = vweird.f32 %v1284_v50 }
 0x4f2   :  { %1679 = vrcp.f32 %v1305_v62  ;;  %v1317_v0 = vand.u32 2147483648, %v1305_v62  ;;  %vm1311_vm9 = vweird.f32 %v1305_v62  ;;  %v1315_v56 = vand.u32 2147483647, %v1305_v62 }
 0x4f3   :  { %v1297_v31 = vor.u32 1.1754944e-38, %v1296_v32  ;;  %vm1295_vm7 = vcmp.eq.f32.partialorder %v1294_v16, 8.507059e+37 }
 0x4f4   :  { %v1318_v29 = vor.u32 1.1754944e-38, %v1317_v0  ;;  %vm1316_vm11 = vcmp.eq.f32.partialorder %v1315_v56, 8.507059e+37 }
 0x4f7   :  { %v1678_v7 = vpop.eup %1677 }
 0x4f8   :  { %v1680_v20 = vpop.eup %1679  ;;  %v1286_v39 = vmul.f32 %v1678_v7, %v1284_v50  ;;  %vm1291_vm4 = vweird.f32 %v1678_v7 }
 0x4f9   :  { %v1307_v15 = vmul.f32 %v1680_v20, %v1305_v62  ;;  %vm1292_vm6 = vmor %vm1290_vm5, %vm1291_vm4  ;;  %vm1312_vm8 = vweird.f32 %v1680_v20 }
 0x4fa   :  { %v1287_v47 = vsub.f32 1.0, %v1286_v39  ;;  %vm1313_vm10 = vmor %vm1311_vm9, %vm1312_vm8 }
 0x4fb   :  { %v1308_v38 = vsub.f32 1.0, %v1307_v15 }
 0x4fc   :  { %v1288_v37 = vmul.f32 %v1678_v7, %v1287_v47 }
 0x4fd   :  { %v1309_v44 = vmul.f32 %v1680_v20, %v1308_v38 }
 0x4fe   :  { %v1289_v2 = vadd.f32 %v1678_v7, %v1288_v37 }
 0x4ff   :  { %v1310_v27 = vadd.f32 %v1680_v20, %v1309_v44 }
 0x500   :  { %v1293_v17 = vsel %vm1292_vm6, %v1678_v7, %v1289_v2 }
 0x501   :  { %v1298_v13 = vsel %vm1295_vm7, %v1297_v31, %v1293_v17  ;;  %v1314_v4 = vsel %vm1313_vm10, %v1680_v20, %v1310_v27 }
 0x502   :  { %v1323_v59 = vmul.f32 %v1322_v5, %v1298_v13  ;;  %v1319_v52 = vsel %vm1316_vm11, %v1318_v29, %v1314_v4 }
 0x503   :  { %v1326_v42 = vsub.f32 1.0, %v1319_v52  ;;  %v1328_v24 = vmul.f32 %v1319_v52, %v2802_v30 }
 0x504   :  { %v1324_v55 = vadd.f32 %v1323_v59, %v334_v63  ;;  %v3008_v59 = vld [vmem:[#allocation40_spill] sm:$0xff] }
 0x505   :  { %v337_v56 = vadd.f32 %v3008_v59, %v2301_v60  ;;  %v1209_v60 = vpop.permute.xlu1 %1208 }
 0x506   :  { %1681 = vtanh.f32 %v1324_v55 }
 0x50c   :  { %v1682_v43 = vpop.eup %1681 }
 0x50d   :  { %v1327_v34 = vmul.f32 %v1682_v43, %v1326_v42 }
 0x50f   :  { %v2837_v23 = vadd.f32 %v1328_v24, %v1327_v34 }
 0x511   :  { %1376 = vmatmul.f32.vlgmr.msra.gmra.mxu3 %v2837_v23  ;;  %1396 = vmatmul.f32.vlgmr.msra.gmra.mxu0 %v2837_v23  ;;  %v1330_v35 = vmul.f32 %v2763_v19, %v2837_v23 }
 0x512   :  { %1416 = vmatmul.f32.vlgmr.msra.gmra.mxu1 %v2837_v23 }
 0x513   :  { %1331 = vadd.xlane.f32.xlu0 %v1330_v35 }
 0x586   :  { %v1332_v49 = vpop.xlane.xlu0 %1331 }
 0x587   :  { %v1333_v54 = vadd.f32 %v1332_v49, %v2995_v10 }
 0x589   :  { %v2846_v3 = vmax.f32 %v2819_v33, %v1333_v54 }
 0x58b   :  { %v1335_v36 = vsub.f32 %v2819_v33, %v2846_v3  ;;  %v1338_v12 = vsub.f32 %v1333_v54, %v2846_v3 }
 0x58d   :  { %v1336_v14 = vmul.f32 1.442695, %v1335_v36  ;;  %v1339_v25 = vmul.f32 1.442695, %v1338_v12  ;;  %v1211_v36 = vmul.f32 %v2827_v53, %v1209_v60 }
 0x58e   :  { %v1397_v22 = vpop.f32.mrf.mxu0 }
 0x58f   :  { %1683 = vpow2.f32 %v1336_v14  ;;  %v1442_v48 = vadd.f32 %v1397_v22, %v296_v18  ;;  %v1417_v31 = vpop.f32.mrf.mxu1 }
 0x590   :  { %1685 = vpow2.f32 %v1339_v25  ;;  %v1463_v13 = vadd.f32 %v2750_v1, %v1417_v31 }
 0x591   :  { %v1564_v8 = vmul.f32 -1.442695, %v1442_v48 }
 0x593   :  { %1687 = vpow2.f32 %v1564_v8 }
 0x594   :  { %v1377_v46 = vpop.f32.mrf.mxu3 }
 0x595   :  { %v1684_v45 = vpop.eup %1683  ;;  %v1421_v57 = vadd.f32 %v1377_v46, %v3007_v40 }
 0x596   :  { %v1686_v58 = vpop.eup %1685  ;;  %1345 = vperm.xlu2 %1586, %v1684_v45   ;;  %v1341_v33 = vmul.f32 %v1684_v45, %v2831_v61 }
 0x597   :  { %v1563_v50 = vmul.f32 -1.442695, %v1421_v57  ;;  %v1352_v62 = vmul.f32 %v1686_v58, %v1350_v41 }
 0x598   :  { %v2855_v7 = vadd.f32 %v1686_v58, %v1341_v33 }
 0x599   :  { %v1688_v26 = vpop.eup %1687  ;;  %1689 = vpow2.f32 %v1563_v50 }
 0x59a   :  { %v1446_v20 = vadd.f32 1.0, %v1688_v26 }
 0x59c   :  { %1691 = vrcp.f32 %v1446_v20  ;;  %v1458_v55 = vand.u32 2147483648, %v1446_v20  ;;  %vm1452_vm2 = vweird.f32 %v1446_v20  ;;  %v1456_v29 = vand.u32 2147483647, %v1446_v20 }
 0x59e   :  { %v1459_v43 = vor.u32 1.1754944e-38, %v1458_v55  ;;  %vm1457_vm4 = vcmp.eq.f32.partialorder %v1456_v29, 8.507059e+37 }
 0x59f   :  { %v1690_v39 = vpop.eup %1689 }
 0x5a0   :  { %v1425_v15 = vadd.f32 1.0, %v1690_v39 }
 0x5a2   :  { %1693 = vrcp.f32 %v1425_v15  ;;  %v1692_v47 = vpop.eup %1691  ;;  %v1437_v6 = vand.u32 2147483648, %v1425_v15  ;;  %v1435_v61 = vand.u32 2147483647, %v1425_v15  ;;  %vm1431_vm13 = vweird.f32 %v1425_v15 }
 0x5a3   :  { %v1448_v38 = vmul.f32 %v1692_v47, %v1446_v20  ;;  %vm1453_vm1 = vweird.f32 %v1692_v47 }
 0x5a4   :  { %v1438_v27 = vor.u32 1.1754944e-38, %v1437_v6  ;;  %vm1436_vm15 = vcmp.eq.f32.partialorder %v1435_v61, 8.507059e+37  ;;  %vm1454_vm3 = vmor %vm1452_vm2, %vm1453_vm1 }
 0x5a5   :  { %v1449_v16 = vsub.f32 1.0, %v1448_v38 }
 0x5a7   :  { %v1450_v17 = vmul.f32 %v1692_v47, %v1449_v16 }
 0x5a8   :  { %v1694_v32 = vpop.eup %1693 }
 0x5a9   :  { %v1427_v37 = vmul.f32 %v1694_v32, %v1425_v15  ;;  %vm1432_vm12 = vweird.f32 %v1694_v32  ;;  %v1451_v0 = vadd.f32 %v1692_v47, %v1450_v17 }
 0x5aa   :  { %vm1433_vm14 = vmor %vm1431_vm13, %vm1432_vm12 }
 0x5ab   :  { %v1428_v44 = vsub.f32 1.0, %v1427_v37  ;;  %v1455_v42 = vsel %vm1454_vm3, %v1692_v47, %v1451_v0 }
 0x5ac   :  { %v1460_v34 = vsel %vm1457_vm4, %v1459_v43, %v1455_v42 }
 0x5ad   :  { %v1429_v2 = vmul.f32 %v1694_v32, %v1428_v44  ;;  %v1467_v1 = vsub.f32 1.0, %v1460_v34  ;;  %v1469_v41 = vmul.f32 %v1460_v34, %v2837_v23 }
 0x5af   :  { %v1430_v5 = vadd.f32 %v1694_v32, %v1429_v2 }
 0x5b1   :  { %v1434_v21 = vsel %vm1433_vm14, %v1694_v32, %v1430_v5 }
 0x5b2   :  { %v1439_v63 = vsel %vm1436_vm15, %v1438_v27, %v1434_v21 }
 0x5b3   :  { %v1464_v4 = vmul.f32 %v1463_v13, %v1439_v63 }
 0x5b5   :  { %v1465_v52 = vadd.f32 %v1464_v4, %v337_v56 }
 0x5b7   :  { %1695 = vtanh.f32 %v1465_v52 }
 0x5bd   :  { %v1696_v24 = vpop.eup %1695 }
 0x5be   :  { %v1468_v35 = vmul.f32 %v1696_v24, %v1467_v1 }
 0x5c0   :  { %v1470_v49 = vadd.f32 %v1469_v41, %v1468_v35 }
 0x5c2   :  { %v1471_v54 = vmul.f32 %v2763_v19, %v1470_v49 }
 0x5c4   :  { %1472 = vadd.xlane.f32.xlu0 %v1471_v54 }
 0x5d8   :  { %1490 = vrot.lane.b32.xlu0 %v2809_v9, %s1899_s17 }
 0x5e0   :  { %1214 = vperm.xlu0 %1584, %v1211_v36  }
 0x5e8   :  { %1355 = vperm.xlu0 %1584, %v1352_v62  }
 0x637   :  { %v1473_v12 = vpop.xlane.xlu0 %1472 }
 0x638   :  { %v1474_v51 = vadd.f32 %v1473_v12, %v2995_v10  ;;  %v1074_v10 = vpop.permute.xlu2 %1073 }
 0x639   :  { %v1076_v62 = vmul.f32 %v1074_v10, %v2756_v11 }
 0x63a   :  { %v1475_v18 = vmax.f32 %v2846_v3, %v1474_v51 }
 0x63c   :  { %v1476_v14 = vsub.f32 %v2846_v3, %v1475_v18  ;;  %v1479_v25 = vsub.f32 %v1474_v51, %v1475_v18  ;;  %1503 = vst.msk [vmem:[#allocation4] sm:$0xff] %vm97_vm0, %v1475_v18 }
 0x63e   :  { %v1477_v19 = vmul.f32 1.442695, %v1476_v14  ;;  %v1480_v22 = vmul.f32 1.442695, %v1479_v25 }
 0x640   :  { %1697 = vpow2.f32 %v1477_v19  ;;  %v1205_v3 = vpop.permute.xlu2 %1204 }
 0x641   :  { %1699 = vpow2.f32 %v1480_v22 }
 0x646   :  { %v1698_v9 = vpop.eup %1697 }
 0x647   :  { %1486 = vperm.xlu1 %1585, %v1698_v9   ;;  %v1482_v53 = vmul.f32 %v1698_v9, %v2855_v7  ;;  %v1700_v48 = vpop.eup %1699  ;;  %v1077_v7 = vadd.f32 %v1076_v62, %v2815_v28 }
 0x648   :  { %v1346_v40 = vpop.permute.xlu2 %1345 }
 0x649   :  { %v1483_v8 = vadd.f32 %v1700_v48, %v1482_v53  ;;  %v1207_v39 = vmul.f32 %v1205_v3, %v1077_v7 }
 0x64a   :  { %v1491_v46 = vpop.permute.xlu0 %1490 }
 0x64b   :  { %v1493_v45 = vmul.f32 %v1700_v48, %v1491_v46  ;;  %1511 = vperm.xlu2 %1586, %v1483_v8   ;;  %1504 = vst.msk [vmem:[#allocation5] sm:$0xff] %vm97_vm0, %v1483_v8 }
 0x64d   :  { %1496 = vperm.xlu0 %1584, %v1493_v45  }
 0x652   :  { %v1215_v33 = vpop.permute.xlu0 %1214 }
 0x653   :  { %v1217_v26 = vmul.f32 %v1215_v33, %v2802_v30 }
 0x655   :  { %v1218_v47 = vadd.f32 %v1217_v26, %v1207_v39 }
 0x657   :  { %v1348_v16 = vmul.f32 %v1346_v40, %v1218_v47 }
 0x65a   :  { %v1356_v15 = vpop.permute.xlu0 %1355 }
 0x65b   :  { %v1358_v32 = vmul.f32 %v1356_v15, %v2837_v23 }
 0x65d   :  { %v1359_v61 = vadd.f32 %v1358_v32, %v1348_v16 }
 0x6a5   :  { %v1512_v57 = vpop.permute.xlu2 %1511 }
 0x6a6   :  { %1701 = vrcp.f32 %v1512_v57  ;;  %v1525_v44 = vand.u32 2147483648, %v1512_v57  ;;  %vm1519_vm5 = vweird.f32 %v1512_v57  ;;  %v1523_v2 = vand.u32 2147483647, %v1512_v57 }
 0x6a8   :  { %v1526_v17 = vor.u32 1.1754944e-38, %v1525_v44  ;;  %vm1524_vm7 = vcmp.eq.f32.partialorder %v1523_v2, 8.507059e+37 }
 0x6ac   :  { %v1702_v58 = vpop.eup %1701 }
 0x6ad   :  { %v1515_v50 = vmul.f32 %v1702_v58, %v1512_v57  ;;  %vm1520_vm0 = vweird.f32 %v1702_v58 }
 0x6ae   :  { %vm1521_vm6 = vmor %vm1519_vm5, %vm1520_vm0 }
 0x6af   :  { %v1516_v20 = vsub.f32 1.0, %v1515_v50 }
 0x6b1   :  { %v1517_v38 = vmul.f32 %v1702_v58, %v1516_v20 }
 0x6b3   :  { %v1518_v37 = vadd.f32 %v1702_v58, %v1517_v38 }
 0x6b5   :  { %v1522_v30 = vsel %vm1521_vm6, %v1702_v58, %v1518_v37 }
 0x6b6   :  { %v1527_v5 = vsel %vm1524_vm7, %v1526_v17, %v1522_v30 }
 0x6b9   :  { %v1487_v6 = vpop.permute.xlu1 %1486 }
 0x6ba   :  { %v1489_v28 = vmul.f32 %v1487_v6, %v1359_v61 }
 0x6bf   :  { %v1497_v11 = vpop.permute.xlu0 %1496 }
 0x6c0   :  { %v1499_v31 = vmul.f32 %v1497_v11, %v1470_v49 }
 0x6c2   :  { %v1500_v23 = vadd.f32 %v1499_v31, %v1489_v28 }
 0x6c4   :  { %v1528_v27 = vmul.f32 %v1527_v5, %v1500_v23 }
 0x6c6   :  { %1529 = vst [vmem:[#allocation16] sm:$0xff] %v1528_v27 }
 0x6c7   :  { %1540 = dma.vmem_to_hbm [thread:$0]  %s1536_s19, 128, %s1538_s21, [#allocation10]  }
 0x6c8   :  { %1880 = dma.done.wait [#allocation10], 128  }
 0x6c9   :  { %1881 = vsyncadd [#allocation10], 4294967168 }
 0x6ca   :  { %1545 = vsyncpa [#allocation9], 1 }
 0x6cb   :  { %1546 = vsyncpa [#allocation12], 1 }
 0x6cc   :  { %1547 = vsyncpa [#allocation15], 1 }
 0x6cd   :  { %1548 = vsyncpa [#allocation10], 1 }

</bundles_post_ra>
